<compile_context>
chip_gen: v7x
topology: tpu7x:2x2x1
jax: 0.10.0
libtpu: 0.0.40
codegen_flags: <defaults>
</compile_context>

<pallas_src>
import numpy as np
import jax
import jax.numpy as jnp
from jax.experimental import pallas as pl
from jax.experimental.pallas import tpu as pltpu

# ----------------------------------------------------------------------------
# Synthetic config (consistent with SingleTemplateEmbedding.__init__)
# ----------------------------------------------------------------------------
NUM_RES   = 16                      # num_res
NUM_BINS  = 15                      # config.template_dgrame_dim == dgram num_bins
MIN_BIN   = 3.25
MAX_BIN   = 50.75
AATYPE_NC = 22                      # one-hot classes (template_aatype_dim)
NUM_CH    = 32                      # triangle_attention_ending_node.value_dim
INPUT_DIM = NUM_BINS + 2 * AATYPE_NC + 5      # = 64
USE_TEMPLATE_UNIT_VECTOR = True
NUM_ATOMS = 37
ATOM_N, ATOM_CA, ATOM_C = 0, 1, 2   # residue_constants.atom_order['N','CA','C']
LN_EPS = 1e-5                       # torch.nn.LayerNorm default eps
TILE_I = 8                          # i-rows per grid step (2 steps at NUM_RES=16)

# packed per-residue feature table columns: [N, FEAT_COLS]
#   pb(3) | pbmask(1) | ca(3) | bbmask(1) | rot9(9) | tk(3) | aati(32) | aatj(32)
_PB, _PBM, _CA, _BB, _ROT, _TK, _AI, _AJ = 0, 3, 4, 7, 8, 17, 20, 52
FEAT_COLS = _AJ + NUM_CH            # 84

# packed parameter/constant rows: [WPACK_ROWS, NUM_CH]
_WD, _WPBM, _WUX, _WUY, _WUZ, _WBBM = 0, 15, 16, 17, 18, 19
_WBIAS, _WGAMMA, _WBETA = 20, 21, 22
_BLO, _BHI = 23, 24                 # squared dgram bin edges (first 15 lanes)
WPACK_ROWS = 25


# ----------------------------------------------------------------------------
# Glue: quat_affine.make_transform_from_reference (per-residue, O(N), plain JAX)
# ----------------------------------------------------------------------------
def make_transform_from_reference(n_xyz, ca_xyz, c_xyz):
  """Rotation/translation mapping the canonical backbone frame onto N/CA/C."""
  translation = ca_xyz
  n_xyz = n_xyz - translation
  c_xyz = c_xyz - translation

  c_x, c_y, c_z = c_xyz[:, 0], c_xyz[:, 1], c_xyz[:, 2]
  norm1 = jnp.sqrt(1e-20 + c_x**2 + c_y**2)
  sin_c1, cos_c1 = -c_y / norm1, c_x / norm1
  zeros, ones = jnp.zeros_like(sin_c1), jnp.ones_like(sin_c1)
  c1 = jnp.stack([cos_c1, -sin_c1, zeros,
                  sin_c1,  cos_c1, zeros,
                  zeros,   zeros,  ones], axis=-1).reshape(-1, 3, 3)

  norm2 = jnp.sqrt(1e-20 + c_x**2 + c_y**2 + c_z**2)
  sin_c2 = c_z / norm2
  cos_c2 = jnp.sqrt(c_x**2 + c_y**2) / norm2
  c2 = jnp.stack([cos_c2, zeros, sin_c2,
                  zeros,  ones,  zeros,
                  -sin_c2, zeros, cos_c2], axis=-1).reshape(-1, 3, 3)

  c_rot = jnp.einsum('nij,njk->nik', c2, c1)
  n_xyz = jnp.einsum('nij,nj->ni', c_rot, n_xyz)

  n_y, n_z = n_xyz[:, 1], n_xyz[:, 2]
  norm3 = jnp.sqrt(1e-20 + n_y**2 + n_z**2)
  sin_n, cos_n = -n_z / norm3, n_y / norm3
  n_rot = jnp.stack([ones,  zeros, zeros,
                     zeros, cos_n, -sin_n,
                     zeros, sin_n,  cos_n], axis=-1).reshape(-1, 3, 3)

  rot = jnp.einsum('nij,njk->nik', n_rot, c_rot)
  return jnp.transpose(rot, (0, 2, 1)), translation


# ----------------------------------------------------------------------------
# Pallas kernel: one block of TILE_I residue rows (all j) per grid step.
# ----------------------------------------------------------------------------
def _ste_kernel(fi_ref, fj_ref, wp_ref, out_ref):
  ti, f = fi_ref.shape              # (TILE_I, FEAT_COLS)
  nj = fj_ref.shape[0]              # num_res (all j)

  fi = fi_ref[...]                  # [TILE_I, F]  per-residue i-block features
  fj = fj_ref[...]                  # [N, F]       per-residue j features

  # Flatten the (i, j) pair block to M = TILE_I * N rows using only 2-D
  # broadcasts and tile-aligned sublane concats (no 3-D relayouts).
  fi_flat = jnp.concatenate(
      [jnp.broadcast_to(fi[i:i + 1, :], (nj, f)) for i in range(ti)], axis=0)
  fj_flat = jnp.concatenate([fj] * ti, axis=0)                  # [M, F]

  wp = wp_ref[...]                                              # [25, 32]
  wd    = wp[_WD:_WD + NUM_BINS]                                # [15, 32]
  wpbm  = wp[_WPBM:_WPBM + 1]
  wux   = wp[_WUX:_WUX + 1]
  wuy   = wp[_WUY:_WUY + 1]
  wuz   = wp[_WUZ:_WUZ + 1]
  wbbm  = wp[_WBBM:_WBBM + 1]
  bias  = wp[_WBIAS:_WBIAS + 1]
  gamma = wp[_WGAMMA:_WGAMMA + 1]
  beta  = wp[_WBETA:_WBETA + 1]
  lower = wp[_BLO:_BLO + 1, :NUM_BINS]                          # [1, 15]
  upper = wp[_BHI:_BHI + 1, :NUM_BINS]                          # [1, 15]

  # dgram_from_positions
  d = fi_flat[:, _PB:_PB + 3] - fj_flat[:, _PB:_PB + 3]         # [M, 3]
  dist2 = jnp.sum(d * d, axis=-1, keepdims=True)                # [M, 1]
  dgram = ((dist2 > lower).astype(jnp.float32) *
           (dist2 < upper).astype(jnp.float32))                 # [M, 15]

  # pair masks
  pbm2d = fi_flat[:, _PBM:_PBM + 1] * fj_flat[:, _PBM:_PBM + 1]  # [M, 1]
  bb2d  = fi_flat[:, _BB:_BB + 1] * fj_flat[:, _BB:_BB + 1]      # [M, 1]

  # QuatAffine.invert_point: av_k = R_i^T (t_j - t_i)
  #   = sum_m R[i][m,k] * t_j[m] + tk[i,k]   (tk precomputed in the wrapper)
  ca_j = fj_flat[:, _CA:_CA + 3]
  av = []
  for k in range(3):
    acc_k = fi_flat[:, _TK + k:_TK + k + 1]
    for m in range(3):
      col = _ROT + 3 * k + m
      acc_k = acc_k + fi_flat[:, col:col + 1] * ca_j[:, m:m + 1]
    av.append(acc_k)                                            # [M, 1]

  inv_d = jax.lax.rsqrt(1e-6 + av[0] * av[0] + av[1] * av[1] + av[2] * av[2])
  inv_d = inv_d * bb2d
  if USE_TEMPLATE_UNIT_VECTOR:
    ux, uy, uz = av[0] * inv_d, av[1] * inv_d, av[2] * inv_d
  else:
    ux = uy = uz = jnp.zeros_like(inv_d)

  # embedding2d: (features * m2d) @ W + b, with m2d a per-pair scalar, so
  # (x * m2d) @ W == m2d * (x @ W).  The aatype one-hot matmuls were hoisted to
  # the wrapper (aati_emb / aatj_emb columns of the feature table).
  acc = jnp.dot(dgram, wd, preferred_element_type=jnp.float32)  # [M, 32] (MXU)
  acc = acc + fj_flat[:, _AJ:_AJ + NUM_CH] + fi_flat[:, _AI:_AI + NUM_CH]
  acc = acc + pbm2d * wpbm + ux * wux + uy * wuy + uz * wuz + bb2d * wbbm
  act = bb2d * acc + bias                                       # mask, then bias

  # TODO(synk): template_pair_stack with num_block=0 is the identity (inner block
  # sources not provided), so `act` passes straight to the output LayerNorm.

  mu = jnp.mean(act, axis=-1, keepdims=True)
  xc = act - mu
  var = jnp.mean(xc * xc, axis=-1, keepdims=True)
  y = xc * jax.lax.rsqrt(var + LN_EPS) * gamma + beta
  out_ref[...] = y.astype(out_ref.dtype)


# ----------------------------------------------------------------------------
# Wrapper (glue + pallas_call)
# ----------------------------------------------------------------------------
def single_template_embedding(query_embedding, batch, mask_2d, params,
                              tile_i=TILE_I):
  del mask_2d  # only used by the (num_block=0) pair stack
  dtype = query_embedding.dtype
  n = batch['template_aatype'].shape[0]
  assert n % tile_i == 0 and n % 8 == 0

  pb = batch['template_pseudo_beta'].astype(jnp.float32)
  pbmask = batch['template_pseudo_beta_mask'].astype(jnp.float32)
  aat = jax.nn.one_hot(batch['template_aatype'], AATYPE_NC, dtype=jnp.float32)

  pos = batch['template_all_atom_positions'].astype(jnp.float32)
  amask = batch['template_all_atom_masks'].astype(jnp.float32)
  rot, trans = make_transform_from_reference(
      n_xyz=pos[:, ATOM_N], ca_xyz=pos[:, ATOM_CA], c_xyz=pos[:, ATOM_C])
  bbmask = amask[:, ATOM_N] * amask[:, ATOM_CA] * amask[:, ATOM_C]

  # split embedding2d weight by feature group (channel order of the concat)
  w = params['embedding2d_w'].astype(jnp.float32)               # [64, 32]
  nb = NUM_BINS
  wd   = w[0:nb]
  wpbm = w[nb:nb + 1]
  waj  = w[nb + 1:nb + 1 + AATYPE_NC]
  wai  = w[nb + 1 + AATYPE_NC:nb + 1 + 2 * AATYPE_NC]
  wux  = w[nb + 45:nb + 46]
  wuy  = w[nb + 46:nb + 47]
  wuz  = w[nb + 47:nb + 48]
  wbbm = w[nb + 48:nb + 49]

  # Hoist the i-invariant / per-residue matmuls out of the pair kernel.
  aati_emb = aat @ wai                                          # [N, 32]
  aatj_emb = aat @ waj                                          # [N, 32]

  # Per-residue rotation columns (k-major) and the precomputed -R_i^T t_i term.
  rot_kmaj = jnp.transpose(rot, (0, 2, 1)).reshape(n, 9)        # col 3k+m = R[m,k]
  tk = -jnp.einsum('imk,im->ik', rot, trans)                    # [N, 3]

  # Packed per-residue feature table [N, 84]:
  #   pb(3) | pbmask(1) | ca(3) | bbmask(1) | rot9(9) | tk(3) | aati(32) | aatj(32)
  res_feats = jnp.concatenate(
      [pb, pbmask[:, None], trans, bbmask[:, None], rot_kmaj, tk,
       aati_emb, aatj_emb], axis=-1).astype(jnp.float32)
  feat_cols = res_feats.shape[-1]
  assert feat_cols == FEAT_COLS

  # dgram squared bin edges (padded to NUM_CH lanes, stored inside wpack).
  lower = jnp.square(jnp.linspace(MIN_BIN, MAX_BIN, NUM_BINS, dtype=jnp.float32))
  upper = jnp.concatenate([lower[1:], jnp.array([1e8], jnp.float32)])
  pad = jnp.zeros((NUM_CH - NUM_BINS,), jnp.float32)

  # All grid-invariant parameters/constants packed into one [25, 32] tensor.
  wpack = jnp.zeros((WPACK_ROWS, NUM_CH), jnp.float32)
  wpack = wpack.at[_WD:_WD + nb].set(wd)
  wpack = wpack.at[_WPBM].set(wpbm[0])
  wpack = wpack.at[_WUX].set(wux[0])
  wpack = wpack.at[_WUY].set(wuy[0])
  wpack = wpack.at[_WUZ].set(wuz[0])
  wpack = wpack.at[_WBBM].set(wbbm[0])
  wpack = wpack.at[_WBIAS].set(params['embedding2d_b'].astype(jnp.float32))
  wpack = wpack.at[_WGAMMA].set(params['ln_gamma'].astype(jnp.float32))
  wpack = wpack.at[_WBETA].set(params['ln_beta'].astype(jnp.float32))
  wpack = wpack.at[_BLO].set(jnp.concatenate([lower, pad]))
  wpack = wpack.at[_BHI].set(jnp.concatenate([upper, pad]))

  grid = (n // tile_i,)

  out_flat = pl.pallas_call(
      _ste_kernel,
      out_shape=jax.ShapeDtypeStruct((n * n, NUM_CH), dtype),
      grid=grid,
      in_specs=[
          pl.BlockSpec((tile_i, feat_cols), lambda b: (b, 0)),   # i-block view
          pl.BlockSpec((n, feat_cols), lambda b: (0, 0)),        # full j view
          pl.BlockSpec((WPACK_ROWS, NUM_CH), lambda b: (0, 0)),  # packed params
      ],
      out_specs=pl.BlockSpec((tile_i * n, NUM_CH), lambda b: (b, 0)),
      compiler_params=pltpu.CompilerParams(
          dimension_semantics=("parallel",)),
  )(res_feats, res_feats, wpack)
  return out_flat.reshape(n, n, NUM_CH)


# ----------------------------------------------------------------------------
# Pure-JAX reference of the same forward (for a correctness check)
# ----------------------------------------------------------------------------
def reference_forward(query_embedding, batch, mask_2d, params):
  del mask_2d
  dtype = query_embedding.dtype
  n = batch['template_aatype'].shape[0]
  pb = batch['template_pseudo_beta'].astype(jnp.float32)
  pbmask = batch['template_pseudo_beta_mask'].astype(jnp.float32)
  pbmask2d = (pbmask[:, None] * pbmask[None, :]).astype(dtype)

  lower = jnp.square(jnp.linspace(MIN_BIN, MAX_BIN, NUM_BINS, dtype=jnp.float32))
  upper = jnp.concatenate([lower[1:], jnp.array([1e8], jnp.float32)])
  dist2 = jnp.sum(jnp.square(pb[:, None, :] - pb[None, :, :]), -1, keepdims=True)
  dgram = (dist2 > lower).astype(dtype) * (dist2 < upper).astype(dtype)

  aat = jax.nn.one_hot(batch['template_aatype'], AATYPE_NC, dtype=dtype)
  aat_j = jnp.broadcast_to(aat[None, :, :], (n, n, AATYPE_NC))
  aat_i = jnp.broadcast_to(aat[:, None, :], (n, n, AATYPE_NC))

  pos = batch['template_all_atom_positions'].astype(jnp.float32)
  amask = batch['template_all_atom_masks'].astype(jnp.float32)
  rot, trans = make_transform_from_reference(
      pos[:, ATOM_N], pos[:, ATOM_CA], pos[:, ATOM_C])
  tdiff = trans[None, :, :] - trans[:, None, :]          # [i, j, m]
  affine_vec = jnp.einsum('imk,ijm->ijk', rot, tdiff)    # [i, j, k]
  bbmask = amask[:, ATOM_N] * amask[:, ATOM_CA] * amask[:, ATOM_C]
  bbmask2d = bbmask[:, None] * bbmask[None, :]
  inv_d = jax.lax.rsqrt(1e-6 + jnp.sum(jnp.square(affine_vec), -1)) * bbmask2d
  unit = affine_vec * inv_d[..., None]
  if not USE_TEMPLATE_UNIT_VECTOR:
    unit = jnp.zeros_like(unit)
  bbmask2d = bbmask2d.astype(dtype)

  act = jnp.concatenate(
      [dgram, pbmask2d[:, :, None], aat_j, aat_i, unit.astype(dtype),
       bbmask2d[..., None]], axis=-1)
  act = act * bbmask2d[..., None]
  act = act @ params['embedding2d_w'] + params['embedding2d_b']
  mu = jnp.mean(act, -1, keepdims=True)
  var = jnp.mean(jnp.square(act - mu), -1, keepdims=True)
  return ((act - mu) * jax.lax.rsqrt(var + LN_EPS) * params['ln_gamma']
          + params['ln_beta']).astype(dtype)


# ----------------------------------------------------------------------------
if __name__ == "__main__":
  key = jax.random.PRNGKey(0)
  ks = jax.random.split(key, 8)
  n = NUM_RES

  batch = {
      'template_aatype': jax.random.randint(ks[0], (n,), 0, AATYPE_NC),
      'template_pseudo_beta': 10.0 * jax.random.normal(ks[1], (n, 3), jnp.float32),
      'template_pseudo_beta_mask':
          (jax.random.uniform(ks[2], (n,)) > 0.15).astype(jnp.float32),
      'template_all_atom_positions':
          10.0 * jax.random.normal(ks[3], (n, NUM_ATOMS, 3), jnp.float32),
      'template_all_atom_masks':
          (jax.random.uniform(ks[4], (n, NUM_ATOMS)) > 0.1).astype(jnp.float32),
  }
  query_embedding = jax.random.normal(ks[5], (n, n, NUM_CH), jnp.float32)
  mask_2d = jnp.ones((n, n), jnp.float32)

  # deterministic synthetic parameters (Linear 'relu' init ~ He; LayerNorm default)
  params = {
      'embedding2d_w': (jnp.sqrt(2.0 / INPUT_DIM) *
                        jax.random.normal(ks[6], (INPUT_DIM, NUM_CH), jnp.float32)),
      'embedding2d_b': jnp.zeros((NUM_CH,), jnp.float32),
      'ln_gamma': jnp.ones((NUM_CH,), jnp.float32),
      'ln_beta': jnp.zeros((NUM_CH,), jnp.float32),
  }

  out = single_template_embedding(query_embedding, batch, mask_2d, params)
  out = jax.block_until_ready(out)

  ref = reference_forward(query_embedding, batch, mask_2d, params)
  np.testing.assert_allclose(np.asarray(out), np.asarray(ref), rtol=2e-2, atol=2e-2)
  print("KERNEL_OK")
</pallas_src>

<mosaic_0001>
module attributes {stable_mosaic.version = 11 : i64} {
  func.func @_ste_kernel(%arg0: i32, %arg1: memref<8x84xf32, #tpu.memory_space<vmem>>, %arg2: memref<16x84xf32, #tpu.memory_space<vmem>>, %arg3: memref<25x32xf32, #tpu.memory_space<vmem>>, %arg4: memref<128x32xf32, #tpu.memory_space<vmem>>) attributes {dimension_semantics = [#tpu.dimension_semantics<parallel>], iteration_bounds = array<i64: 2>, scalar_prefetch = 0 : i64, scratch_operands = 0 : i64, tpu.core_type = #tpu.core_type<tc>, window_params = [{transform_indices = @transform_0, window_bounds = array<i64: 8, 84>}, {pipeline_mode = #tpu.pipeline_mode<synchronous>, transform_indices = @transform_1, window_bounds = array<i64: 16, 84>}, {pipeline_mode = #tpu.pipeline_mode<synchronous>, transform_indices = @transform_2, window_bounds = array<i64: 25, 32>}, {transform_indices = @transform_3, window_bounds = array<i64: 128, 32>}]} {
    %c0 = arith.constant 0 : index
    %c0_0 = arith.constant 0 : index
    %0 = vector.load %arg1[%c0, %c0_0] : memref<8x84xf32, #tpu.memory_space<vmem>>, vector<8x84xf32>
    %c0_1 = arith.constant 0 : index
    %c0_2 = arith.constant 0 : index
    %1 = vector.load %arg2[%c0_1, %c0_2] : memref<16x84xf32, #tpu.memory_space<vmem>>, vector<16x84xf32>
    %2 = vector.extract_strided_slice %0 {offsets = [0, 0], sizes = [1, 84], strides = [1, 1]} : vector<8x84xf32> to vector<1x84xf32>
    %3 = vector.shape_cast %2 : vector<1x84xf32> to vector<1x84xf32>
    %4 = vector.broadcast %3 : vector<1x84xf32> to vector<16x84xf32>
    %5 = vector.extract_strided_slice %0 {offsets = [1, 0], sizes = [1, 84], strides = [1, 1]} : vector<8x84xf32> to vector<1x84xf32>
    %6 = vector.shape_cast %5 : vector<1x84xf32> to vector<1x84xf32>
    %7 = vector.broadcast %6 : vector<1x84xf32> to vector<16x84xf32>
    %8 = vector.extract_strided_slice %0 {offsets = [2, 0], sizes = [1, 84], strides = [1, 1]} : vector<8x84xf32> to vector<1x84xf32>
    %9 = vector.shape_cast %8 : vector<1x84xf32> to vector<1x84xf32>
    %10 = vector.broadcast %9 : vector<1x84xf32> to vector<16x84xf32>
    %11 = vector.extract_strided_slice %0 {offsets = [3, 0], sizes = [1, 84], strides = [1, 1]} : vector<8x84xf32> to vector<1x84xf32>
    %12 = vector.shape_cast %11 : vector<1x84xf32> to vector<1x84xf32>
    %13 = vector.broadcast %12 : vector<1x84xf32> to vector<16x84xf32>
    %14 = vector.extract_strided_slice %0 {offsets = [4, 0], sizes = [1, 84], strides = [1, 1]} : vector<8x84xf32> to vector<1x84xf32>
    %15 = vector.shape_cast %14 : vector<1x84xf32> to vector<1x84xf32>
    %16 = vector.broadcast %15 : vector<1x84xf32> to vector<16x84xf32>
    %17 = vector.extract_strided_slice %0 {offsets = [5, 0], sizes = [1, 84], strides = [1, 1]} : vector<8x84xf32> to vector<1x84xf32>
    %18 = vector.shape_cast %17 : vector<1x84xf32> to vector<1x84xf32>
    %19 = vector.broadcast %18 : vector<1x84xf32> to vector<16x84xf32>
    %20 = vector.extract_strided_slice %0 {offsets = [6, 0], sizes = [1, 84], strides = [1, 1]} : vector<8x84xf32> to vector<1x84xf32>
    %21 = vector.shape_cast %20 : vector<1x84xf32> to vector<1x84xf32>
    %22 = vector.broadcast %21 : vector<1x84xf32> to vector<16x84xf32>
    %23 = vector.extract_strided_slice %0 {offsets = [7, 0], sizes = [1, 84], strides = [1, 1]} : vector<8x84xf32> to vector<1x84xf32>
    %24 = vector.shape_cast %23 : vector<1x84xf32> to vector<1x84xf32>
    %25 = vector.broadcast %24 : vector<1x84xf32> to vector<16x84xf32>
    %26 = tpu.concatenate %4, %7, %10, %13, %16, %19, %22, %25 in 0 : vector<16x84xf32>, vector<16x84xf32>, vector<16x84xf32>, vector<16x84xf32>, vector<16x84xf32>, vector<16x84xf32>, vector<16x84xf32>, vector<16x84xf32> -> vector<128x84xf32>
    %27 = tpu.concatenate %1, %1, %1, %1, %1, %1, %1, %1 in 0 : vector<16x84xf32>, vector<16x84xf32>, vector<16x84xf32>, vector<16x84xf32>, vector<16x84xf32>, vector<16x84xf32>, vector<16x84xf32>, vector<16x84xf32> -> vector<128x84xf32>
    %c0_3 = arith.constant 0 : index
    %c0_4 = arith.constant 0 : index
    %28 = vector.load %arg3[%c0_3, %c0_4] : memref<25x32xf32, #tpu.memory_space<vmem>>, vector<25x32xf32>
    %29 = vector.extract_strided_slice %28 {offsets = [0, 0], sizes = [15, 32], strides = [1, 1]} : vector<25x32xf32> to vector<15x32xf32>
    %30 = vector.extract_strided_slice %28 {offsets = [15, 0], sizes = [1, 32], strides = [1, 1]} : vector<25x32xf32> to vector<1x32xf32>
    %31 = vector.extract_strided_slice %28 {offsets = [16, 0], sizes = [1, 32], strides = [1, 1]} : vector<25x32xf32> to vector<1x32xf32>
    %32 = vector.extract_strided_slice %28 {offsets = [17, 0], sizes = [1, 32], strides = [1, 1]} : vector<25x32xf32> to vector<1x32xf32>
    %33 = vector.extract_strided_slice %28 {offsets = [18, 0], sizes = [1, 32], strides = [1, 1]} : vector<25x32xf32> to vector<1x32xf32>
    %34 = vector.extract_strided_slice %28 {offsets = [19, 0], sizes = [1, 32], strides = [1, 1]} : vector<25x32xf32> to vector<1x32xf32>
    %35 = vector.extract_strided_slice %28 {offsets = [20, 0], sizes = [1, 32], strides = [1, 1]} : vector<25x32xf32> to vector<1x32xf32>
    %36 = vector.extract_strided_slice %28 {offsets = [21, 0], sizes = [1, 32], strides = [1, 1]} : vector<25x32xf32> to vector<1x32xf32>
    %37 = vector.extract_strided_slice %28 {offsets = [22, 0], sizes = [1, 32], strides = [1, 1]} : vector<25x32xf32> to vector<1x32xf32>
    %38 = vector.extract_strided_slice %28 {offsets = [23, 0], sizes = [1, 15], strides = [1, 1]} : vector<25x32xf32> to vector<1x15xf32>
    %39 = vector.extract_strided_slice %28 {offsets = [24, 0], sizes = [1, 15], strides = [1, 1]} : vector<25x32xf32> to vector<1x15xf32>
    %40 = vector.extract_strided_slice %26 {offsets = [0, 0], sizes = [128, 3], strides = [1, 1]} : vector<128x84xf32> to vector<128x3xf32>
    %41 = vector.extract_strided_slice %27 {offsets = [0, 0], sizes = [128, 3], strides = [1, 1]} : vector<128x84xf32> to vector<128x3xf32>
    %42 = arith.subf %40, %41 : vector<128x3xf32>
    %43 = arith.mulf %42, %42 : vector<128x3xf32>
    %cst = arith.constant dense<0.000000e+00> : vector<128xf32>
    %44 = vector.multi_reduction <add>, %43, %cst [1] : vector<128x3xf32> to vector<128xf32>
    %45 = vector.shape_cast %44 : vector<128xf32> to vector<128x1xf32>
    %46 = vector.broadcast %45 : vector<128x1xf32> to vector<128x15xf32>
    %47 = vector.broadcast %38 : vector<1x15xf32> to vector<128x15xf32>
    %48 = arith.cmpf ogt, %46, %47 : vector<128x15xf32>
    %49 = arith.extui %48 : vector<128x15xi1> to vector<128x15xi32>
    %50 = arith.sitofp %49 : vector<128x15xi32> to vector<128x15xf32>
    %51 = vector.broadcast %45 : vector<128x1xf32> to vector<128x15xf32>
    %52 = vector.broadcast %39 : vector<1x15xf32> to vector<128x15xf32>
    %53 = arith.cmpf olt, %51, %52 : vector<128x15xf32>
    %54 = arith.extui %53 : vector<128x15xi1> to vector<128x15xi32>
    %55 = arith.sitofp %54 : vector<128x15xi32> to vector<128x15xf32>
    %56 = arith.mulf %50, %55 : vector<128x15xf32>
    %57 = vector.extract_strided_slice %26 {offsets = [0, 3], sizes = [128, 1], strides = [1, 1]} : vector<128x84xf32> to vector<128x1xf32>
    %58 = vector.extract_strided_slice %27 {offsets = [0, 3], sizes = [128, 1], strides = [1, 1]} : vector<128x84xf32> to vector<128x1xf32>
    %59 = arith.mulf %57, %58 : vector<128x1xf32>
    %60 = vector.extract_strided_slice %26 {offsets = [0, 7], sizes = [128, 1], strides = [1, 1]} : vector<128x84xf32> to vector<128x1xf32>
    %61 = vector.extract_strided_slice %27 {offsets = [0, 7], sizes = [128, 1], strides = [1, 1]} : vector<128x84xf32> to vector<128x1xf32>
    %62 = arith.mulf %60, %61 : vector<128x1xf32>
    %63 = vector.extract_strided_slice %27 {offsets = [0, 4], sizes = [128, 3], strides = [1, 1]} : vector<128x84xf32> to vector<128x3xf32>
    %64 = vector.extract_strided_slice %26 {offsets = [0, 17], sizes = [128, 1], strides = [1, 1]} : vector<128x84xf32> to vector<128x1xf32>
    %65 = vector.extract_strided_slice %26 {offsets = [0, 8], sizes = [128, 1], strides = [1, 1]} : vector<128x84xf32> to vector<128x1xf32>
    %66 = vector.extract_strided_slice %63 {offsets = [0, 0], sizes = [128, 1], strides = [1, 1]} : vector<128x3xf32> to vector<128x1xf32>
    %67 = arith.mulf %65, %66 : vector<128x1xf32>
    %68 = arith.addf %64, %67 : vector<128x1xf32>
    %69 = vector.extract_strided_slice %26 {offsets = [0, 9], sizes = [128, 1], strides = [1, 1]} : vector<128x84xf32> to vector<128x1xf32>
    %70 = vector.extract_strided_slice %63 {offsets = [0, 1], sizes = [128, 1], strides = [1, 1]} : vector<128x3xf32> to vector<128x1xf32>
    %71 = arith.mulf %69, %70 : vector<128x1xf32>
    %72 = arith.addf %68, %71 : vector<128x1xf32>
    %73 = vector.extract_strided_slice %26 {offsets = [0, 10], sizes = [128, 1], strides = [1, 1]} : vector<128x84xf32> to vector<128x1xf32>
    %74 = vector.extract_strided_slice %63 {offsets = [0, 2], sizes = [128, 1], strides = [1, 1]} : vector<128x3xf32> to vector<128x1xf32>
    %75 = arith.mulf %73, %74 : vector<128x1xf32>
    %76 = arith.addf %72, %75 : vector<128x1xf32>
    %77 = vector.extract_strided_slice %26 {offsets = [0, 18], sizes = [128, 1], strides = [1, 1]} : vector<128x84xf32> to vector<128x1xf32>
    %78 = vector.extract_strided_slice %26 {offsets = [0, 11], sizes = [128, 1], strides = [1, 1]} : vector<128x84xf32> to vector<128x1xf32>
    %79 = vector.extract_strided_slice %63 {offsets = [0, 0], sizes = [128, 1], strides = [1, 1]} : vector<128x3xf32> to vector<128x1xf32>
    %80 = arith.mulf %78, %79 : vector<128x1xf32>
    %81 = arith.addf %77, %80 : vector<128x1xf32>
    %82 = vector.extract_strided_slice %26 {offsets = [0, 12], sizes = [128, 1], strides = [1, 1]} : vector<128x84xf32> to vector<128x1xf32>
    %83 = vector.extract_strided_slice %63 {offsets = [0, 1], sizes = [128, 1], strides = [1, 1]} : vector<128x3xf32> to vector<128x1xf32>
    %84 = arith.mulf %82, %83 : vector<128x1xf32>
    %85 = arith.addf %81, %84 : vector<128x1xf32>
    %86 = vector.extract_strided_slice %26 {offsets = [0, 13], sizes = [128, 1], strides = [1, 1]} : vector<128x84xf32> to vector<128x1xf32>
    %87 = vector.extract_strided_slice %63 {offsets = [0, 2], sizes = [128, 1], strides = [1, 1]} : vector<128x3xf32> to vector<128x1xf32>
    %88 = arith.mulf %86, %87 : vector<128x1xf32>
    %89 = arith.addf %85, %88 : vector<128x1xf32>
    %90 = vector.extract_strided_slice %26 {offsets = [0, 19], sizes = [128, 1], strides = [1, 1]} : vector<128x84xf32> to vector<128x1xf32>
    %91 = vector.extract_strided_slice %26 {offsets = [0, 14], sizes = [128, 1], strides = [1, 1]} : vector<128x84xf32> to vector<128x1xf32>
    %92 = vector.extract_strided_slice %63 {offsets = [0, 0], sizes = [128, 1], strides = [1, 1]} : vector<128x3xf32> to vector<128x1xf32>
    %93 = arith.mulf %91, %92 : vector<128x1xf32>
    %94 = arith.addf %90, %93 : vector<128x1xf32>
    %95 = vector.extract_strided_slice %26 {offsets = [0, 15], sizes = [128, 1], strides = [1, 1]} : vector<128x84xf32> to vector<128x1xf32>
    %96 = vector.extract_strided_slice %63 {offsets = [0, 1], sizes = [128, 1], strides = [1, 1]} : vector<128x3xf32> to vector<128x1xf32>
    %97 = arith.mulf %95, %96 : vector<128x1xf32>
    %98 = arith.addf %94, %97 : vector<128x1xf32>
    %99 = vector.extract_strided_slice %26 {offsets = [0, 16], sizes = [128, 1], strides = [1, 1]} : vector<128x84xf32> to vector<128x1xf32>
    %100 = vector.extract_strided_slice %63 {offsets = [0, 2], sizes = [128, 1], strides = [1, 1]} : vector<128x3xf32> to vector<128x1xf32>
    %101 = arith.mulf %99, %100 : vector<128x1xf32>
    %102 = arith.addf %98, %101 : vector<128x1xf32>
    %103 = arith.mulf %76, %76 : vector<128x1xf32>
    %cst_5 = arith.constant 9.99999997E-7 : f32
    %104 = vector.broadcast %cst_5 : f32 to vector<128x1xf32>
    %105 = arith.addf %104, %103 : vector<128x1xf32>
    %106 = arith.mulf %89, %89 : vector<128x1xf32>
    %107 = arith.addf %105, %106 : vector<128x1xf32>
    %108 = arith.mulf %102, %102 : vector<128x1xf32>
    %109 = arith.addf %107, %108 : vector<128x1xf32>
    %110 = math.rsqrt %109 : vector<128x1xf32>
    %111 = arith.mulf %110, %62 : vector<128x1xf32>
    %112 = arith.mulf %76, %111 : vector<128x1xf32>
    %113 = arith.mulf %89, %111 : vector<128x1xf32>
    %114 = arith.mulf %102, %111 : vector<128x1xf32>
    %cst_6 = arith.constant dense<0.000000e+00> : vector<128x32xf32>
    %115 = tpu.matmul %56, %29, %cst_6 {dimension_numbers = #tpu.dot_dimension_numbers<[1], [0], [0], [1], [0, 0, 1, 1], [], []>} : vector<128x15xf32>, vector<15x32xf32>, vector<128x32xf32> -> vector<128x32xf32>
    %116 = vector.extract_strided_slice %27 {offsets = [0, 52], sizes = [128, 32], strides = [1, 1]} : vector<128x84xf32> to vector<128x32xf32>
    %117 = arith.addf %115, %116 : vector<128x32xf32>
    %118 = vector.extract_strided_slice %26 {offsets = [0, 20], sizes = [128, 32], strides = [1, 1]} : vector<128x84xf32> to vector<128x32xf32>
    %119 = arith.addf %117, %118 : vector<128x32xf32>
    %120 = vector.broadcast %59 : vector<128x1xf32> to vector<128x32xf32>
    %121 = vector.broadcast %30 : vector<1x32xf32> to vector<128x32xf32>
    %122 = arith.mulf %120, %121 : vector<128x32xf32>
    %123 = arith.addf %119, %122 : vector<128x32xf32>
    %124 = vector.broadcast %112 : vector<128x1xf32> to vector<128x32xf32>
    %125 = vector.broadcast %31 : vector<1x32xf32> to vector<128x32xf32>
    %126 = arith.mulf %124, %125 : vector<128x32xf32>
    %127 = arith.addf %123, %126 : vector<128x32xf32>
    %128 = vector.broadcast %113 : vector<128x1xf32> to vector<128x32xf32>
    %129 = vector.broadcast %32 : vector<1x32xf32> to vector<128x32xf32>
    %130 = arith.mulf %128, %129 : vector<128x32xf32>
    %131 = arith.addf %127, %130 : vector<128x32xf32>
    %132 = vector.broadcast %114 : vector<128x1xf32> to vector<128x32xf32>
    %133 = vector.broadcast %33 : vector<1x32xf32> to vector<128x32xf32>
    %134 = arith.mulf %132, %133 : vector<128x32xf32>
    %135 = arith.addf %131, %134 : vector<128x32xf32>
    %136 = vector.broadcast %62 : vector<128x1xf32> to vector<128x32xf32>
    %137 = vector.broadcast %34 : vector<1x32xf32> to vector<128x32xf32>
    %138 = arith.mulf %136, %137 : vector<128x32xf32>
    %139 = arith.addf %135, %138 : vector<128x32xf32>
    %140 = vector.broadcast %62 : vector<128x1xf32> to vector<128x32xf32>
    %141 = arith.mulf %140, %139 : vector<128x32xf32>
    %142 = vector.broadcast %35 : vector<1x32xf32> to vector<128x32xf32>
    %143 = arith.addf %141, %142 : vector<128x32xf32>
    %cst_7 = arith.constant dense<0.000000e+00> : vector<128xf32>
    %144 = vector.multi_reduction <add>, %143, %cst_7 [1] : vector<128x32xf32> to vector<128xf32>
    %145 = vector.shape_cast %144 : vector<128xf32> to vector<128x1xf32>
    %cst_8 = arith.constant 3.200000e+01 : f32
    %146 = vector.broadcast %cst_8 : f32 to vector<128x1xf32>
    %147 = arith.divf %145, %146 : vector<128x1xf32>
    %148 = vector.broadcast %147 : vector<128x1xf32> to vector<128x32xf32>
    %149 = arith.subf %143, %148 : vector<128x32xf32>
    %150 = arith.mulf %149, %149 : vector<128x32xf32>
    %cst_9 = arith.constant dense<0.000000e+00> : vector<128xf32>
    %151 = vector.multi_reduction <add>, %150, %cst_9 [1] : vector<128x32xf32> to vector<128xf32>
    %152 = vector.shape_cast %151 : vector<128xf32> to vector<128x1xf32>
    %cst_10 = arith.constant 3.200000e+01 : f32
    %153 = vector.broadcast %cst_10 : f32 to vector<128x1xf32>
    %154 = arith.divf %152, %153 : vector<128x1xf32>
    %cst_11 = arith.constant 9.99999974E-6 : f32
    %155 = vector.broadcast %cst_11 : f32 to vector<128x1xf32>
    %156 = arith.addf %154, %155 : vector<128x1xf32>
    %157 = math.rsqrt %156 : vector<128x1xf32>
    %158 = vector.broadcast %157 : vector<128x1xf32> to vector<128x32xf32>
    %159 = arith.mulf %149, %158 : vector<128x32xf32>
    %160 = vector.broadcast %36 : vector<1x32xf32> to vector<128x32xf32>
    %161 = arith.mulf %159, %160 : vector<128x32xf32>
    %162 = vector.broadcast %37 : vector<1x32xf32> to vector<128x32xf32>
    %163 = arith.addf %161, %162 : vector<128x32xf32>
    %c0_12 = arith.constant 0 : index
    %c0_13 = arith.constant 0 : index
    %164 = vector.load %arg4[%c0_12, %c0_13] : memref<128x32xf32, #tpu.memory_space<vmem>>, vector<128x32xf32>
    tpu.vector_store %arg4[%c0_12, %c0_13], %163 {strides = array<i32>} : memref<128x32xf32, #tpu.memory_space<vmem>>, vector<128x32xf32>,
    return
  }
  func.func @transform_0(%arg0: i32) -> (i32, i32) {
    %c0_i32 = arith.constant 0 : i32
    %c0_i32_0 = arith.constant 0 : i32
    return %arg0, %c0_i32 : i32, i32
  }
  func.func @transform_1(%arg0: i32) -> (i32, i32) {
    %c0_i32 = arith.constant 0 : i32
    %c0_i32_0 = arith.constant 0 : i32
    %c0_i32_1 = arith.constant 0 : i32
    return %c0_i32, %c0_i32_0 : i32, i32
  }
  func.func @transform_2(%arg0: i32) -> (i32, i32) {
    %c0_i32 = arith.constant 0 : i32
    %c0_i32_0 = arith.constant 0 : i32
    %c0_i32_1 = arith.constant 0 : i32
    return %c0_i32, %c0_i32_0 : i32, i32
  }
  func.func @transform_3(%arg0: i32) -> (i32, i32) {
    %c0_i32 = arith.constant 0 : i32
    %c0_i32_0 = arith.constant 0 : i32
    return %arg0, %c0_i32 : i32, i32
  }
}

</mosaic_0001>

<bundles_post_ra>
// kernel: tpu_custom_call.1
= control target key start
LH: loop header
LB: loop body
LE: loop exit
PB: predicated region body
PF: predicated region fallthrough
CT: control target
= control target key end

     0   :  { %8 = vsyncpa [#allocation3], 0  ;;  %s5402_s0 = inlined_call_operand.hbm [shape: f32[16,84], index: 0, kind: input, shape index: {}]   ;;  %s5403_s1 = inlined_call_operand.hbm [shape: f32[16,84], index: 1, kind: input, shape index: {}]   ;;  %s5404_s2 = inlined_call_operand.hbm [shape: f32[25,32], index: 2, kind: input, shape index: {}]   ;;  %s5405_s3 = inlined_call_operand.vmem [shape: f32[256,32], index: 3, kind: output, shape index: {}]  }
   0x1   :  { %10 = vsyncpa [#allocation3 + $0x1], 0 }
   0x2   :  { %11 = vsyncpa [#allocation5], 0  ;;  %s3286_s12 = smov 0   ;;  %s3288_s13 = smov 0  }
   0x3   :  { %s3290_s14 = smov 0   ;;  %s3292_s15 = smov 0  }
   0x4 LB: > { %s2834_s16 = sadd.s32 4294967295, %s3238_s15   ;;  %p37_p0 = scmp.ne.s32.totalorder %s3230_s13, %s3226_s12  ;;  %s3238_s15 = sphi %s3292_s15, %s5750_s15   ;;  %s3234_s14 = sphi %s3290_s14, %s5749_s14   ;;  %s3230_s13 = sphi %s3288_s13, %s5748_s13   ;;  %s3226_s12 = sphi %s3286_s12, %s5747_s12  }
   0x5   : > { %p3308_p1 = scmp.eq.s32.totalorder %s2834_s16, 0  ;;  %p2836_p2 = scmp.ge.s32.totalorder %s3238_s15, 1 }
   0x6   : > { %p116_p3 = scmp.lt.s32.totalorder %s3238_s15, 3  ;;  %s3240_s20 = smov [#allocation4]  }
   0x7   : > { %s5480_s17 = scalar_select %p3308_p1, 1, 0 }
   0x8   : > { %p3316_p4 = por %p3308_p1, %p37_p0  ;;  %p3320_p5 = pnand %p2836_p2, %p116_p3 }
   0x9   : > { %s128_s21 = sshll.u32 %s3240_s20, 4  ;;  %s3241_s23 = smov [#allocation6]   ;;  %s129_s21 = int_to_ptr.vmem [resolvable:$true] %s128_s21 }
   0xa   : > { %s5481_s18 = scalar_select %p3316_p4, 1, 0 }
   0xb   : > { %s5482_s19 = scalar_select %p3320_p5, 1, 0 }
   0xc   : > { %p2964_p6 = pneg %p3320_p5  ;;  %s141_s24 = sshll.u32 %s3241_s23, 4  ;;  %s3332_s24 = int_to_ptr.vmem [resolvable:$true] %s141_s24 }
   0xd   : > { %s3114_s27 = scalar_lea.hbm %s5403_s1, 256 }
   0xe   : > { %p3328_p7 = pnand %p2964_p6, %p3308_p1  ;;  %p3115_p8 = scmp.ne.s32.totalorder %s5403_s1, %s3114_s27 }
   0xf   : > { %p3121_p12 = scmp.lt.u32.totalorder %s3114_s27, %s5403_s1 }
  0x10   : > { %p3116_p9 = pneg %p3328_p7 }
  0x12   : > { %p3117_p10 = pnand %p3116_p9, %p3115_p8 }
  0x14   : > { %p3118_p11 = pneg %p3117_p10 }
  0x16   : > { %p3123_p13 = pnand %p3121_p12, %p3118_p11 }
  0x18   : > { %3126 = shalt.err (!%p3123_p13)
}
  0x19   : > { %s3127_s5 = scalar_lea.vmem %s129_s21, 256  ;;  %p3135_p6 = scmp.lt.s32.totalorder %s129_s21, %s129_s21 }
  0x1a   : > { %p3128_p0 = scmp.ne.s32.totalorder %s129_s21, %s3127_s5  ;;  %p3136_p1 = scmp.lt.s32.totalorder %s3127_s5, %s3127_s5 }
  0x1c   : > { %p3130_p2 = pnand %p3128_p0, %p3116_p9  ;;  %p3137_p4 = por %p3136_p1, %p3135_p6 }
  0x1e   : > { %p3131_p3 = pneg %p3130_p2 }
  0x20   : > { %p3138_p5 = pnand %p3137_p4, %p3131_p3 }
  0x22   : > { %3141 = shalt.err (!%p3138_p5)
}
  0x23   : > { %s3242_s6 = smov 128   ;;  %s3243_s7 = smov 8  }
  0x24   : > { %2967 = dma.hbm_to_vmem [thread:$0]  (!%p3328_p7), %s5403_s1, 256, %s129_s21, [#allocation5], %s3242_s6, %s3242_s6, %s3243_s7  }
  0x25   : > { %s3142_s12 = scalar_lea.hbm %s5404_s2, 512 }
  0x26   : > { %p3143_p8 = scmp.ne.s32.totalorder %s5404_s2, %s3142_s12  ;;  %p3149_p5 = scmp.lt.u32.totalorder %s3142_s12, %s5404_s2 }
  0x28   : > { %p3145_p1 = pnand %p3143_p8, %p3116_p9 }
  0x2a   : > { %p3146_p4 = pneg %p3145_p1 }
  0x2c   : > { %p3151_p10 = pnand %p3149_p5, %p3146_p4 }
  0x2e   : > { %3154 = shalt.err (!%p3151_p10)
}
  0x2f   : > { %s3155_s21 = scalar_lea.vmem %s3332_s24, 512  ;;  %p3163_p0 = scmp.lt.s32.totalorder %s3332_s24, %s3332_s24 }
  0x30   : > { %p3156_p11 = scmp.ne.s32.totalorder %s3332_s24, %s3155_s21  ;;  %p3164_p2 = scmp.lt.s32.totalorder %s3155_s21, %s3155_s21 }
  0x32   : > { %p3158_p12 = pnand %p3156_p11, %p3116_p9  ;;  %p3165_p3 = por %p3164_p2, %p3163_p0 }
  0x34   : > { %p3159_p13 = pneg %p3158_p12 }
  0x36   : > { %p3166_p6 = pnand %p3165_p3, %p3159_p13 }
  0x38   : > { %3169 = shalt.err (!%p3166_p6)
}
  0x39   : > { %2970 = dma.hbm_to_vmem [thread:$0]  (!%p3328_p7), %s5404_s2, 512, %s3332_s24, [#allocation5], %s3242_s6, %s3242_s6, %s3243_s7  }
  0x3a   : > { %s3382_s29 = sadd.s32 1, %s3238_s15   ;;  %s24_s30 = sadd.s32 1, %s3234_s14 }
  0x3b   : > { %s21_s22 = ssub.s32 %s3238_s15, %s3382_s29  ;;  %p31_p9 = scmp.ne.s32.totalorder %s3234_s14, %s3230_s13 }
  0x3c   : > { %p22_p8 = scmp.eq.s32.totalorder %s21_s22, 0  ;;  %p32_p1 = scmp.eq.s32.totalorder %s3238_s15, 0 }
  0x3d   : > { %p2977_p4 = scmp.lt.s32.totalorder %s3238_s15, 2  ;;  %s155_s4 = sand.u32 1, %s3234_s14  }
  0x3e   : > { %s3393_s5 = scalar_select %p22_p8, %s3234_s14, %s24_s30  }
  0x3f   : > { %p33_p5 = por %p32_p1, %p31_p9  ;;  %s2840_s8 = sshll.u32 %s155_s4, 3 }
  0x40   : > { %s2841_s9 = sshll.u32 %s3238_s15, 7  ;;  %s159_s24 = scalar_lea.vmem [#allocation2], %s2840_s8 }
  0x41   : > { %s3399_s12 = scalar_lea.hbm %s5402_s0, %s2841_s9  ;;  %s166_s6 = sshll.u32 %s159_s24, 4  ;;  %s3405_s6 = int_to_ptr.vmem [resolvable:$true] %s166_s6 }
  0x42   : > { %p3401_p7 = pnand %p2977_p4, %p33_p5  ;;  %s156_s20 = scalar_lea.sflag [#allocation3], %s155_s4 }
  0x43   : > { %s3170_s23 = scalar_lea.hbm %s3399_s12, 128  ;;  %s3175_s21 = scalar_lea.hbm %s5402_s0, 256 }
  0x44   : > { %p3171_p10 = scmp.ne.s32.totalorder %s3399_s12, %s3170_s23  ;;  %p3172_p11 = pneg %p3401_p7 }
  0x45   : > { %p3176_p0 = scmp.lt.u32.totalorder %s3399_s12, %s5402_s0  ;;  %p3177_p2 = scmp.lt.u32.totalorder %s3175_s21, %s3170_s23 }
  0x46   : > { %p3173_p12 = pnand %p3172_p11, %p3171_p10  ;;  %p3179_p6 = scmp.lt.u32.totalorder %s3170_s23, %s3399_s12 }
  0x47   : > { %p3178_p3 = por %p3177_p2, %p3176_p0 }
  0x48   : > { %p3174_p13 = pneg %p3173_p12 }
  0x49   : > { %p3180_p9 = por %p3179_p6, %p3178_p3 }
  0x4b   : > { %p3181_p8 = pnand %p3180_p9, %p3174_p13 }
  0x4d   : > { %3184 = shalt.err (!%p3181_p8)
}
  0x4e   : > { %s3185_s30 = scalar_lea.vmem %s3405_s6, 128  ;;  %s3244_s22 = smov [#allocation2]  }
  0x4f   : > { %p3186_p1 = scmp.ne.s32.totalorder %s3405_s6, %s3185_s30  ;;  %s3190_s4 = sshll.u32 %s3244_s22, 4  ;;  %s3191_s4 = int_to_ptr.vmem [resolvable:$false] %s3190_s4 }
  0x50   : > { %s3192_s8 = scalar_lea.vmem %s3191_s4, 256  ;;  %p3193_p10 = scmp.lt.s32.totalorder %s3405_s6, %s3191_s4 }
  0x51   : > { %p3188_p4 = pnand %p3186_p1, %p3172_p11  ;;  %p3194_p12 = scmp.lt.s32.totalorder %s3192_s8, %s3185_s30 }
  0x53   : > { %p3189_p5 = pneg %p3188_p4  ;;  %p3195_p0 = por %p3194_p12, %p3193_p10 }
  0x55   : > { %p3196_p2 = pnand %p3195_p0, %p3189_p5 }
  0x57   : > { %3199 = shalt.err (!%p3196_p2)
}
  0x58   : > { %2974 = dma.hbm_to_vmem [thread:$0]  (!%p3401_p7), %s3399_s12, 128, %s3405_s6, %s156_s20  }
  0x59   : > { %p5485_p13 = scmp.ne.s32.totalorder %s5482_s19, 0 }
  0x5b   : > { %175 = sbr.rel (%p5485_p13) target bundleno = 1763 (0x6e3), region = 32 }
  0x62   : > { %s177_s9 = sand.u32 1, %s3230_s13   ;;  %p5486_p11 = scmp.ne.s32.totalorder %s5481_s18, 0 }
  0x63   : > { %s2843_s10 = sshll.u32 %s177_s9, 3  ;;  %s178_s11 = scalar_lea.sflag [#allocation3], %s177_s9 }
  0x64   : > { %s181_s24 = scalar_lea.vmem [#allocation2], %s2843_s10 }
  0x65   : > { %3217 = dma.done.wait (%p5486_p11), %s178_s11, 128  }
  0x66   : > { %3219 = vsyncadd (%p5486_p11), %s178_s11, 4294967168  ;;  %p5487_p3 = scmp.ne.s32.totalorder %s5480_s17, 0 }
  0x68   : > { %3221 = dma.done.wait (%p5487_p3), [#allocation5], 768  }
  0x69   : > { %3223 = vsyncadd (%p5487_p3), [#allocation5], 4294966528  ;;  %v221_v0 = vlaneseq  ;;  %v218_v5 = vld [vmem:[%s181_s24] sm:$0xff]  ;;  %v3448_v6 = vld [vmem:[#allocation4] sm:$0xff]  ;;  %vm297_vm0 = vcmask 23552   ;;  %vm1709_vm1 = vcmask 1046528  }
  0x6a   : > { %v3450_v7 = vld [vmem:[#allocation4 + $0x8] sm:$0xff]  ;;  %v261_v58 = vld [vmem:[#allocation6] sm:$0xff]  ;;  %v262_v59 = vld [vmem:[#allocation6 + $0x8] sm:$0xff]  ;;  %vm3245_vm2 = vmmov 1   ;;  %s3246_s17 = smov 4   ;;  %vm1660_vm4 = vcmask 121856  }
  0x6b   : > { %v3443_v1 = vshrl.u32 %v221_v0, 7  ;;  %v2946_v61 = vpack.c.bf16 %v262_v59, %v261_v58  ;;  %vm2947_vm3 = vmpackc.low %vm1709_vm1, %vm3245_vm2  ;;  %s3248_s18 = smov 9   ;;  %s3249_s19 = smov 8  }
  0x6c   : > { %s3250_s12 = smov 7   ;;  %s3251_s6 = smov 6  }
  0x6d   : > { %5488 = vst [vmem:[#allocation9_spill] sm:$0xff] %v3443_v1  ;;  %v5416_v2 = vsub.s32 0, %v3443_v1  ;;  %v5415_v3 = vsub.s32 1, %v3443_v1  ;;  %v5414_v4 = vsub.s32 2, %v3443_v1  ;;  %v5413_v8 = vsub.s32 3, %v3443_v1  ;;  %2948 = vmatprep.subr.msk.bf16.mxu0 %vm2947_vm3, %v2946_v61  ;;  %2952 = vmatprep.subr.msk.bf16.mxu1 %vm2947_vm3, %v2946_v61  ;;  %s3252_s7 = smov 5  }
  0x6e   : > { %v5412_v19 = vsub.s32 4, %v3443_v1  ;;  %v5411_v29 = vsub.s32 5, %v3443_v1  ;;  %v5410_v37 = vsub.s32 6, %v3443_v1  ;;  %v251_v42 = vsub.s32 7, %v3443_v1  ;;  %2951 = vmatpush3.bf16.msk.msra.mxu0 %vm2947_vm3, %v2946_v61  ;;  %2953 = vmatpush3.bf16.msk.msra.mxu1 %vm2947_vm3, %v2946_v61  ;;  %s3253_s20 = smov 10   ;;  %s3254_s23 = smov 3  }
  0x6f   : > { %v3455_v9 = vrot.slane %v218_v5, %v5416_v2  ;;  %v3459_v10 = vrot.slane %v218_v5, %v5415_v3  ;;  %v3463_v11 = vrot.slane %v218_v5, %v5414_v4  ;;  %v3479_v18 = vrot.slane %v218_v5, %v5413_v8  ;;  %s3255_s25 = smov 127   ;;  %s3256_s26 = smov 126  }
  0x70   : > { %v3490_v28 = vrot.slane %v218_v5, %v5412_v19  ;;  %v3497_v36 = vrot.slane %v218_v5, %v5411_v29  ;;  %v3511_v45 = vrot.slane %v218_v5, %v5410_v37  ;;  %v3517_v50 = vrot.slane %v218_v5, %v251_v42  ;;  %s3258_s21 = smov 1   ;;  %s3259_s27 = smov 2  }
  0x71   : > { %v265_v12 = vsub.f32 %v3455_v9, %v3448_v6  ;;  %v267_v13 = vsub.f32 %v3459_v10, %v3448_v6  ;;  %v266_v14 = vsub.f32 %v3455_v9, %v3450_v7  ;;  %v268_v15 = vsub.f32 %v3459_v10, %v3450_v7  ;;  %s3260_s28 = smov 76   ;;  %s3261_s30 = smov 108  }
  0x72   : > { %v269_v16 = vsub.f32 %v3463_v11, %v3448_v6  ;;  %v270_v17 = vsub.f32 %v3463_v11, %v3450_v7  ;;  %v271_v26 = vsub.f32 %v3479_v18, %v3448_v6  ;;  %v272_v27 = vsub.f32 %v3479_v18, %v3450_v7  ;;  %s2846_s22 = sshll.u32 %s2834_s16, 4 }
  0x73   : > { %v281_v20 = vmul.f32 %v265_v12, %v265_v12  ;;  %v283_v21 = vmul.f32 %v267_v13, %v267_v13  ;;  %v282_v22 = vmul.f32 %v266_v14, %v266_v14  ;;  %v284_v23 = vmul.f32 %v268_v15, %v268_v15  ;;  %p213_p7 = scmp.lt.s32.totalorder %s2846_s22, 31 }
  0x74   : > { %v285_v32 = vmul.f32 %v269_v16, %v269_v16  ;;  %v286_v33 = vmul.f32 %v270_v17, %v270_v17  ;;  %v287_v34 = vmul.f32 %v271_v26, %v271_v26  ;;  %v288_v35 = vmul.f32 %v272_v27, %v272_v27 }
  0x75   : > { %v298_v24 = vsel %vm297_vm0, %v281_v20, 0.0  ;;  %v304_v25 = vsel %vm297_vm0, %v283_v21, 0.0  ;;  %v301_v30 = vsel %vm297_vm0, %v282_v22, 0.0  ;;  %v307_v31 = vsel %vm297_vm0, %v284_v23, 0.0  ;;  %v263_v21 = vld [vmem:[#allocation6 + $0x10] sm:$0xff]  ;;  %s5752_s22 = smov (!%p213_p7, %s2846_s22), 31 }
  0x76   : > { %299 = vadd.xlane.f32.xlu0 %v298_v24  ;;  %305 = vadd.xlane.f32.xlu1 %v304_v25  ;;  %v310_v38 = vsel %vm297_vm0, %v285_v32, 0.0  ;;  %v313_v39 = vsel %vm297_vm0, %v286_v33, 0.0  ;;  %v273_v40 = vsub.f32 %v3490_v28, %v3448_v6  ;;  %v274_v41 = vsub.f32 %v3490_v28, %v3450_v7  ;;  %v3543_v23 = vld [vmem:[#allocation6 + $0x18] ss:$0 sm:$0xff]  ;;  %s2847_s4 = sshll.u32 %s5752_s22, 3 }
  0x77   : > { %v316_v43 = vsel %vm297_vm0, %v287_v34, 0.0  ;;  %v319_v44 = vsel %vm297_vm0, %v288_v35, 0.0  ;;  %v275_v48 = vsub.f32 %v3497_v36, %v3448_v6  ;;  %v276_v49 = vsub.f32 %v3497_v36, %v3450_v7  ;;  %s5309_s8 = scalar_lea.vmem %s5405_s3, %s2847_s4 }
  0x78   : > { %v289_v46 = vmul.f32 %v273_v40, %v273_v40  ;;  %v290_v47 = vmul.f32 %v274_v41, %v274_v41  ;;  %v277_v51 = vsub.f32 %v3511_v45, %v3448_v6  ;;  %v278_v52 = vsub.f32 %v3511_v45, %v3450_v7 }
  0x79   : > { %v291_v55 = vmul.f32 %v275_v48, %v275_v48  ;;  %v292_v56 = vmul.f32 %v276_v49, %v276_v49  ;;  %v279_v57 = vsub.f32 %v3517_v50, %v3448_v6  ;;  %v280_v60 = vsub.f32 %v3517_v50, %v3450_v7 }
  0x7a   : > { %302 = vadd.xlane.f32.xlu0 %v301_v30  ;;  %308 = vadd.xlane.f32.xlu1 %v307_v31  ;;  %v322_v53 = vsel %vm297_vm0, %v289_v46, 0.0  ;;  %v325_v54 = vsel %vm297_vm0, %v290_v47, 0.0  ;;  %v293_v0 = vmul.f32 %v277_v51, %v277_v51  ;;  %v294_v5 = vmul.f32 %v278_v52, %v278_v52 }
  0x7b   : > { %v328_v62 = vsel %vm297_vm0, %v291_v55, 0.0  ;;  %v331_v63 = vsel %vm297_vm0, %v292_v56, 0.0  ;;  %v3531_v12 = vrot.slane %v262_v59, %v251_v42  ;;  %v295_v15 = vmul.f32 %v279_v57, %v279_v57 }
  0x7c   : > { %v334_v13 = vsel %vm297_vm0, %v293_v0, 0.0  ;;  %v337_v14 = vsel %vm297_vm0, %v294_v5, 0.0  ;;  %v296_v16 = vmul.f32 %v280_v60, %v280_v60  ;;  %v3541_v22 = vrot.slane %v263_v21, %v251_v42 }
  0x7d   : > { %5489 = vst [vmem:[#allocation10_spill] sm:$0xff] %v3531_v12  ;;  %v340_v17 = vsel %vm297_vm0, %v295_v15, 0.0  ;;  %v3247_v26 = vmov 0.0  }
  0x7e   : > { %311 = vadd.xlane.f32.xlu0 %v310_v38  ;;  %314 = vadd.xlane.f32.xlu1 %v313_v39  ;;  %v343_v20 = vsel %vm297_vm0, %v296_v16, 0.0 }
  0x82   : > { %317 = vadd.xlane.f32.xlu0 %v316_v43  ;;  %320 = vadd.xlane.f32.xlu1 %v319_v44 }
  0x86   : > { %323 = vadd.xlane.f32.xlu0 %v322_v53  ;;  %326 = vadd.xlane.f32.xlu1 %v325_v54 }
  0x8a   : > { %329 = vadd.xlane.f32.xlu0 %v328_v62  ;;  %332 = vadd.xlane.f32.xlu1 %v331_v63 }
  0x8e   : > { %335 = vadd.xlane.f32.xlu0 %v334_v13  ;;  %338 = vadd.xlane.f32.xlu1 %v337_v14 }
  0x92   : > { %341 = vadd.xlane.f32.xlu0 %v340_v17  ;;  %344 = vadd.xlane.f32.xlu1 %v343_v20 }
  0xa3   : > { %486 = vrot.lane.b32.xlu1 %v3450_v7, %s3246_s17 }
  0xa8   : > { %484 = vrot.lane.b32.xlu0 %v3448_v6, %s3246_s17 }
 0x103   : > { %v300_v24 = vpop.xlane.xlu0 %299  ;;  %v306_v25 = vpop.xlane.xlu1 %305 }
 0x104   : > { %vm352_vm5 = vcmp.gt.f32.partialorder %v306_v25, %v3541_v22  ;;  %vm404_vm6 = vcmp.lt.f32.partialorder %v306_v25, %v3543_v23  ;;  %vm350_vm7 = vcmp.gt.f32.partialorder %v300_v24, %v3541_v22  ;;  %vm402_vm8 = vcmp.lt.f32.partialorder %v300_v24, %v3543_v23 }
 0x105   : > { %v2850_v27 = vsel %vm352_vm5, 1.0, %v3247_v26  ;;  %v2867_v30 = vsel %vm404_vm6, 1.0, %v3247_v26  ;;  %v2848_v31 = vsel %vm350_vm7, 1.0, %v3247_v26  ;;  %v2865_v32 = vsel %vm402_vm8, 1.0, %v3247_v26 }
 0x106   : > { %v450_v33 = vmul.f32 %v2865_v32, %v2848_v31  ;;  %v452_v34 = vmul.f32 %v2867_v30, %v2850_v27 }
 0x107   : > { %v303_v35 = vpop.xlane.xlu0 %302  ;;  %v309_v38 = vpop.xlane.xlu1 %308 }
 0x108   : > { %vm351_vm9 = vcmp.gt.f32.partialorder %v303_v35, %v3541_v22  ;;  %vm403_vm10 = vcmp.lt.f32.partialorder %v303_v35, %v3543_v23  ;;  %2922 = vmatprep.mubr.msk.f32.mxu0 %vm1660_vm4, %v450_v33  ;;  %vm353_vm11 = vcmp.gt.f32.partialorder %v309_v38, %v3541_v22  ;;  %vm405_vm12 = vcmp.lt.f32.partialorder %v309_v38, %v3543_v23 }
 0x109   : > { %v2849_v39 = vsel %vm351_vm9, 1.0, %v3247_v26  ;;  %v2866_v40 = vsel %vm403_vm10, 1.0, %v3247_v26  ;;  %v2851_v41 = vsel %vm353_vm11, 1.0, %v3247_v26  ;;  %v2868_v42 = vsel %vm405_vm12, 1.0, %v3247_v26 }
 0x10a   : > { %v451_v43 = vmul.f32 %v2866_v40, %v2849_v39  ;;  %v453_v44 = vmul.f32 %v2868_v42, %v2851_v41 }
 0x10b   : > { %v312_v46 = vpop.xlane.xlu0 %311  ;;  %v315_v47 = vpop.xlane.xlu1 %314 }
 0x10c   : > { %vm354_vm13 = vcmp.gt.f32.partialorder %v312_v46, %v3541_v22  ;;  %vm406_vm14 = vcmp.lt.f32.partialorder %v312_v46, %v3543_v23  ;;  %2923 = vmatmul.mubr.msk.f32.vlgmr.msra.gmra.mrb[0].mxu0 %vm1660_vm4, %v451_v43  ;;  %vm355_vm15 = vcmp.gt.f32.partialorder %v315_v47, %v3541_v22  ;;  %vm407_vm0 = vcmp.lt.f32.partialorder %v315_v47, %v3543_v23 }
 0x10d   : > { %v2852_v48 = vsel %vm354_vm13, 1.0, %v3247_v26  ;;  %v2869_v49 = vsel %vm406_vm14, 1.0, %v3247_v26  ;;  %2925 = vmatprep.mubr.msk.f32.mxu0 %vm1660_vm4, %v452_v34  ;;  %v2853_v51 = vsel %vm355_vm15, 1.0, %v3247_v26  ;;  %v2870_v52 = vsel %vm407_vm0, 1.0, %v3247_v26 }
 0x10e   : > { %v454_v53 = vmul.f32 %v2869_v49, %v2852_v48  ;;  %v455_v54 = vmul.f32 %v2870_v52, %v2853_v51 }
 0x10f   : > { %v318_v55 = vpop.xlane.xlu0 %317  ;;  %v321_v56 = vpop.xlane.xlu1 %320 }
 0x110   : > { %vm356_vm1 = vcmp.gt.f32.partialorder %v318_v55, %v3541_v22  ;;  %vm408_vm2 = vcmp.lt.f32.partialorder %v318_v55, %v3543_v23  ;;  %2926 = vmatmul.mubr.msk.f32.gmra.mrb[2].mxu0 %vm1660_vm4, %v453_v44  ;;  %vm357_vm3 = vcmp.gt.f32.partialorder %v321_v56, %v3541_v22  ;;  %vm409_vm5 = vcmp.lt.f32.partialorder %v321_v56, %v3543_v23 }
 0x111   : > { %v2854_v57 = vsel %vm356_vm1, 1.0, %v3247_v26  ;;  %v2871_v58 = vsel %vm408_vm2, 1.0, %v3247_v26  ;;  %2928 = vmatprep.mubr.msk.f32.mxu0 %vm1660_vm4, %v454_v53  ;;  %v2855_v59 = vsel %vm357_vm3, 1.0, %v3247_v26  ;;  %v2872_v60 = vsel %vm409_vm5, 1.0, %v3247_v26 }
 0x112   : > { %v456_v61 = vmul.f32 %v2871_v58, %v2854_v57  ;;  %v457_v62 = vmul.f32 %v2872_v60, %v2855_v59 }
 0x113   : > { %v324_v63 = vpop.xlane.xlu0 %323  ;;  %v327_v0 = vpop.xlane.xlu1 %326 }
 0x114   : > { %2929 = vmatmul.mubr.msk.f32.gmra.mrb[4].mxu0 %vm1660_vm4, %v455_v54  ;;  %vm359_vm6 = vcmp.gt.f32.partialorder %v327_v0, %v3541_v22  ;;  %vm411_vm7 = vcmp.lt.f32.partialorder %v327_v0, %v3543_v23  ;;  %vm358_vm8 = vcmp.gt.f32.partialorder %v324_v63, %v3541_v22  ;;  %vm410_vm9 = vcmp.lt.f32.partialorder %v324_v63, %v3543_v23 }
 0x115   : > { %2931 = vmatprep.mubr.msk.f32.mxu0 %vm1660_vm4, %v456_v61  ;;  %v2857_v5 = vsel %vm359_vm6, 1.0, %v3247_v26  ;;  %v2874_v13 = vsel %vm411_vm7, 1.0, %v3247_v26  ;;  %v2856_v14 = vsel %vm358_vm8, 1.0, %v3247_v26  ;;  %v2873_v15 = vsel %vm410_vm9, 1.0, %v3247_v26 }
 0x116   : > { %v459_v16 = vmul.f32 %v2874_v13, %v2857_v5  ;;  %v458_v17 = vmul.f32 %v2873_v15, %v2856_v14 }
 0x117   : > { %v330_v20 = vpop.xlane.xlu0 %329  ;;  %v333_v21 = vpop.xlane.xlu1 %332 }
 0x118   : > { %vm360_vm10 = vcmp.gt.f32.partialorder %v330_v20, %v3541_v22  ;;  %vm412_vm11 = vcmp.lt.f32.partialorder %v330_v20, %v3543_v23  ;;  %2932 = vmatmul.mubr.msk.f32.gmra.mrb[6].mxu0 %vm1660_vm4, %v457_v62  ;;  %2934 = vmatprep.mubr.msk.f32.mxu1 %vm1660_vm4, %v458_v17  ;;  %vm361_vm12 = vcmp.gt.f32.partialorder %v333_v21, %v3541_v22 }
 0x119   : > { %v2858_v24 = vsel %vm360_vm10, 1.0, %v3247_v26  ;;  %v2875_v25 = vsel %vm412_vm11, 1.0, %v3247_v26  ;;  %v2859_v27 = vsel %vm361_vm12, 1.0, %v3247_v26  ;;  %vm413_vm13 = vcmp.lt.f32.partialorder %v333_v21, %v3543_v23  ;;  %2935 = vmatmul.mubr.msk.f32.vlgmr.msra.gmra.mrb[0].mxu1 %vm1660_vm4, %v459_v16 }
 0x11a   : > { %v460_v30 = vmul.f32 %v2875_v25, %v2858_v24  ;;  %v2876_v31 = vsel %vm413_vm13, 1.0, %v3247_v26 }
 0x11b   : > { %v461_v32 = vmul.f32 %v2876_v31, %v2859_v27  ;;  %v336_v33 = vpop.xlane.xlu0 %335  ;;  %v339_v34 = vpop.xlane.xlu1 %338 }
 0x11c   : > { %vm362_vm14 = vcmp.gt.f32.partialorder %v336_v33, %v3541_v22  ;;  %vm414_vm15 = vcmp.lt.f32.partialorder %v336_v33, %v3543_v23  ;;  %2937 = vmatprep.mubr.msk.f32.mxu1 %vm1660_vm4, %v460_v30  ;;  %vm363_vm0 = vcmp.gt.f32.partialorder %v339_v34, %v3541_v22  ;;  %vm415_vm1 = vcmp.lt.f32.partialorder %v339_v34, %v3543_v23 }
 0x11d   : > { %v2860_v35 = vsel %vm362_vm14, 1.0, %v3247_v26  ;;  %v2877_v38 = vsel %vm414_vm15, 1.0, %v3247_v26  ;;  %v2861_v39 = vsel %vm363_vm0, 1.0, %v3247_v26  ;;  %v2878_v40 = vsel %vm415_vm1, 1.0, %v3247_v26  ;;  %2938 = vmatmul.mubr.msk.f32.gmra.mrb[2].mxu1 %vm1660_vm4, %v461_v32 }
 0x11e   : > { %v462_v41 = vmul.f32 %v2877_v38, %v2860_v35  ;;  %v463_v42 = vmul.f32 %v2878_v40, %v2861_v39 }
 0x11f   : > { %v342_v43 = vpop.xlane.xlu0 %341  ;;  %v345_v44 = vpop.xlane.xlu1 %344 }
 0x120   : > { %vm364_vm2 = vcmp.gt.f32.partialorder %v342_v43, %v3541_v22  ;;  %vm416_vm3 = vcmp.lt.f32.partialorder %v342_v43, %v3543_v23  ;;  %2940 = vmatprep.mubr.msk.f32.mxu1 %vm1660_vm4, %v462_v41  ;;  %vm365_vm5 = vcmp.gt.f32.partialorder %v345_v44, %v3541_v22  ;;  %vm417_vm6 = vcmp.lt.f32.partialorder %v345_v44, %v3543_v23 }
 0x121   : > { %v2862_v46 = vsel %vm364_vm2, 1.0, %v3247_v26  ;;  %v2879_v47 = vsel %vm416_vm3, 1.0, %v3247_v26  ;;  %v2863_v48 = vsel %vm365_vm5, 1.0, %v3247_v26  ;;  %v2880_v49 = vsel %vm417_vm6, 1.0, %v3247_v26  ;;  %2941 = vmatmul.mubr.msk.f32.gmra.mrb[4].mxu1 %vm1660_vm4, %v463_v42 }
 0x122   : > { %v464_v51 = vmul.f32 %v2879_v47, %v2862_v46  ;;  %v465_v52 = vmul.f32 %v2880_v49, %v2863_v48 }
 0x123   : > { %v485_v53 = vpop.permute.xlu0 %484  ;;  %v487_v54 = vpop.permute.xlu1 %486 }
 0x124   : > { %2943 = vmatprep.mubr.msk.f32.mxu1 %vm1660_vm4, %v464_v51  ;;  %v492_v22 = vmul.f32 %v485_v53, %v3459_v10  ;;  %v490_v23 = vmul.f32 %v485_v53, %v3455_v9  ;;  %v491_v26 = vmul.f32 %v487_v54, %v3455_v9  ;;  %v494_v55 = vmul.f32 %v485_v53, %v3463_v11 }
 0x125   : > { %2944 = vmatmul.mubr.msk.f32.gmra.mrb[6].mxu1 %vm1660_vm4, %v465_v52  ;;  %v496_v56 = vmul.f32 %v485_v53, %v3479_v18  ;;  %v493_v57 = vmul.f32 %v487_v54, %v3459_v10  ;;  %v498_v58 = vmul.f32 %v485_v53, %v3490_v28  ;;  %v495_v59 = vmul.f32 %v487_v54, %v3463_v11 }
 0x126   : > { %526 = vrot.lane.b32.xlu0 %v492_v22, %s3248_s18  ;;  %522 = vrot.lane.b32.xlu1 %v490_v23, %s3248_s18  ;;  %v500_v60 = vmul.f32 %v485_v53, %v3497_v36  ;;  %v497_v61 = vmul.f32 %v487_v54, %v3479_v18  ;;  %v502_v62 = vmul.f32 %v485_v53, %v3511_v45  ;;  %vm2482_vm4 = vcmask 261120  }
 0x127   : > { %v499_v63 = vmul.f32 %v487_v54, %v3490_v28  ;;  %v504_v0 = vmul.f32 %v485_v53, %v3517_v50  ;;  %v501_v5 = vmul.f32 %v487_v54, %v3497_v36  ;;  %v503_v13 = vmul.f32 %v487_v54, %v3511_v45 }
 0x128   : > { %v505_v14 = vmul.f32 %v487_v54, %v3517_v50 }
 0x12a   : > { %530 = vrot.lane.b32.xlu0 %v494_v55, %s3248_s18  ;;  %524 = vrot.lane.b32.xlu1 %v491_v26, %s3248_s18 }
 0x12e   : > { %534 = vrot.lane.b32.xlu0 %v496_v56, %s3248_s18  ;;  %528 = vrot.lane.b32.xlu1 %v493_v57, %s3248_s18 }
 0x132   : > { %538 = vrot.lane.b32.xlu0 %v498_v58, %s3248_s18  ;;  %532 = vrot.lane.b32.xlu1 %v495_v59, %s3248_s18 }
 0x136   : > { %542 = vrot.lane.b32.xlu0 %v500_v60, %s3248_s18  ;;  %536 = vrot.lane.b32.xlu1 %v497_v61, %s3248_s18 }
 0x13a   : > { %546 = vrot.lane.b32.xlu0 %v502_v62, %s3248_s18  ;;  %540 = vrot.lane.b32.xlu1 %v499_v63, %s3248_s18 }
 0x13e   : > { %550 = vrot.lane.b32.xlu0 %v504_v0, %s3248_s18  ;;  %544 = vrot.lane.b32.xlu1 %v501_v5, %s3248_s18 }
 0x142   : > { %586 = vrot.lane.b32.xlu0 %v490_v23, %s3249_s19  ;;  %548 = vrot.lane.b32.xlu1 %v503_v13, %s3248_s18 }
 0x146   : > { %590 = vrot.lane.b32.xlu0 %v492_v22, %s3249_s19  ;;  %552 = vrot.lane.b32.xlu1 %v505_v14, %s3248_s18 }
 0x14a   : > { %594 = vrot.lane.b32.xlu0 %v494_v55, %s3249_s19  ;;  %588 = vrot.lane.b32.xlu1 %v491_v26, %s3249_s19 }
 0x14e   : > { %598 = vrot.lane.b32.xlu0 %v496_v56, %s3249_s19  ;;  %592 = vrot.lane.b32.xlu1 %v493_v57, %s3249_s19 }
 0x152   : > { %602 = vrot.lane.b32.xlu0 %v498_v58, %s3249_s19  ;;  %596 = vrot.lane.b32.xlu1 %v495_v59, %s3249_s19 }
 0x156   : > { %606 = vrot.lane.b32.xlu0 %v500_v60, %s3249_s19  ;;  %600 = vrot.lane.b32.xlu1 %v497_v61, %s3249_s19 }
 0x15a   : > { %610 = vrot.lane.b32.xlu0 %v502_v62, %s3249_s19  ;;  %604 = vrot.lane.b32.xlu1 %v499_v63, %s3249_s19 }
 0x15e   : > { %614 = vrot.lane.b32.xlu0 %v504_v0, %s3249_s19  ;;  %608 = vrot.lane.b32.xlu1 %v501_v5, %s3249_s19 }
 0x162   : > { %650 = vrot.lane.b32.xlu0 %v490_v23, %s3250_s12  ;;  %612 = vrot.lane.b32.xlu1 %v503_v13, %s3249_s19 }
 0x166   : > { %654 = vrot.lane.b32.xlu0 %v492_v22, %s3250_s12  ;;  %616 = vrot.lane.b32.xlu1 %v505_v14, %s3249_s19 }
 0x16a   : > { %658 = vrot.lane.b32.xlu0 %v494_v55, %s3250_s12  ;;  %652 = vrot.lane.b32.xlu1 %v491_v26, %s3250_s12 }
 0x16e   : > { %662 = vrot.lane.b32.xlu0 %v496_v56, %s3250_s12  ;;  %656 = vrot.lane.b32.xlu1 %v493_v57, %s3250_s12 }
 0x172   : > { %666 = vrot.lane.b32.xlu0 %v498_v58, %s3250_s12  ;;  %660 = vrot.lane.b32.xlu1 %v495_v59, %s3250_s12 }
 0x176   : > { %670 = vrot.lane.b32.xlu0 %v500_v60, %s3250_s12  ;;  %664 = vrot.lane.b32.xlu1 %v497_v61, %s3250_s12 }
 0x17a   : > { %674 = vrot.lane.b32.xlu0 %v502_v62, %s3250_s12  ;;  %668 = vrot.lane.b32.xlu1 %v499_v63, %s3250_s12 }
 0x17e   : > { %678 = vrot.lane.b32.xlu0 %v504_v0, %s3250_s12  ;;  %672 = vrot.lane.b32.xlu1 %v501_v5, %s3250_s12 }
 0x182   : > { %714 = vrot.lane.b32.xlu0 %v3448_v6, %s3250_s12  ;;  %676 = vrot.lane.b32.xlu1 %v503_v13, %s3250_s12 }
 0x186   : > { %680 = vrot.lane.b32.xlu1 %v505_v14, %s3250_s12 }
 0x18a   : > { %716 = vrot.lane.b32.xlu1 %v3450_v7, %s3250_s12 }
 0x198   : > { %v3677_v15 = vpop.permute.xlu0 %526  ;;  %v3679_v16 = vpop.permute.xlu1 %522 }
 0x199   : > { %5490 = vst [vmem:[#allocation11_spill] sm:$0xff] %v3677_v15  ;;  %5491 = vst [vmem:[#allocation12_spill] sm:$0xff] %v3679_v16 }
 0x19c   : > { %v3681_v17 = vpop.permute.xlu0 %530  ;;  %v3683_v20 = vpop.permute.xlu1 %524 }
 0x19d   : > { %5492 = vst [vmem:[#allocation13_spill] sm:$0xff] %v3681_v17  ;;  %5493 = vst [vmem:[#allocation14_spill] sm:$0xff] %v3683_v20 }
 0x1a0   : > { %v3685_v21 = vpop.permute.xlu0 %534  ;;  %v3687_v24 = vpop.permute.xlu1 %528 }
 0x1a1   : > { %5494 = vst [vmem:[#allocation15_spill] sm:$0xff] %v3685_v21  ;;  %5495 = vst [vmem:[#allocation16_spill] sm:$0xff] %v3687_v24 }
 0x1a4   : > { %v3689_v25 = vpop.permute.xlu0 %538  ;;  %v3691_v27 = vpop.permute.xlu1 %532 }
 0x1a5   : > { %5496 = vst [vmem:[#allocation17_spill] sm:$0xff] %v3689_v25  ;;  %5497 = vst [vmem:[#allocation18_spill] sm:$0xff] %v3691_v27 }
 0x1a8   : > { %v3693_v30 = vpop.permute.xlu0 %542  ;;  %v3695_v31 = vpop.permute.xlu1 %536 }
 0x1a9   : > { %5498 = vst [vmem:[#allocation19_spill] sm:$0xff] %v3693_v30  ;;  %5499 = vst [vmem:[#allocation20_spill] sm:$0xff] %v3695_v31 }
 0x1ac   : > { %v3697_v32 = vpop.permute.xlu0 %546  ;;  %v3699_v33 = vpop.permute.xlu1 %540 }
 0x1ad   : > { %5500 = vst [vmem:[#allocation21_spill] sm:$0xff] %v3697_v32  ;;  %5501 = vst [vmem:[#allocation22_spill] sm:$0xff] %v3699_v33 }
 0x1b0   : > { %v3701_v34 = vpop.permute.xlu0 %550  ;;  %v3703_v35 = vpop.permute.xlu1 %544 }
 0x1b1   : > { %5502 = vst [vmem:[#allocation23_spill] sm:$0xff] %v3701_v34  ;;  %5503 = vst [vmem:[#allocation24_spill] sm:$0xff] %v3703_v35 }
 0x1b4   : > { %v3705_v38 = vpop.permute.xlu0 %586  ;;  %v3707_v39 = vpop.permute.xlu1 %548 }
 0x1b5   : > { %5504 = vst [vmem:[#allocation25_spill] sm:$0xff] %v3705_v38  ;;  %5505 = vst [vmem:[#allocation26_spill] sm:$0xff] %v3707_v39 }
 0x1b8   : > { %v3709_v40 = vpop.permute.xlu0 %590  ;;  %v3711_v41 = vpop.permute.xlu1 %552 }
 0x1b9   : > { %5506 = vst [vmem:[#allocation27_spill] sm:$0xff] %v3709_v40  ;;  %5507 = vst [vmem:[#allocation28_spill] sm:$0xff] %v3711_v41 }
 0x1bc   : > { %v3713_v42 = vpop.permute.xlu0 %594  ;;  %v3715_v43 = vpop.permute.xlu1 %588 }
 0x1bd   : > { %5508 = vst [vmem:[#allocation29_spill] sm:$0xff] %v3713_v42  ;;  %5509 = vst [vmem:[#allocation30_spill] sm:$0xff] %v3715_v43 }
 0x1c0   : > { %v3717_v44 = vpop.permute.xlu0 %598  ;;  %v3719_v46 = vpop.permute.xlu1 %592 }
 0x1c1   : > { %5510 = vst [vmem:[#allocation31_spill] sm:$0xff] %v3717_v44  ;;  %5511 = vst [vmem:[#allocation32_spill] sm:$0xff] %v3719_v46 }
 0x1c4   : > { %v3721_v47 = vpop.permute.xlu0 %602  ;;  %v3723_v48 = vpop.permute.xlu1 %596 }
 0x1c5   : > { %5512 = vst [vmem:[#allocation33_spill] sm:$0xff] %v3721_v47  ;;  %5513 = vst [vmem:[#allocation34_spill] sm:$0xff] %v3723_v48 }
 0x1c8   : > { %v3725_v49 = vpop.permute.xlu0 %606  ;;  %v3727_v51 = vpop.permute.xlu1 %600 }
 0x1c9   : > { %5514 = vst [vmem:[#allocation35_spill] sm:$0xff] %v3725_v49  ;;  %5515 = vst [vmem:[#allocation36_spill] sm:$0xff] %v3727_v51 }
 0x1cc   : > { %v3729_v52 = vpop.permute.xlu0 %610  ;;  %v3731_v53 = vpop.permute.xlu1 %604 }
 0x1cd   : > { %5516 = vst [vmem:[#allocation37_spill] sm:$0xff] %v3729_v52  ;;  %5517 = vst [vmem:[#allocation38_spill] sm:$0xff] %v3731_v53 }
 0x1d0   : > { %v3733_v54 = vpop.permute.xlu0 %614  ;;  %v3735_v22 = vpop.permute.xlu1 %608 }
 0x1d1   : > { %5518 = vst [vmem:[#allocation39_spill] sm:$0xff] %v3733_v54  ;;  %5519 = vst [vmem:[#allocation40_spill] sm:$0xff] %v3735_v22 }
 0x1d4   : > { %v3737_v23 = vpop.permute.xlu0 %650  ;;  %v3739_v26 = vpop.permute.xlu1 %612 }
 0x1d5   : > { %5520 = vst [vmem:[#allocation41_spill] sm:$0xff] %v3737_v23  ;;  %5521 = vst [vmem:[#allocation42_spill] sm:$0xff] %v3739_v26 }
 0x1d8   : > { %v3741_v55 = vpop.permute.xlu0 %654  ;;  %v3743_v56 = vpop.permute.xlu1 %616 }
 0x1d9   : > { %5522 = vst [vmem:[#allocation43_spill] sm:$0xff] %v3741_v55  ;;  %5523 = vst [vmem:[#allocation44_spill] sm:$0xff] %v3743_v56 }
 0x1dc   : > { %v3745_v57 = vpop.permute.xlu0 %658  ;;  %v3747_v58 = vpop.permute.xlu1 %652 }
 0x1dd   : > { %5524 = vst [vmem:[#allocation45_spill] sm:$0xff] %v3745_v57  ;;  %5525 = vst [vmem:[#allocation46_spill] sm:$0xff] %v3747_v58 }
 0x1df   : > { %v3749_v59 = vpop.f32.mrb[0].mxu0 }
 0x1e0   : > { %5526 = vst [vmem:[#allocation47_spill] sm:$0xff] %v3749_v59  ;;  %v3751_v60 = vpop.f32.mrb[1].mxu0  ;;  %v3753_v61 = vpop.permute.xlu0 %662 }
 0x1e1   : > { %5527 = vst [vmem:[#allocation48_spill] sm:$0xff] %v3751_v60  ;;  %5528 = vst [vmem:[#allocation49_spill] sm:$0xff] %v3753_v61  ;;  %v3755_v62 = vpop.permute.xlu1 %656 }
 0x1e2   : > { %5529 = vst [vmem:[#allocation50_spill] sm:$0xff] %v3755_v62 }
 0x1e3   : > { %v3757_v63 = vpop.f32.mrb[2].mxu0 }
 0x1e4   : > { %5530 = vst [vmem:[#allocation51_spill] sm:$0xff] %v3757_v63  ;;  %v3759_v0 = vpop.f32.mrb[3].mxu0  ;;  %v3761_v5 = vpop.permute.xlu0 %666 }
 0x1e5   : > { %5531 = vst [vmem:[#allocation52_spill] sm:$0xff] %v3759_v0  ;;  %5532 = vst [vmem:[#allocation53_spill] sm:$0xff] %v3761_v5  ;;  %v3763_v13 = vpop.permute.xlu1 %660 }
 0x1e6   : > { %5533 = vst [vmem:[#allocation54_spill] sm:$0xff] %v3763_v13 }
 0x1e7   : > { %v3765_v14 = vpop.f32.mrb[4].mxu0 }
 0x1e8   : > { %5534 = vst [vmem:[#allocation55_spill] sm:$0xff] %v3765_v14  ;;  %v3767_v37 = vpop.f32.mrb[5].mxu0  ;;  %v3769_v29 = vpop.permute.xlu0 %670 }
 0x1e9   : > { %5535 = vst [vmem:[#allocation56_spill] sm:$0xff] %v3767_v37  ;;  %5536 = vst [vmem:[#allocation57_spill] sm:$0xff] %v3769_v29  ;;  %v3771_v19 = vpop.permute.xlu1 %664 }
 0x1ea   : > { %5537 = vst [vmem:[#allocation58_spill] sm:$0xff] %v3771_v19 }
 0x1eb   : > { %v3773_v8 = vpop.f32.mrb[6].mxu0 }
 0x1ec   : > { %5538 = vst [vmem:[#allocation59_spill] sm:$0xff] %v3773_v8  ;;  %v3775_v4 = vpop.f32.mrb[7].mxu0  ;;  %v3777_v3 = vpop.permute.xlu0 %674 }
 0x1ed   : > { %5539 = vst [vmem:[#allocation60_spill] sm:$0xff] %v3775_v4  ;;  %5540 = vst [vmem:[#allocation61_spill] sm:$0xff] %v3777_v3  ;;  %v3779_v2 = vpop.permute.xlu1 %668  ;;  %v3781_v1 = vpop.f32.mrb[0].mxu1 }
 0x1ee   : > { %5541 = vst [vmem:[#allocation62_spill] sm:$0xff] %v3779_v2  ;;  %5542 = vst [vmem:[#allocation63_spill] sm:$0xff] %v3781_v1  ;;  %v3783_v0 = vpop.f32.mrb[1].mxu1 }
 0x1ef   : > { %5543 = vst [vmem:[#allocation64_spill] sm:$0xff] %v3783_v0 }
 0x1f0   : > { %v3785_v59 = vpop.permute.xlu0 %678  ;;  %v3787_v14 = vpop.f32.mrb[2].mxu1 }
 0x1f1   : > { %5544 = vst [vmem:[#allocation65_spill] sm:$0xff] %v3785_v59  ;;  %5545 = vst [vmem:[#allocation66_spill] sm:$0xff] %v3787_v14  ;;  %v3789_v37 = vpop.permute.xlu1 %672  ;;  %v3791_v63 = vpop.f32.mrb[3].mxu1 }
 0x1f2   : > { %5546 = vst [vmem:[#allocation67_spill] sm:$0xff] %v3789_v37  ;;  %5547 = vst [vmem:[#allocation68_spill] sm:$0xff] %v3791_v63 }
 0x1f4   : > { %v715_v12 = vpop.permute.xlu0 %714  ;;  %v3793_v8 = vpop.f32.mrb[4].mxu1 }
 0x1f5   : > { %5548 = vst [vmem:[#allocation69_spill] sm:$0xff] %v3793_v8  ;;  %v3795_v4 = vpop.permute.xlu1 %676  ;;  %v3797_v60 = vpop.f32.mrb[5].mxu1  ;;  %v720_v56 = vmul.f32 %v715_v12, %v3455_v9  ;;  %v722_v0 = vmul.f32 %v715_v12, %v3459_v10  ;;  %v724_v63 = vmul.f32 %v715_v12, %v3463_v11  ;;  %v732_v59 = vmul.f32 %v715_v12, %v3511_v45 }
 0x1f6   : > { %5549 = vst [vmem:[#allocation70_spill] sm:$0xff] %v3795_v4  ;;  %5550 = vst [vmem:[#allocation71_spill] sm:$0xff] %v3797_v60  ;;  %v726_v60 = vmul.f32 %v715_v12, %v3479_v18  ;;  %v734_v39 = vmul.f32 %v715_v12, %v3517_v50 }
 0x1f7   : > { %752 = vrot.lane.b32.xlu0 %v720_v56, %s3250_s12 }
 0x1f8   : > { %v3802_v1 = vpop.f32.mrb[6].mxu1 }
 0x1f9   : > { %5551 = vst [vmem:[#allocation72_spill] sm:$0xff] %v3802_v1  ;;  %v3804_v14 = vpop.permute.xlu1 %680  ;;  %v3806_v26 = vpop.f32.mrb[7].mxu1  ;;  %v728_v1 = vmul.f32 %v715_v12, %v3490_v28 }
 0x1fa   : > { %5552 = vst [vmem:[#allocation73_spill] sm:$0xff] %v3804_v14  ;;  %5553 = vst [vmem:[#allocation74_spill] sm:$0xff] %v3806_v26  ;;  %v730_v14 = vmul.f32 %v715_v12, %v3497_v36 }
 0x1fb   : > { %756 = vrot.lane.b32.xlu0 %v722_v0, %s3250_s12 }
 0x1fd   : > { %v717_v8 = vpop.permute.xlu1 %716 }
 0x1fe   : > { %v721_v4 = vmul.f32 %v717_v8, %v3455_v9  ;;  %v723_v41 = vmul.f32 %v717_v8, %v3459_v10  ;;  %v725_v26 = vmul.f32 %v717_v8, %v3463_v11  ;;  %v727_v37 = vmul.f32 %v717_v8, %v3479_v18 }
 0x1ff   : > { %760 = vrot.lane.b32.xlu0 %v724_v63, %s3250_s12  ;;  %v729_v22 = vmul.f32 %v717_v8, %v3490_v28  ;;  %v731_v2 = vmul.f32 %v717_v8, %v3497_v36  ;;  %v733_v3 = vmul.f32 %v717_v8, %v3511_v45  ;;  %v735_v54 = vmul.f32 %v717_v8, %v3517_v50 }
 0x200   : > { %754 = vrot.lane.b32.xlu1 %v721_v4, %s3250_s12 }
 0x203   : > { %764 = vrot.lane.b32.xlu0 %v726_v60, %s3250_s12 }
 0x204   : > { %758 = vrot.lane.b32.xlu1 %v723_v41, %s3250_s12 }
 0x207   : > { %768 = vrot.lane.b32.xlu0 %v728_v1, %s3250_s12 }
 0x208   : > { %762 = vrot.lane.b32.xlu1 %v725_v26, %s3250_s12 }
 0x20b   : > { %772 = vrot.lane.b32.xlu0 %v730_v14, %s3250_s12 }
 0x20c   : > { %766 = vrot.lane.b32.xlu1 %v727_v37, %s3250_s12 }
 0x20f   : > { %776 = vrot.lane.b32.xlu0 %v732_v59, %s3250_s12 }
 0x210   : > { %770 = vrot.lane.b32.xlu1 %v729_v22, %s3250_s12 }
 0x213   : > { %780 = vrot.lane.b32.xlu0 %v734_v39, %s3250_s12 }
 0x214   : > { %774 = vrot.lane.b32.xlu1 %v731_v2, %s3250_s12 }
 0x217   : > { %816 = vrot.lane.b32.xlu0 %v720_v56, %s3251_s6 }
 0x218   : > { %778 = vrot.lane.b32.xlu1 %v733_v3, %s3250_s12 }
 0x21b   : > { %820 = vrot.lane.b32.xlu0 %v722_v0, %s3251_s6 }
 0x21c   : > { %782 = vrot.lane.b32.xlu1 %v735_v54, %s3250_s12 }
 0x21f   : > { %824 = vrot.lane.b32.xlu0 %v724_v63, %s3251_s6 }
 0x220   : > { %818 = vrot.lane.b32.xlu1 %v721_v4, %s3251_s6 }
 0x223   : > { %828 = vrot.lane.b32.xlu0 %v726_v60, %s3251_s6 }
 0x224   : > { %822 = vrot.lane.b32.xlu1 %v723_v41, %s3251_s6 }
 0x227   : > { %832 = vrot.lane.b32.xlu0 %v728_v1, %s3251_s6 }
 0x228   : > { %826 = vrot.lane.b32.xlu1 %v725_v26, %s3251_s6 }
 0x22b   : > { %836 = vrot.lane.b32.xlu0 %v730_v14, %s3251_s6 }
 0x22c   : > { %830 = vrot.lane.b32.xlu1 %v727_v37, %s3251_s6 }
 0x22f   : > { %840 = vrot.lane.b32.xlu0 %v732_v59, %s3251_s6 }
 0x230   : > { %834 = vrot.lane.b32.xlu1 %v729_v22, %s3251_s6 }
 0x233   : > { %844 = vrot.lane.b32.xlu0 %v734_v39, %s3251_s6 }
 0x234   : > { %838 = vrot.lane.b32.xlu1 %v731_v2, %s3251_s6 }
 0x237   : > { %880 = vrot.lane.b32.xlu0 %v720_v56, %s3252_s7 }
 0x238   : > { %842 = vrot.lane.b32.xlu1 %v733_v3, %s3251_s6 }
 0x23b   : > { %884 = vrot.lane.b32.xlu0 %v722_v0, %s3252_s7 }
 0x23c   : > { %846 = vrot.lane.b32.xlu1 %v735_v54, %s3251_s6 }
 0x23f   : > { %888 = vrot.lane.b32.xlu0 %v724_v63, %s3252_s7 }
 0x240   : > { %882 = vrot.lane.b32.xlu1 %v721_v4, %s3252_s7 }
 0x243   : > { %892 = vrot.lane.b32.xlu0 %v726_v60, %s3252_s7 }
 0x244   : > { %886 = vrot.lane.b32.xlu1 %v723_v41, %s3252_s7 }
 0x247   : > { %896 = vrot.lane.b32.xlu0 %v728_v1, %s3252_s7 }
 0x248   : > { %890 = vrot.lane.b32.xlu1 %v725_v26, %s3252_s7 }
 0x24b   : > { %900 = vrot.lane.b32.xlu0 %v730_v14, %s3252_s7 }
 0x24c   : > { %894 = vrot.lane.b32.xlu1 %v727_v37, %s3252_s7 }
 0x24f   : > { %904 = vrot.lane.b32.xlu0 %v732_v59, %s3252_s7 }
 0x250   : > { %898 = vrot.lane.b32.xlu1 %v729_v22, %s3252_s7 }
 0x253   : > { %908 = vrot.lane.b32.xlu0 %v734_v39, %s3252_s7 }
 0x254   : > { %902 = vrot.lane.b32.xlu1 %v731_v2, %s3252_s7 }
 0x257   : > { %944 = vrot.lane.b32.xlu0 %v3448_v6, %s3253_s20 }
 0x258   : > { %906 = vrot.lane.b32.xlu1 %v733_v3, %s3252_s7 }
 0x25c   : > { %910 = vrot.lane.b32.xlu1 %v735_v54, %s3252_s7 }
 0x260   : > { %946 = vrot.lane.b32.xlu1 %v3450_v7, %s3253_s20 }
 0x269   : > { %v3857_v1 = vpop.permute.xlu0 %752 }
 0x26d   : > { %v3859_v4 = vpop.permute.xlu0 %756 }
 0x271   : > { %v3861_v8 = vpop.permute.xlu0 %760 }
 0x272   : > { %v3863_v37 = vpop.permute.xlu1 %754 }
 0x275   : > { %v3865_v2 = vpop.permute.xlu0 %764 }
 0x276   : > { %v3867_v12 = vpop.permute.xlu1 %758 }
 0x279   : > { %v3869_v6 = vpop.permute.xlu0 %768 }
 0x27a   : > { %v3871_v3 = vpop.permute.xlu1 %762 }
 0x27d   : > { %v3873_v39 = vpop.permute.xlu0 %772 }
 0x27e   : > { %v3875_v41 = vpop.permute.xlu1 %766 }
 0x281   : > { %v3877_v7 = vpop.permute.xlu0 %776 }
 0x282   : > { %v3879_v54 = vpop.permute.xlu1 %770 }
 0x285   : > { %v3881_v22 = vpop.permute.xlu0 %780 }
 0x286   : > { %v3883_v26 = vpop.permute.xlu1 %774 }
 0x289   : > { %v3885_v56 = vpop.permute.xlu0 %816 }
 0x28a   : > { %v3887_v59 = vpop.permute.xlu1 %778 }
 0x28b   : > { %5554 = vst [vmem:[#allocation75_spill] sm:$0xff] %v3887_v59 }
 0x28d   : > { %v3889_v60 = vpop.permute.xlu0 %820 }
 0x28e   : > { %v3891_v63 = vpop.permute.xlu1 %782 }
 0x28f   : > { %5555 = vst [vmem:[#allocation76_spill] sm:$0xff] %v3891_v63 }
 0x291   : > { %v3893_v0 = vpop.permute.xlu0 %824 }
 0x292   : > { %v3895_v14 = vpop.permute.xlu1 %818 }
 0x295   : > { %v3897_v53 = vpop.permute.xlu0 %828 }
 0x296   : > { %v3899_v52 = vpop.permute.xlu1 %822 }
 0x299   : > { %v3901_v35 = vpop.permute.xlu0 %832 }
 0x29a   : > { %v3903_v19 = vpop.permute.xlu1 %826 }
 0x29d   : > { %v3905_v34 = vpop.permute.xlu0 %836 }
 0x29e   : > { %v3907_v29 = vpop.permute.xlu1 %830 }
 0x2a1   : > { %v3909_v51 = vpop.permute.xlu0 %840 }
 0x2a2   : > { %v3911_v33 = vpop.permute.xlu1 %834 }
 0x2a5   : > { %v3913_v32 = vpop.permute.xlu0 %844 }
 0x2a6   : > { %5556 = vst [vmem:[#allocation77_spill] sm:$0xff] %v3913_v32  ;;  %v3915_v49 = vpop.permute.xlu1 %838 }
 0x2a7   : > { %5557 = vst [vmem:[#allocation78_spill] sm:$0xff] %v3915_v49 }
 0x2a9   : > { %v3917_v31 = vpop.permute.xlu0 %880 }
 0x2aa   : > { %v3919_v13 = vpop.permute.xlu1 %842 }
 0x2ab   : > { %5558 = vst [vmem:[#allocation79_spill] sm:$0xff] %v3919_v13 }
 0x2ad   : > { %v3921_v5 = vpop.permute.xlu0 %884 }
 0x2ae   : > { %v3923_v30 = vpop.permute.xlu1 %846 }
 0x2af   : > { %5559 = vst [vmem:[#allocation80_spill] sm:$0xff] %v3923_v30 }
 0x2b1   : > { %v3925_v48 = vpop.permute.xlu0 %888 }
 0x2b2   : > { %v3927_v62 = vpop.permute.xlu1 %882 }
 0x2b5   : > { %v3929_v47 = vpop.permute.xlu0 %892 }
 0x2b6   : > { %v3931_v61 = vpop.permute.xlu1 %886 }
 0x2b9   : > { %v3933_v27 = vpop.permute.xlu0 %896 }
 0x2ba   : > { %v3935_v46 = vpop.permute.xlu1 %890 }
 0x2bd   : > { %v3937_v25 = vpop.permute.xlu0 %900 }
 0x2be   : > { %v3939_v44 = vpop.permute.xlu1 %894 }
 0x2c1   : > { %v3941_v58 = vpop.permute.xlu0 %904 }
 0x2c2   : > { %v3943_v24 = vpop.permute.xlu1 %898 }
 0x2c5   : > { %v3945_v21 = vpop.permute.xlu0 %908 }
 0x2c6   : > { %5560 = vst [vmem:[#allocation81_spill] sm:$0xff] %v3945_v21  ;;  %v3947_v57 = vpop.permute.xlu1 %902 }
 0x2c7   : > { %5561 = vst [vmem:[#allocation82_spill] sm:$0xff] %v3947_v57 }
 0x2c9   : > { %v945_v43 = vpop.permute.xlu0 %944 }
 0x2ca   : > { %v3949_v42 = vpop.permute.xlu1 %906  ;;  %v950_v20 = vmul.f32 %v945_v43, %v3455_v9  ;;  %v952_v55 = vmul.f32 %v945_v43, %v3459_v10  ;;  %v954_v40 = vmul.f32 %v945_v43, %v3463_v11  ;;  %v956_v38 = vmul.f32 %v945_v43, %v3479_v18 }
 0x2cb   : > { %5562 = vst [vmem:[#allocation83_spill] sm:$0xff] %v3949_v42  ;;  %v958_v30 = vmul.f32 %v945_v43, %v3490_v28  ;;  %v960_v42 = vmul.f32 %v945_v43, %v3497_v36  ;;  %v962_v13 = vmul.f32 %v945_v43, %v3511_v45  ;;  %v964_v59 = vmul.f32 %v945_v43, %v3517_v50 }
 0x2cc   : > { %982 = vrot.lane.b32.xlu0 %v950_v20, %s3252_s7 }
 0x2ce   : > { %v3954_v17 = vpop.permute.xlu1 %910 }
 0x2cf   : > { %5563 = vst [vmem:[#allocation84_spill] sm:$0xff] %v3954_v17 }
 0x2d0   : > { %986 = vrot.lane.b32.xlu0 %v952_v55, %s3252_s7 }
 0x2d2   : > { %v947_v23 = vpop.permute.xlu1 %946 }
 0x2d3   : > { %v951_v15 = vmul.f32 %v947_v23, %v3455_v9  ;;  %v953_v16 = vmul.f32 %v947_v23, %v3459_v10  ;;  %v955_v17 = vmul.f32 %v947_v23, %v3463_v11  ;;  %v957_v63 = vmul.f32 %v947_v23, %v3479_v18 }
 0x2d4   : > { %990 = vrot.lane.b32.xlu0 %v954_v40, %s3252_s7  ;;  %v959_v57 = vmul.f32 %v947_v23, %v3490_v28  ;;  %v961_v21 = vmul.f32 %v947_v23, %v3497_v36  ;;  %v963_v49 = vmul.f32 %v947_v23, %v3511_v45  ;;  %v965_v32 = vmul.f32 %v947_v23, %v3517_v50 }
 0x2d5   : > { %984 = vrot.lane.b32.xlu1 %v951_v15, %s3252_s7 }
 0x2d8   : > { %994 = vrot.lane.b32.xlu0 %v956_v38, %s3252_s7 }
 0x2d9   : > { %988 = vrot.lane.b32.xlu1 %v953_v16, %s3252_s7 }
 0x2dc   : > { %998 = vrot.lane.b32.xlu0 %v958_v30, %s3252_s7 }
 0x2dd   : > { %992 = vrot.lane.b32.xlu1 %v955_v17, %s3252_s7 }
 0x2e0   : > { %1002 = vrot.lane.b32.xlu0 %v960_v42, %s3252_s7 }
 0x2e1   : > { %996 = vrot.lane.b32.xlu1 %v957_v63, %s3252_s7 }
 0x2e4   : > { %1006 = vrot.lane.b32.xlu0 %v962_v13, %s3252_s7 }
 0x2e5   : > { %1000 = vrot.lane.b32.xlu1 %v959_v57, %s3252_s7 }
 0x2e8   : > { %1010 = vrot.lane.b32.xlu0 %v964_v59, %s3252_s7 }
 0x2e9   : > { %1004 = vrot.lane.b32.xlu1 %v961_v21, %s3252_s7 }
 0x2ec   : > { %1046 = vrot.lane.b32.xlu0 %v950_v20, %s3246_s17 }
 0x2ed   : > { %1008 = vrot.lane.b32.xlu1 %v963_v49, %s3252_s7 }
 0x2f0   : > { %1050 = vrot.lane.b32.xlu0 %v952_v55, %s3246_s17 }
 0x2f1   : > { %1012 = vrot.lane.b32.xlu1 %v965_v32, %s3252_s7 }
 0x2f4   : > { %1054 = vrot.lane.b32.xlu0 %v954_v40, %s3246_s17 }
 0x2f5   : > { %1048 = vrot.lane.b32.xlu1 %v951_v15, %s3246_s17 }
 0x2f8   : > { %1058 = vrot.lane.b32.xlu0 %v956_v38, %s3246_s17 }
 0x2f9   : > { %1052 = vrot.lane.b32.xlu1 %v953_v16, %s3246_s17 }
 0x2fc   : > { %1062 = vrot.lane.b32.xlu0 %v958_v30, %s3246_s17 }
 0x2fd   : > { %1056 = vrot.lane.b32.xlu1 %v955_v17, %s3246_s17 }
 0x300   : > { %1066 = vrot.lane.b32.xlu0 %v960_v42, %s3246_s17 }
 0x301   : > { %1060 = vrot.lane.b32.xlu1 %v957_v63, %s3246_s17 }
 0x304   : > { %1070 = vrot.lane.b32.xlu0 %v962_v13, %s3246_s17 }
 0x305   : > { %1064 = vrot.lane.b32.xlu1 %v959_v57, %s3246_s17 }
 0x308   : > { %1074 = vrot.lane.b32.xlu0 %v964_v59, %s3246_s17 }
 0x309   : > { %1068 = vrot.lane.b32.xlu1 %v961_v21, %s3246_s17 }
 0x30c   : > { %1110 = vrot.lane.b32.xlu0 %v950_v20, %s3254_s23  ;;  %v800_v20 = vadd.f32 %v3857_v1, %v3455_v9 }
 0x30d   : > { %1072 = vrot.lane.b32.xlu1 %v963_v49, %s3246_s17 }
 0x30e   : > { %v864_v43 = vadd.f32 %v3885_v56, %v800_v20  ;;  %v5578_v20 = vld [vmem:[#allocation81_spill] sm:$0xff] }
 0x310   : > { %1114 = vrot.lane.b32.xlu0 %v952_v55, %s3254_s23 }
 0x311   : > { %1076 = vrot.lane.b32.xlu1 %v965_v32, %s3246_s17 }
 0x314   : > { %1118 = vrot.lane.b32.xlu0 %v954_v40, %s3254_s23 }
 0x315   : > { %1112 = vrot.lane.b32.xlu1 %v951_v15, %s3254_s23  ;;  %v802_v15 = vadd.f32 %v3859_v4, %v3459_v10  ;;  %v808_v4 = vadd.f32 %v3869_v6, %v3490_v28 }
 0x318   : > { %1122 = vrot.lane.b32.xlu0 %v956_v38, %s3254_s23 }
 0x319   : > { %1116 = vrot.lane.b32.xlu1 %v953_v16, %s3254_s23  ;;  %v4019_v16 = vadd.f32 %v3917_v31, %v864_v43 }
 0x31b   : > { %5564 = vst [vmem:[#allocation85_spill] sm:$0xff] %v4019_v16  ;;  %v1206_v38 = vmul.f32 %v4019_v16, %v4019_v16 }
 0x31c   : > { %1126 = vrot.lane.b32.xlu0 %v958_v30, %s3254_s23  ;;  %v804_v30 = vadd.f32 %v3861_v8, %v3463_v11 }
 0x31d   : > { %1120 = vrot.lane.b32.xlu1 %v955_v17, %s3254_s23  ;;  %v866_v17 = vadd.f32 %v3889_v60, %v802_v15  ;;  %v5580_v15 = vld [vmem:[#allocation75_spill] sm:$0xff] }
 0x31e   : > { %v868_v31 = vadd.f32 %v3893_v0, %v804_v30  ;;  %v5581_v30 = vld [vmem:[#allocation82_spill] sm:$0xff] }
 0x31f   : > { %v4029_v40 = vadd.f32 %v3921_v5, %v866_v17  ;;  %v803_v5 = vadd.f32 %v3867_v12, %v3459_v10  ;;  %v813_v17 = vadd.f32 %v5580_v15, %v3511_v45 }
 0x320   : > { %1130 = vrot.lane.b32.xlu0 %v960_v42, %s3254_s23  ;;  %v801_v42 = vadd.f32 %v3863_v37, %v3455_v9 }
 0x321   : > { %1124 = vrot.lane.b32.xlu1 %v957_v63, %s3254_s23  ;;  %5565 = vst [vmem:[#allocation86_spill] sm:$0xff] %v4029_v40  ;;  %v1208_v55 = vmul.f32 %v4029_v40, %v4029_v40  ;;  %v5576_v63 = vld [vmem:[#allocation77_spill] sm:$0xff] }
 0x322   : > { %v865_v23 = vadd.f32 %v3895_v14, %v801_v42  ;;  %v5583_v42 = vld [vmem:[#allocation79_spill] sm:$0xff] }
 0x324   : > { %1134 = vrot.lane.b32.xlu0 %v962_v13, %s3254_s23  ;;  %v4047_v13 = vadd.f32 %v3927_v62, %v865_v23  ;;  %v805_v62 = vadd.f32 %v3871_v3, %v3463_v11 }
 0x325   : > { %1128 = vrot.lane.b32.xlu1 %v959_v57, %s3254_s23  ;;  %v4042_v57 = vadd.f32 %v3925_v48, %v868_v31  ;;  %v877_v31 = vadd.f32 %v5583_v42, %v813_v17 }
 0x326   : > { %5567 = vst [vmem:[#allocation88_spill] sm:$0xff] %v4047_v13 }
 0x327   : > { %5566 = vst [vmem:[#allocation87_spill] sm:$0xff] %v4042_v57  ;;  %v1210_v48 = vmul.f32 %v4042_v57, %v4042_v57 }
 0x328   : > { %1138 = vrot.lane.b32.xlu0 %v964_v59, %s3254_s23 }
 0x329   : > { %1132 = vrot.lane.b32.xlu1 %v961_v21, %s3254_s23  ;;  %v806_v21 = vadd.f32 %v3865_v2, %v3479_v18 }
 0x32b   : > { %v870_v1 = vadd.f32 %v3897_v53, %v806_v21  ;;  %v1207_v53 = vmul.f32 %v4047_v13, %v4047_v13  ;;  %v5625_v13 = vld [vmem:[#allocation14_spill] sm:$0xff] }
 0x32c   : > { %1238 = vrot.lane.b32.xlu0 %v1206_v38, %s3255_s25 }
 0x32d   : > { %1136 = vrot.lane.b32.xlu1 %v963_v49, %s3254_s23  ;;  %v867_v49 = vadd.f32 %v3899_v52, %v803_v5  ;;  %v4058_v8 = vadd.f32 %v3929_v47, %v870_v1  ;;  %v869_v52 = vadd.f32 %v3903_v19, %v805_v62  ;;  %v810_v47 = vadd.f32 %v3873_v39, %v3497_v36  ;;  %v5587_v62 = vld [vmem:[#allocation80_spill] sm:$0xff] }
 0x32f   : > { %5568 = vst [vmem:[#allocation89_spill] sm:$0xff] %v4058_v8  ;;  %v4065_v37 = vadd.f32 %v3931_v61, %v867_v49  ;;  %v1212_v2 = vmul.f32 %v4058_v8, %v4058_v8  ;;  %v807_v61 = vadd.f32 %v3875_v41, %v3479_v18  ;;  %v4083_v6 = vadd.f32 %v3935_v46, %v869_v52  ;;  %v5585_v49 = vld [vmem:[#allocation83_spill] sm:$0xff] }
 0x330   : > { %1242 = vrot.lane.b32.xlu0 %v1208_v55, %s3255_s25  ;;  %v874_v19 = vadd.f32 %v3905_v34, %v810_v47  ;;  %v809_v46 = vadd.f32 %v3879_v54, %v3490_v28  ;;  %v5584_v55 = vld [vmem:[#allocation76_spill] sm:$0xff]  ;;  %v5621_v8 = vld [vmem:[#allocation27_spill] sm:$0xff] }
 0x331   : > { %1140 = vrot.lane.b32.xlu1 %v965_v32, %s3254_s23  ;;  %5569 = vst [vmem:[#allocation90_spill] sm:$0xff] %v4065_v37  ;;  %v872_v32 = vadd.f32 %v3901_v35, %v808_v4  ;;  %v1209_v35 = vmul.f32 %v4065_v37, %v4065_v37  ;;  %5571 = vst [vmem:[#allocation92_spill] sm:$0xff] %v4083_v6  ;;  %v871_v3 = vadd.f32 %v3907_v29, %v807_v61  ;;  %v5588_v47 = vld [vmem:[#allocation84_spill] sm:$0xff]  ;;  %v5630_v37 = vld [vmem:[#allocation15_spill] sm:$0xff] }
 0x332   : > { %v4094_v41 = vadd.f32 %v3937_v25, %v874_v19  ;;  %v1211_v34 = vmul.f32 %v4083_v6, %v4083_v6  ;;  %v814_v25 = vadd.f32 %v3881_v22, %v3517_v50  ;;  %v5577_v22 = vld [vmem:[#allocation78_spill] sm:$0xff]  ;;  %v815_v5 = vadd.f32 %v5584_v55, %v3517_v50 }
 0x333   : > { %v4076_v12 = vadd.f32 %v3933_v27, %v872_v32  ;;  %v812_v27 = vadd.f32 %v3877_v7, %v3511_v45  ;;  %v4101_v56 = vadd.f32 %v3939_v44, %v871_v3  ;;  %v873_v7 = vadd.f32 %v3911_v33, %v809_v46 }
 0x334   : > { %1246 = vrot.lane.b32.xlu0 %v1210_v48, %s3255_s25  ;;  %5572 = vst [vmem:[#allocation93_spill] sm:$0xff] %v4094_v41  ;;  %v1216_v54 = vmul.f32 %v4094_v41, %v4094_v41  ;;  %v811_v44 = vadd.f32 %v3883_v26, %v3497_v36  ;;  %v878_v0 = vadd.f32 %v5576_v63, %v814_v25  ;;  %v5618_v41 = vld [vmem:[#allocation11_spill] sm:$0xff] }
 0x335   : > { %1240 = vrot.lane.b32.xlu1 %v1207_v53, %s3255_s25  ;;  %5570 = vst [vmem:[#allocation91_spill] sm:$0xff] %v4076_v12  ;;  %v1214_v39 = vmul.f32 %v4076_v12, %v4076_v12  ;;  %5573 = vst [vmem:[#allocation94_spill] sm:$0xff] %v4101_v56  ;;  %v876_v29 = vadd.f32 %v3909_v51, %v812_v27  ;;  %v1213_v51 = vmul.f32 %v4101_v56, %v4101_v56 }
 0x336   : > { %v4119_v33 = vadd.f32 %v3943_v24, %v873_v7  ;;  %v875_v14 = vadd.f32 %v5577_v22, %v811_v44  ;;  %v4128_v43 = vadd.f32 %v5578_v20, %v878_v0  ;;  %v4147_v4 = vadd.f32 %v5585_v49, %v877_v31 }
 0x337   : > { %v4112_v59 = vadd.f32 %v3941_v58, %v876_v29  ;;  %v879_v53 = vadd.f32 %v5587_v62, %v815_v5  ;;  %v576_v16 = vadd.f32 %v5630_v37, %v3479_v18 }
 0x338   : > { %1250 = vrot.lane.b32.xlu0 %v1212_v2, %s3255_s25  ;;  %5575 = vst [vmem:[#allocation96_spill] sm:$0xff] %v4119_v33  ;;  %5579 = vst [vmem:[#allocation77_spill] sm:$0xff] %v4128_v43  ;;  %v1215_v24 = vmul.f32 %v4119_v33, %v4119_v33  ;;  %v4135_v38 = vadd.f32 %v5581_v30, %v875_v14  ;;  %v1220_v23 = vmul.f32 %v4128_v43, %v4128_v43 }
 0x339   : > { %1244 = vrot.lane.b32.xlu1 %v1209_v35, %s3255_s25  ;;  %5574 = vst [vmem:[#allocation95_spill] sm:$0xff] %v4112_v59  ;;  %v1218_v58 = vmul.f32 %v4112_v59, %v4112_v59  ;;  %5586 = vst [vmem:[#allocation81_spill] sm:$0xff] %v4147_v4  ;;  %v1219_v52 = vmul.f32 %v4147_v4, %v4147_v4  ;;  %v4155_v2 = vadd.f32 %v5588_v47, %v879_v53  ;;  %v5622_v4 = vld [vmem:[#allocation13_spill] sm:$0xff] }
 0x33a   : > { %5582 = vst [vmem:[#allocation78_spill] sm:$0xff] %v4135_v38  ;;  %v1217_v1 = vmul.f32 %v4135_v38, %v4135_v38  ;;  %v574_v40 = vadd.f32 %v5622_v4, %v3463_v11  ;;  %v571_v33 = vadd.f32 %v5625_v13, %v3455_v9  ;;  %v5631_v13 = vld [vmem:[#allocation16_spill] sm:$0xff] }
 0x33b   : > { %5589 = vst [vmem:[#allocation75_spill] sm:$0xff] %v4155_v2  ;;  %v1221_v19 = vmul.f32 %v4155_v2, %v4155_v2 }
 0x33c   : > { %1254 = vrot.lane.b32.xlu0 %v1214_v39, %s3255_s25 }
 0x33d   : > { %1248 = vrot.lane.b32.xlu1 %v1211_v34, %s3255_s25 }
 0x33e   : > { %v983_v60 = vpop.permute.xlu0 %982 }
 0x33f   : > { %v1030_v31 = vadd.f32 %v983_v60, %v3455_v9 }
 0x340   : > { %1258 = vrot.lane.b32.xlu0 %v1216_v54, %s3255_s25 }
 0x341   : > { %1252 = vrot.lane.b32.xlu1 %v1213_v51, %s3255_s25 }
 0x342   : > { %v987_v26 = vpop.permute.xlu0 %986 }
 0x344   : > { %1262 = vrot.lane.b32.xlu0 %v1218_v58, %s3255_s25 }
 0x345   : > { %1256 = vrot.lane.b32.xlu1 %v1215_v24, %s3255_s25 }
 0x346   : > { %v991_v21 = vpop.permute.xlu0 %990 }
 0x347   : > { %v985_v48 = vpop.permute.xlu1 %984 }
 0x348   : > { %1266 = vrot.lane.b32.xlu0 %v1220_v23, %s3255_s25 }
 0x349   : > { %1260 = vrot.lane.b32.xlu1 %v1217_v1, %s3255_s25  ;;  %v1032_v1 = vadd.f32 %v987_v26, %v3459_v10  ;;  %v1031_v26 = vadd.f32 %v985_v48, %v3455_v9 }
 0x34a   : > { %v995_v32 = vpop.permute.xlu0 %994 }
 0x34b   : > { %v989_v61 = vpop.permute.xlu1 %988 }
 0x34d   : > { %1264 = vrot.lane.b32.xlu1 %v1219_v52, %s3255_s25 }
 0x34e   : > { %v999_v35 = vpop.permute.xlu0 %998 }
 0x34f   : > { %v993_v3 = vpop.permute.xlu1 %992 }
 0x351   : > { %1268 = vrot.lane.b32.xlu1 %v1221_v19, %s3255_s25  ;;  %v1034_v19 = vadd.f32 %v991_v21, %v3463_v11 }
 0x352   : > { %v4161_v27 = vpop.permute.xlu0 %1002 }
 0x353   : > { %v4163_v39 = vpop.permute.xlu1 %996 }
 0x356   : > { %v4165_v46 = vpop.permute.xlu0 %1006 }
 0x357   : > { %v4167_v34 = vpop.permute.xlu1 %1000 }
 0x35a   : > { %v4169_v29 = vpop.permute.xlu0 %1010 }
 0x35b   : > { %v4171_v7 = vpop.permute.xlu1 %1004 }
 0x35e   : > { %v1047_v25 = vpop.permute.xlu0 %1046 }
 0x35f   : > { %v4173_v54 = vpop.permute.xlu1 %1008  ;;  %v1094_v55 = vadd.f32 %v1047_v25, %v1030_v31 }
 0x362   : > { %v1051_v44 = vpop.permute.xlu0 %1050 }
 0x363   : > { %v4175_v51 = vpop.permute.xlu1 %1012  ;;  %v1096_v53 = vadd.f32 %v1051_v44, %v1032_v1 }
 0x366   : > { %v1055_v63 = vpop.permute.xlu0 %1054 }
 0x367   : > { %v1049_v0 = vpop.permute.xlu1 %1048  ;;  %v1098_v25 = vadd.f32 %v1055_v63, %v1034_v19 }
 0x368   : > { %v1095_v44 = vadd.f32 %v1049_v0, %v1031_v26 }
 0x36a   : > { %v1059_v22 = vpop.permute.xlu0 %1058 }
 0x36b   : > { %v1053_v14 = vpop.permute.xlu1 %1052 }
 0x36e   : > { %v1063_v58 = vpop.permute.xlu0 %1062 }
 0x36f   : > { %v1057_v20 = vpop.permute.xlu1 %1056 }
 0x372   : > { %v1067_v15 = vpop.permute.xlu0 %1066 }
 0x373   : > { %v1061_v17 = vpop.permute.xlu1 %1060 }
 0x376   : > { %v4177_v24 = vpop.permute.xlu0 %1070 }
 0x377   : > { %v4179_v30 = vpop.permute.xlu1 %1064 }
 0x37a   : > { %v4181_v42 = vpop.permute.xlu0 %1074 }
 0x37b   : > { %v4184_v23 = vpop.permute.xlu1 %1068 }
 0x37e   : > { %v1111_v5 = vpop.permute.xlu0 %1110 }
 0x37f   : > { %v4187_v49 = vadd.f32 %v1111_v5, %v1094_v55  ;;  %v4189_v62 = vpop.permute.xlu1 %1072  ;;  %v1036_v5 = vadd.f32 %v995_v32, %v3479_v18  ;;  %v1038_v32 = vadd.f32 %v999_v35, %v3490_v28 }
 0x381   : > { %5590 = vst [vmem:[#allocation82_spill] sm:$0xff] %v4187_v49  ;;  %v1302_v52 = vmul.f32 %v4187_v49, %v4187_v49  ;;  %v5616_v49 = vld [vmem:[#allocation12_spill] sm:$0xff] }
 0x382   : > { %v1115_v47 = vpop.permute.xlu0 %1114 }
 0x383   : > { %v4194_v43 = vadd.f32 %v1115_v47, %v1096_v53  ;;  %v4196_v60 = vpop.permute.xlu1 %1076  ;;  %1334 = vrot.lane.b32.xlu0 %v1302_v52, %s3256_s26  ;;  %v1033_v53 = vadd.f32 %v989_v61, %v3459_v10  ;;  %v1100_v52 = vadd.f32 %v1059_v22, %v1036_v5  ;;  %v1035_v61 = vadd.f32 %v993_v3, %v3463_v11 }
 0x384   : > { %v1102_v22 = vadd.f32 %v1063_v58, %v1038_v32  ;;  %v1040_v5 = vadd.f32 %v4161_v27, %v3497_v36  ;;  %v1037_v3 = vadd.f32 %v4163_v39, %v3479_v18  ;;  %v1039_v39 = vadd.f32 %v4167_v34, %v3490_v28 }
 0x385   : > { %5591 = vst [vmem:[#allocation79_spill] sm:$0xff] %v4194_v43  ;;  %v1304_v31 = vmul.f32 %v4194_v43, %v4194_v43  ;;  %v1097_v63 = vadd.f32 %v1053_v14, %v1033_v53 }
 0x386   : > { %v1119_v55 = vpop.permute.xlu0 %1118 }
 0x387   : > { %v4203_v1 = vadd.f32 %v1119_v55, %v1098_v25  ;;  %v1113_v21 = vpop.permute.xlu1 %1112  ;;  %1338 = vrot.lane.b32.xlu0 %v1304_v31, %s3256_s26 }
 0x388   : > { %v4207_v47 = vadd.f32 %v1113_v21, %v1095_v44  ;;  %v1099_v44 = vadd.f32 %v1057_v20, %v1035_v61  ;;  %v1104_v20 = vadd.f32 %v1067_v15, %v1040_v5  ;;  %v1103_v61 = vadd.f32 %v4179_v30, %v1039_v39 }
 0x389   : > { %5592 = vst [vmem:[#allocation76_spill] sm:$0xff] %v4203_v1  ;;  %v1306_v48 = vmul.f32 %v4203_v1, %v4203_v1 }
 0x38a   : > { %5593 = vst [vmem:[#allocation83_spill] sm:$0xff] %v4207_v47  ;;  %v1303_v0 = vmul.f32 %v4207_v47, %v4207_v47  ;;  %v1123_v19 = vpop.permute.xlu0 %1122  ;;  %v5619_v47 = vld [vmem:[#allocation41_spill] sm:$0xff] }
 0x38b   : > { %v4214_v26 = vadd.f32 %v1123_v19, %v1100_v52  ;;  %v1117_v25 = vpop.permute.xlu1 %1116  ;;  %1342 = vrot.lane.b32.xlu0 %v1306_v48, %s3256_s26  ;;  %v1101_v48 = vadd.f32 %v1061_v17, %v1037_v3 }
 0x38c   : > { %v4218_v31 = vadd.f32 %v1117_v25, %v1097_v63  ;;  %1336 = vrot.lane.b32.xlu1 %v1303_v0, %s3256_s26  ;;  %v1042_v0 = vadd.f32 %v4165_v46, %v3511_v45 }
 0x38d   : > { %5594 = vst [vmem:[#allocation80_spill] sm:$0xff] %v4214_v26  ;;  %v1308_v14 = vmul.f32 %v4214_v26, %v4214_v26 }
 0x38e   : > { %5595 = vst [vmem:[#allocation84_spill] sm:$0xff] %v4218_v31  ;;  %v1305_v55 = vmul.f32 %v4218_v31, %v4218_v31  ;;  %v1127_v35 = vpop.permute.xlu0 %1126  ;;  %v1106_v17 = vadd.f32 %v4177_v24, %v1042_v0  ;;  %v1041_v24 = vadd.f32 %v4171_v7, %v3497_v36  ;;  %v1043_v7 = vadd.f32 %v4173_v54, %v3511_v45 }
 0x38f   : > { %v4227_v21 = vadd.f32 %v1127_v35, %v1102_v22  ;;  %v1121_v53 = vpop.permute.xlu1 %1120  ;;  %1346 = vrot.lane.b32.xlu0 %v1308_v14, %s3256_s26  ;;  %v1044_v14 = vadd.f32 %v4169_v29, %v3517_v50  ;;  %v1045_v0 = vadd.f32 %v4175_v51, %v3517_v50 }
 0x390   : > { %v4232_v58 = vadd.f32 %v1121_v53, %v1099_v44  ;;  %1340 = vrot.lane.b32.xlu1 %v1305_v55, %s3256_s26  ;;  %v1105_v5 = vadd.f32 %v4184_v23, %v1041_v24  ;;  %v1107_v23 = vadd.f32 %v4189_v62, %v1043_v7 }
 0x391   : > { %5596 = vst [vmem:[#allocation97_spill] sm:$0xff] %v4227_v21  ;;  %v1310_v52 = vmul.f32 %v4227_v21, %v4227_v21  ;;  %v1108_v30 = vadd.f32 %v4181_v42, %v1044_v14  ;;  %v1109_v62 = vadd.f32 %v4196_v60, %v1045_v0  ;;  %v5617_v21 = vld [vmem:[#allocation25_spill] sm:$0xff] }
 0x392   : > { %5597 = vst [vmem:[#allocation98_spill] sm:$0xff] %v4232_v58  ;;  %v1307_v27 = vmul.f32 %v4232_v58, %v4232_v58  ;;  %v1131_v63 = vpop.permute.xlu0 %1130 }
 0x393   : > { %v4241_v19 = vadd.f32 %v1131_v63, %v1104_v20  ;;  %v1125_v32 = vpop.permute.xlu1 %1124  ;;  %1350 = vrot.lane.b32.xlu0 %v1310_v52, %s3256_s26  ;;  %v4285_v63 = vld [vmem:[#allocation4] sm:$0xff] }
 0x394   : > { %v4246_v15 = vadd.f32 %v1125_v32, %v1101_v48  ;;  %1344 = vrot.lane.b32.xlu1 %v1307_v27, %s3256_s26  ;;  %v4289_v54 = vmul.f32 %v4285_v63, %v3455_v9  ;;  %v4314_v60 = vmul.f32 %v4285_v63, %v3463_v11  ;;  %v4327_v14 = vmul.f32 %v4285_v63, %v3479_v18 }
 0x395   : > { %5598 = vst [vmem:[#allocation99_spill] sm:$0xff] %v4241_v19  ;;  %v1312_v25 = vmul.f32 %v4241_v19, %v4241_v19  ;;  %v4339_v24 = vmul.f32 %v4285_v63, %v3490_v28  ;;  %v570_v19 = vadd.f32 %v5616_v49, %v3455_v9 }
 0x396   : > { %5599 = vst [vmem:[#allocation100_spill] sm:$0xff] %v4246_v15  ;;  %v1309_v46 = vmul.f32 %v4246_v15, %v4246_v15  ;;  %v1135_v22 = vpop.permute.xlu0 %1134  ;;  %5606 = vst [vmem:[#allocation107_spill] sm:$0xff] %v4314_v60  ;;  %v3257_v15 = vmov 3  }
 0x397   : > { %v4257_v44 = vadd.f32 %v1135_v22, %v1106_v17  ;;  %v1129_v34 = vpop.permute.xlu1 %1128  ;;  %1354 = vrot.lane.b32.xlu0 %v1312_v25, %s3256_s26  ;;  %v4303_v25 = vmul.f32 %v4285_v63, %v3459_v10  ;;  %5607 = vst [vmem:[#allocation108_spill] sm:$0xff] %v4327_v14  ;;  %5608 = vst [vmem:[#allocation109_spill] sm:$0xff] %v4339_v24  ;;  %3038 = vset.pattern.permute.xlu1 %v3257_v15 }
 0x398   : > { %v4262_v55 = vadd.f32 %v1129_v34, %v1103_v61  ;;  %1348 = vrot.lane.b32.xlu1 %v1309_v46, %s3256_s26  ;;  %v4317_v46 = vld [vmem:[#allocation4 + $0x8] sm:$0xff]  ;;  %3037 = vset.pattern.permute.xlu0 %v3257_v15  ;;  %v634_v26 = vadd.f32 %v5617_v21, %v570_v19  ;;  %v572_v15 = vadd.f32 %v5618_v41, %v3459_v10  ;;  %v5623_v21 = vld [vmem:[#allocation43_spill] sm:$0xff]  ;;  %v5626_v41 = vld [vmem:[#allocation29_spill] sm:$0xff] }
 0x399   : > { %5600 = vst [vmem:[#allocation101_spill] sm:$0xff] %v4257_v44  ;;  %v1314_v35 = vmul.f32 %v4257_v44, %v4257_v44  ;;  %v4321_v22 = vmul.f32 %v4317_v46, %v3455_v9  ;;  %v4333_v34 = vmul.f32 %v4317_v46, %v3459_v10  ;;  %v4381_v7 = vmul.f32 %v4317_v46, %v3497_v36 }
 0x39a   : > { %5601 = vst [vmem:[#allocation102_spill] sm:$0xff] %v4262_v55  ;;  %v1311_v29 = vmul.f32 %v4262_v55, %v4262_v55  ;;  %v1139_v53 = vpop.permute.xlu0 %1138  ;;  %v4433_v12 = vadd.f32 %v5619_v47, %v634_v26  ;;  %v636_v2 = vadd.f32 %v5621_v8, %v572_v15  ;;  %v638_v56 = vadd.f32 %v5626_v41, %v574_v40  ;;  %v5627_v26 = vld [vmem:[#allocation30_spill] sm:$0xff]  ;;  %v5628_v15 = vld [vmem:[#allocation45_spill] sm:$0xff] }
 0x39b   : > { %v4271_v3 = vadd.f32 %v1139_v53, %v1108_v30  ;;  %v1133_v20 = vpop.permute.xlu1 %1132  ;;  %1358 = vrot.lane.b32.xlu0 %v1314_v35, %s3256_s26  ;;  %v4345_v30 = vmul.f32 %v4317_v46, %v3463_v11  ;;  %v4351_v35 = vmul.f32 %v4285_v63, %v3497_v36  ;;  %v4369_v53 = vmul.f32 %v4317_v46, %v3490_v28  ;;  %v5632_v40 = vld [vmem:[#allocation46_spill] sm:$0xff] }
 0x39c   : > { %v4276_v52 = vadd.f32 %v1133_v20, %v1105_v5  ;;  %1352 = vrot.lane.b32.xlu1 %v1311_v29, %s3256_s26  ;;  %v4357_v5 = vmul.f32 %v4317_v46, %v3479_v18  ;;  %v4363_v29 = vmul.f32 %v4285_v63, %v3511_v45  ;;  %v4375_v20 = vmul.f32 %v4285_v63, %v3517_v50 }
 0x39d   : > { %5602 = vst [vmem:[#allocation103_spill] sm:$0xff] %v4271_v3  ;;  %v1316_v42 = vmul.f32 %v4271_v3, %v4271_v3  ;;  %5609 = vst [vmem:[#allocation110_spill] sm:$0xff] %v4351_v35  ;;  %v1174_v49 = vmul.f32 %v4433_v12, %v4433_v12  ;;  %v4441_v19 = vadd.f32 %v5623_v21, %v636_v2 }
 0x39e   : > { %5603 = vst [vmem:[#allocation104_spill] sm:$0xff] %v4276_v52  ;;  %v1313_v48 = vmul.f32 %v4276_v52, %v4276_v52  ;;  %5610 = vst [vmem:[#allocation111_spill] sm:$0xff] %v4363_v29  ;;  %v635_v8 = vadd.f32 %v5627_v26, %v571_v33  ;;  %v4450_v6 = vadd.f32 %v5628_v15, %v638_v56  ;;  %v5635_v15 = vld [vmem:[#allocation17_spill] sm:$0xff] }
 0x39f   : > { %v1137_v27 = vpop.permute.xlu1 %1136  ;;  %1362 = vrot.lane.b32.xlu0 %v1316_v42, %s3256_s26  ;;  %5611 = vst [vmem:[#allocation112_spill] sm:$0xff] %v4369_v53  ;;  %5612 = vst [vmem:[#allocation113_spill] sm:$0xff] %v4375_v20  ;;  %v4389_v42 = vmul.f32 %v4317_v46, %v3511_v45  ;;  %v1176_v2 = vmul.f32 %v4441_v19, %v4441_v19  ;;  %v1190_v21 = vadd.f32 1e-06, %v1174_v49 }
 0x3a0   : > { %v4293_v32 = vadd.f32 %v1137_v27, %v1107_v23  ;;  %1356 = vrot.lane.b32.xlu1 %v1313_v48, %s3256_s26  ;;  %5613 = vst [vmem:[#allocation114_spill] sm:$0xff] %v4381_v7  ;;  %v4395_v23 = vmul.f32 %v4317_v46, %v3517_v50  ;;  %v1239_v48 = vpop.permute.xlu0 %1238  ;;  %5620 = vst [vmem:[#allocation12_spill] sm:$0xff] %v4433_v12  ;;  %v573_v12 = vadd.f32 %v5631_v13, %v3459_v10  ;;  %v5637_v13 = vld [vmem:[#allocation18_spill] sm:$0xff] }
 0x3a1   : > { %5614 = vst [vmem:[#allocation115_spill] sm:$0xff] %v4389_v42  ;;  %5624 = vst [vmem:[#allocation25_spill] sm:$0xff] %v4441_v19  ;;  %v4461_v41 = vadd.f32 %v5632_v40, %v635_v8  ;;  %v1286_v26 = vadd.f32 %v1239_v48, %v1190_v21  ;;  %v1178_v19 = vmul.f32 %v4450_v6, %v4450_v6  ;;  %v5638_v8 = vld [vmem:[#allocation49_spill] sm:$0xff] }
 0x3a2   : > { %5604 = vst [vmem:[#allocation105_spill] sm:$0xff] %v4293_v32  ;;  %v1315_v39 = vmul.f32 %v4293_v32, %v4293_v32  ;;  %5615 = vst [vmem:[#allocation116_spill] sm:$0xff] %v4395_v23  ;;  %v5640_v48 = vld [vmem:[#allocation33_spill] sm:$0xff] }
 0x3a3   : > { %v1141_v17 = vpop.permute.xlu1 %1140  ;;  %1430 = vrot.lane.b32.xlu0 %v4289_v54, %s3253_s20  ;;  %5629 = vst [vmem:[#allocation11_spill] sm:$0xff] %v4450_v6  ;;  %5633 = vst [vmem:[#allocation41_spill] sm:$0xff] %v4461_v41 }
 0x3a4   : > { %v4305_v61 = vadd.f32 %v1141_v17, %v1109_v62  ;;  %1360 = vrot.lane.b32.xlu1 %v1315_v39, %s3256_s26  ;;  %v1243_v27 = vpop.permute.xlu0 %1242 }
 0x3a6   : > { %5605 = vst [vmem:[#allocation106_spill] sm:$0xff] %v4305_v61  ;;  %v1317_v51 = vmul.f32 %v4305_v61, %v4305_v61 }
 0x3a7   : > { %1434 = vrot.lane.b32.xlu0 %v4303_v25, %s3253_s20  ;;  %v4399_v0 = vpop.permute.xlu1 %1240 }
 0x3a8   : > { %1364 = vrot.lane.b32.xlu1 %v1317_v51, %s3256_s26  ;;  %v4401_v62 = vpop.permute.xlu0 %1246 }
 0x3ab   : > { %1438 = vrot.lane.b32.xlu0 %v4314_v60, %s3253_s20  ;;  %v4403_v39 = vpop.permute.xlu1 %1244  ;;  %v5659_v60 = vld [vmem:[#allocation38_spill] sm:$0xff] }
 0x3ac   : > { %1432 = vrot.lane.b32.xlu1 %v4321_v22, %s3253_s20  ;;  %v4405_v17 = vpop.permute.xlu0 %1250 }
 0x3af   : > { %1442 = vrot.lane.b32.xlu0 %v4327_v14, %s3253_s20  ;;  %v4407_v51 = vpop.permute.xlu1 %1248 }
 0x3b0   : > { %1436 = vrot.lane.b32.xlu1 %v4333_v34, %s3253_s20  ;;  %v4409_v61 = vpop.permute.xlu0 %1254 }
 0x3b3   : > { %1446 = vrot.lane.b32.xlu0 %v4339_v24, %s3253_s20  ;;  %v4411_v32 = vpop.permute.xlu1 %1252  ;;  %v5641_v24 = vld [vmem:[#allocation50_spill] sm:$0xff] }
 0x3b4   : > { %1440 = vrot.lane.b32.xlu1 %v4345_v30, %s3253_s20  ;;  %v4413_v52 = vpop.permute.xlu0 %1258 }
 0x3b7   : > { %1450 = vrot.lane.b32.xlu0 %v4351_v35, %s3253_s20  ;;  %v4415_v55 = vpop.permute.xlu1 %1256  ;;  %v5636_v35 = vld [vmem:[#allocation32_spill] sm:$0xff] }
 0x3b8   : > { %1444 = vrot.lane.b32.xlu1 %v4357_v5, %s3253_s20  ;;  %v4417_v58 = vpop.permute.xlu0 %1262  ;;  %v637_v37 = vadd.f32 %v5636_v35, %v573_v12  ;;  %v5643_v35 = vld [vmem:[#allocation34_spill] sm:$0xff] }
 0x3ba   : > { %v4482_v12 = vadd.f32 %v5641_v24, %v637_v37 }
 0x3bb   : > { %1454 = vrot.lane.b32.xlu0 %v4363_v29, %s3253_s20  ;;  %v4419_v31 = vpop.permute.xlu1 %1260  ;;  %v578_v29 = vadd.f32 %v5635_v15, %v3490_v28  ;;  %v1175_v15 = vmul.f32 %v4461_v41, %v4461_v41 }
 0x3bc   : > { %1448 = vrot.lane.b32.xlu1 %v4369_v53, %s3253_s20  ;;  %v4421_v3 = vpop.permute.xlu0 %1266  ;;  %5642 = vst [vmem:[#allocation13_spill] sm:$0xff] %v4482_v12 }
 0x3bd   : > { %v642_v21 = vadd.f32 %v5640_v48, %v578_v29 }
 0x3bf   : > { %1458 = vrot.lane.b32.xlu0 %v4375_v20, %s3253_s20  ;;  %v4423_v43 = vpop.permute.xlu1 %1264  ;;  %v5634_v20 = vld [vmem:[#allocation31_spill] sm:$0xff] }
 0x3c0   : > { %1452 = vrot.lane.b32.xlu1 %v4381_v7, %s3253_s20  ;;  %v640_v33 = vadd.f32 %v5634_v20, %v576_v16  ;;  %v1192_v16 = vadd.f32 1e-06, %v1176_v2 }
 0x3c2   : > { %v4476_v40 = vadd.f32 %v5638_v8, %v640_v33  ;;  %v5645_v33 = vld [vmem:[#allocation53_spill] sm:$0xff] }
 0x3c3   : > { %v4428_v1 = vpop.permute.xlu1 %1268  ;;  %v4490_v8 = vadd.f32 %v5645_v33, %v642_v21  ;;  %v1177_v21 = vmul.f32 %v4482_v12, %v4482_v12  ;;  %v5652_v33 = vld [vmem:[#allocation22_spill] sm:$0xff] }
 0x3c4   : > { %1456 = vrot.lane.b32.xlu1 %v4389_v42, %s3253_s20  ;;  %5639 = vst [vmem:[#allocation27_spill] sm:$0xff] %v4476_v40  ;;  %v1288_v42 = vadd.f32 %v1243_v27, %v1192_v16  ;;  %v1180_v29 = vmul.f32 %v4476_v40, %v4476_v40  ;;  %v5649_v27 = vld [vmem:[#allocation20_spill] sm:$0xff]  ;;  %v5650_v16 = vld [vmem:[#allocation35_spill] sm:$0xff]  ;;  %v579_v40 = vadd.f32 %v5652_v33, %v3490_v28 }
 0x3c5   : > { %5646 = vst [vmem:[#allocation43_spill] sm:$0xff] %v4490_v8  ;;  %v577_v37 = vadd.f32 %v5649_v27, %v3479_v18 }
 0x3c6   : > { %v1196_v33 = vadd.f32 1e-06, %v1180_v29  ;;  %v643_v53 = vadd.f32 %v5659_v60, %v579_v40  ;;  %v5662_v40 = vld [vmem:[#allocation62_spill] sm:$0xff] }
 0x3c8   : > { %1460 = vrot.lane.b32.xlu1 %v4395_v23, %s3253_s20  ;;  %v575_v23 = vadd.f32 %v5637_v13, %v3463_v11  ;;  %v5644_v13 = vld [vmem:[#allocation19_spill] sm:$0xff] }
 0x3c9   : > { %v580_v7 = vadd.f32 %v5644_v13, %v3497_v36 }
 0x3ca   : > { %v639_v6 = vadd.f32 %v5643_v35, %v575_v23  ;;  %v1191_v35 = vadd.f32 1e-06, %v1175_v15 }
 0x3cb   : > { %v644_v48 = vadd.f32 %v5650_v16, %v580_v7  ;;  %v5654_v7 = vld [vmem:[#allocation57_spill] sm:$0xff] }
 0x3cc   : > { %v1287_v15 = vadd.f32 %v4399_v0, %v1191_v35  ;;  %v5658_v0 = vld [vmem:[#allocation37_spill] sm:$0xff] }
 0x3cd   : > { %v4515_v27 = vadd.f32 %v5654_v7, %v644_v48  ;;  %v5657_v48 = vld [vmem:[#allocation24_spill] sm:$0xff] }
 0x3ce   : > { %v581_v7 = vadd.f32 %v5657_v48, %v3497_v36 }
 0x3f5   : > { %v1335_v44 = vpop.permute.xlu0 %1334 }
 0x3f6   : > { %v1382_v20 = vadd.f32 %v1335_v44, %v1286_v26  ;;  %v1194_v44 = vadd.f32 1e-06, %v1178_v19  ;;  %v5647_v26 = vld [vmem:[#allocation54_spill] sm:$0xff]  ;;  %v5651_v19 = vld [vmem:[#allocation21_spill] sm:$0xff] }
 0x3f7   : > { %v4497_v24 = vadd.f32 %v5647_v26, %v639_v6  ;;  %v582_v13 = vadd.f32 %v5651_v19, %v3511_v45 }
 0x3f8   : > { %3047 = vrsqrt.f32 %v1382_v20  ;;  %v1290_v6 = vadd.f32 %v4401_v62, %v1194_v44  ;;  %v1182_v20 = vmul.f32 %v4490_v8, %v4490_v8  ;;  %v5655_v44 = vld [vmem:[#allocation23_spill] sm:$0xff]  ;;  %v1193_v8 = vadd.f32 1e-06, %v1177_v21 }
 0x3f9   : > { %v1339_v59 = vpop.permute.xlu0 %1338  ;;  %5648 = vst [vmem:[#allocation14_spill] sm:$0xff] %v4497_v24  ;;  %v1179_v19 = vmul.f32 %v4497_v24, %v4497_v24  ;;  %v584_v12 = vadd.f32 %v5655_v44, %v3517_v50  ;;  %v646_v35 = vadd.f32 %v5658_v0, %v582_v13  ;;  %v1292_v24 = vadd.f32 %v4405_v17, %v1196_v33  ;;  %v5665_v0 = vld [vmem:[#allocation65_spill] sm:$0xff] }
 0x3fa   : > { %v1384_v23 = vadd.f32 %v1339_v59, %v1288_v42  ;;  %v5653_v59 = vld [vmem:[#allocation36_spill] sm:$0xff]  ;;  %v1198_v21 = vadd.f32 1e-06, %v1182_v20 }
 0x3fb   : > { %v641_v42 = vadd.f32 %v5653_v59, %v577_v37  ;;  %v5656_v37 = vld [vmem:[#allocation58_spill] sm:$0xff]  ;;  %v1195_v13 = vadd.f32 1e-06, %v1179_v19 }
 0x3fc   : > { %3049 = vrsqrt.f32 %v1384_v23  ;;  %v1294_v19 = vadd.f32 %v4409_v61, %v1198_v21  ;;  %v5667_v21 = vld [vmem:[#allocation28_spill] sm:$0xff] }
 0x3fd   : > { %v1343_v57 = vpop.permute.xlu0 %1342  ;;  %v4525_v59 = vadd.f32 %v5656_v37, %v641_v42  ;;  %v1289_v42 = vadd.f32 %v4403_v39, %v1193_v8  ;;  %v5663_v8 = vld [vmem:[#allocation26_spill] sm:$0xff]  ;;  %v5664_v37 = vld [vmem:[#allocation40_spill] sm:$0xff] }
 0x3fe   : > { %v1337_v38 = vpop.permute.xlu1 %1336  ;;  %v1386_v62 = vadd.f32 %v1343_v57, %v1290_v6  ;;  %v5660_v57 = vld [vmem:[#allocation39_spill] sm:$0xff]  ;;  %v1184_v6 = vmul.f32 %v4515_v27, %v4515_v27  ;;  %v583_v20 = vadd.f32 %v5663_v8, %v3511_v45  ;;  %v645_v48 = vadd.f32 %v5664_v37, %v581_v7 }
 0x3ff   : > { %v1383_v41 = vadd.f32 %v1337_v38, %v1287_v15  ;;  %v648_v23 = vadd.f32 %v5660_v57, %v584_v12  ;;  %v5661_v15 = vld [vmem:[#allocation61_spill] sm:$0xff]  ;;  %v1181_v17 = vmul.f32 %v4525_v59, %v4525_v59  ;;  %v4547_v12 = vadd.f32 %v5662_v40, %v643_v53  ;;  %v5666_v57 = vld [vmem:[#allocation67_spill] sm:$0xff]  ;;  %v5668_v40 = vld [vmem:[#allocation42_spill] sm:$0xff] }
 0x400   : > { %v4541_v44 = vadd.f32 %v5661_v15, %v646_v35  ;;  %3051 = vrsqrt.f32 %v1386_v62  ;;  %v1200_v35 = vadd.f32 1e-06, %v1184_v6  ;;  %v585_v15 = vadd.f32 %v5667_v21, %v3517_v50 }
 0x401   : > { %v4446_v47 = vpop.permute.xlu0 %1346  ;;  %3053 = vrsqrt.f32 %v1383_v41  ;;  %v1183_v7 = vmul.f32 %v4547_v12, %v4547_v12 }
 0x402   : > { %v4452_v4 = vpop.permute.xlu1 %1340  ;;  %v1388_v60 = vadd.f32 %v4446_v47, %v1292_v24  ;;  %v3048_v39 = vpop.eup %3047  ;;  %v4555_v47 = vadd.f32 %v5665_v0, %v648_v23  ;;  %v1291_v24 = vadd.f32 %v4407_v51, %v1195_v13  ;;  %v1197_v23 = vadd.f32 1e-06, %v1181_v17 }
 0x403   : > { %v1385_v33 = vadd.f32 %v4452_v4, %v1289_v42  ;;  %v1186_v4 = vmul.f32 %v4541_v44, %v4541_v44  ;;  %v4565_v42 = vadd.f32 %v5666_v57, %v645_v48  ;;  %v1296_v13 = vadd.f32 %v4413_v52, %v1200_v35  ;;  %v5669_v52 = vld [vmem:[#allocation70_spill] sm:$0xff]  ;;  %v5670_v57 = vld [vmem:[#allocation44_spill] sm:$0xff] }
 0x404   : > { %3055 = vrsqrt.f32 %v1388_v60  ;;  %v1293_v17 = vadd.f32 %v4411_v32, %v1197_v23 }
 0x405   : > { %v4464_v56 = vpop.permute.xlu0 %1350  ;;  %3057 = vrsqrt.f32 %v1385_v33  ;;  %v1185_v8 = vmul.f32 %v4565_v42, %v4565_v42  ;;  %v1202_v37 = vadd.f32 1e-06, %v1186_v4  ;;  %v649_v4 = vadd.f32 %v5670_v57, %v585_v15 }
 0x406   : > { %v4471_v49 = vpop.permute.xlu1 %1344  ;;  %v1390_v61 = vadd.f32 %v4464_v56, %v1294_v19  ;;  %v3050_v6 = vpop.eup %3049  ;;  %v647_v56 = vadd.f32 %v5668_v40, %v583_v20  ;;  %v1199_v20 = vadd.f32 1e-06, %v1183_v7 }
 0x407   : > { %v1387_v51 = vadd.f32 %v4471_v49, %v1291_v24  ;;  %v1298_v0 = vadd.f32 %v4417_v58, %v1202_v37  ;;  %v1201_v7 = vadd.f32 1e-06, %v1185_v8  ;;  %v5671_v58 = vld [vmem:[#allocation73_spill] sm:$0xff] }
 0x408   : > { %3059 = vrsqrt.f32 %v1390_v61  ;;  %v4588_v19 = vadd.f32 %v5669_v52, %v647_v56  ;;  %v1295_v61 = vadd.f32 %v4415_v55, %v1199_v20 }
 0x409   : > { %v4485_v14 = vpop.permute.xlu0 %1354  ;;  %3061 = vrsqrt.f32 %v1387_v51  ;;  %v1297_v56 = vadd.f32 %v4419_v31, %v1201_v7 }
 0x40a   : > { %v4492_v2 = vpop.permute.xlu1 %1348  ;;  %v1392_v48 = vadd.f32 %v4485_v14, %v1296_v13  ;;  %v3052_v32 = vpop.eup %3051  ;;  %v1187_v21 = vmul.f32 %v4588_v19, %v4588_v19  ;;  %v4604_v13 = vadd.f32 %v5671_v58, %v649_v4 }
 0x40b   : > { %v3054_v35 = vpop.eup %3053 }
 0x40c   : > { %3063 = vrsqrt.f32 %v1392_v48  ;;  %v1189_v37 = vmul.f32 %v4604_v13, %v4604_v13  ;;  %v1203_v48 = vadd.f32 1e-06, %v1187_v21 }
 0x40d   : > { %v4509_v26 = vpop.permute.xlu0 %1358 }
 0x40e   : > { %v4518_v16 = vpop.permute.xlu1 %1352  ;;  %v3056_v55 = vpop.eup %3055 }
 0x40f   : > { %v1391_v15 = vadd.f32 %v4518_v16, %v1295_v61  ;;  %v3058_v40 = vpop.eup %3057 }
 0x411   : > { %v4532_v29 = vpop.permute.xlu0 %1362 }
 0x412   : > { %v4538_v38 = vpop.permute.xlu1 %1356  ;;  %v3060_v52 = vpop.eup %3059 }
 0x413   : > { %v3062_v20 = vpop.eup %3061 }
 0x415   : > { %v1431_v62 = vpop.permute.xlu0 %1430 }
 0x416   : > { %v4558_v53 = vmul.f32 %v3048_v39, %v1431_v62  ;;  %v4560_v41 = vpop.permute.xlu1 %1360  ;;  %v1188_v39 = vmul.f32 %v4555_v47, %v4555_v47  ;;  %v1389_v62 = vadd.f32 %v4492_v2, %v1293_v17  ;;  %v1394_v2 = vadd.f32 %v4509_v26, %v1298_v0 }
 0x418   : > { %1526 = vrot.lane.b32.xlu0 %v4558_v53, %s3258_s21  ;;  %v1204_v14 = vadd.f32 1e-06, %v1188_v39  ;;  %3065 = vrsqrt.f32 %v1389_v62 }
 0x419   : > { %v1435_v60 = vpop.permute.xlu0 %1434  ;;  %3067 = vrsqrt.f32 %v1394_v2 }
 0x41a   : > { %v4580_v33 = vmul.f32 %v3050_v6, %v1435_v60  ;;  %v4582_v49 = vpop.permute.xlu1 %1364  ;;  %v1300_v60 = vadd.f32 %v4421_v3, %v1204_v14  ;;  %3069 = vrsqrt.f32 %v1391_v15  ;;  %v1393_v3 = vadd.f32 %v4538_v38, %v1297_v56 }
 0x41c   : > { %1530 = vrot.lane.b32.xlu0 %v4580_v33, %s3258_s21  ;;  %v1396_v8 = vadd.f32 %v4532_v29, %v1300_v60  ;;  %v1299_v29 = vadd.f32 %v4423_v43, %v1203_v48 }
 0x41d   : > { %v1439_v24 = vpop.permute.xlu0 %1438 }
 0x41e   : > { %v4596_v23 = vmul.f32 %v3052_v32, %v1439_v24  ;;  %v1433_v6 = vpop.permute.xlu1 %1432  ;;  %3071 = vrsqrt.f32 %v1396_v8  ;;  %v1205_v24 = vadd.f32 1e-06, %v1189_v37  ;;  %v1395_v38 = vadd.f32 %v4560_v41, %v1299_v29  ;;  %v5681_v29 = vld [vmem:[#allocation111_spill] sm:$0xff] }
 0x41f   : > { %v4599_v51 = vmul.f32 %v3054_v35, %v1433_v6  ;;  %3073 = vrsqrt.f32 %v1393_v3  ;;  %v3064_v35 = vpop.eup %3063 }
 0x420   : > { %1534 = vrot.lane.b32.xlu0 %v4596_v23, %s3258_s21  ;;  %v1301_v43 = vadd.f32 %v4428_v1, %v1205_v24  ;;  %3075 = vrsqrt.f32 %v1395_v38  ;;  %v5682_v24 = vld [vmem:[#allocation11_spill] sm:$0xff] }
 0x421   : > { %1528 = vrot.lane.b32.xlu1 %v4599_v51, %s3258_s21  ;;  %v1443_v26 = vpop.permute.xlu0 %1442  ;;  %v1498_v38 = vmul.f32 %v4596_v23, %v5682_v24 }
 0x422   : > { %v4613_v39 = vmul.f32 %v3056_v55, %v1443_v26  ;;  %v1437_v17 = vpop.permute.xlu1 %1436  ;;  %v3066_v4 = vpop.eup %3065  ;;  %v1397_v7 = vadd.f32 %v4582_v49, %v1301_v43 }
 0x423   : > { %v4616_v16 = vmul.f32 %v3058_v40, %v1437_v17  ;;  %v3068_v41 = vpop.eup %3067 }
 0x424   : > { %1538 = vrot.lane.b32.xlu0 %v4613_v39, %s3258_s21  ;;  %v3070_v21 = vpop.eup %3069  ;;  %3077 = vrsqrt.f32 %v1397_v7 }
 0x425   : > { %1532 = vrot.lane.b32.xlu1 %v4616_v16, %s3258_s21  ;;  %v1447_v31 = vpop.permute.xlu0 %1446 }
 0x426   : > { %v4626_v62 = vmul.f32 %v3060_v52, %v1447_v31  ;;  %v1441_v32 = vpop.permute.xlu1 %1440 }
 0x427   : > { %v4628_v0 = vmul.f32 %v3062_v20, %v1441_v32  ;;  %v3262_v20 = vmov 17  }
 0x428   : > { %1542 = vrot.lane.b32.xlu0 %v4626_v62, %s3258_s21  ;;  %v3072_v55 = vpop.eup %3071 }
 0x429   : > { %1536 = vrot.lane.b32.xlu1 %v4628_v0, %s3258_s21  ;;  %v1451_v57 = vpop.permute.xlu0 %1450  ;;  %v3074_v60 = vpop.eup %3073 }
 0x42a   : > { %v4636_v61 = vmul.f32 %v3064_v35, %v1451_v57  ;;  %v1445_v14 = vpop.permute.xlu1 %1444  ;;  %v3076_v17 = vpop.eup %3075  ;;  %v5683_v35 = vld [vmem:[#allocation113_spill] sm:$0xff] }
 0x42b   : > { %v4638_v6 = vmul.f32 %v3066_v4, %v1445_v14  ;;  %v5684_v4 = vld [vmem:[#allocation27_spill] sm:$0xff] }
 0x42c   : > { %1546 = vrot.lane.b32.xlu0 %v4636_v61, %s3258_s21  ;;  %v1500_v43 = vmul.f32 %v4613_v39, %v5684_v4 }
 0x42d   : > { %1540 = vrot.lane.b32.xlu1 %v4638_v6, %s3258_s21  ;;  %v1455_v2 = vpop.permute.xlu0 %1454 }
 0x42e   : > { %v4645_v58 = vmul.f32 %v3068_v41, %v1455_v2  ;;  %v1449_v1 = vpop.permute.xlu1 %1448  ;;  %v3078_v48 = vpop.eup %3077  ;;  %v5686_v2 = vld [vmem:[#allocation43_spill] sm:$0xff] }
 0x42f   : > { %v4647_v15 = vmul.f32 %v3070_v21, %v1449_v1  ;;  %v5687_v1 = vld [vmem:[#allocation25_spill] sm:$0xff] }
 0x430   : > { %1550 = vrot.lane.b32.xlu0 %v4645_v58, %s3258_s21 }
 0x431   : > { %1544 = vrot.lane.b32.xlu1 %v4647_v15, %s3258_s21  ;;  %v1459_v49 = vpop.permute.xlu0 %1458 }
 0x432   : > { %v4653_v26 = vmul.f32 %v3072_v55, %v1459_v49  ;;  %v1453_v40 = vpop.permute.xlu1 %1452  ;;  %v1496_v55 = vmul.f32 %v4580_v33, %v5687_v1 }
 0x433   : > { %v4655_v56 = vmul.f32 %v3074_v60, %v1453_v40  ;;  %v5688_v60 = vld [vmem:[#allocation13_spill] sm:$0xff] }
 0x434   : > { %1554 = vrot.lane.b32.xlu0 %v4653_v26, %s3258_s21  ;;  %v1497_v40 = vmul.f32 %v4616_v16, %v5688_v60 }
 0x435   : > { %1548 = vrot.lane.b32.xlu1 %v4655_v56, %s3258_s21 }
 0x436   : > { %v1457_v8 = vpop.permute.xlu1 %1456 }
 0x437   : > { %v4661_v37 = vmul.f32 %v3076_v17, %v1457_v8 }
 0x438   : > { %1590 = vrot.lane.b32.xlu0 %v4558_v53, %s3259_s27 }
 0x439   : > { %1552 = vrot.lane.b32.xlu1 %v4661_v37, %s3258_s21 }
 0x43a   : > { %v1461_v3 = vpop.permute.xlu1 %1460 }
 0x43b   : > { %v4666_v52 = vmul.f32 %v3078_v48, %v1461_v3 }
 0x43c   : > { %1594 = vrot.lane.b32.xlu0 %v4580_v33, %s3259_s27  ;;  %v5689_v33 = vld [vmem:[#allocation14_spill] sm:$0xff] }
 0x43d   : > { %1556 = vrot.lane.b32.xlu1 %v4666_v52, %s3258_s21  ;;  %v1499_v48 = vmul.f32 %v4628_v0, %v5689_v33 }
 0x440   : > { %1598 = vrot.lane.b32.xlu0 %v4596_v23, %s3259_s27  ;;  %v1502_v23 = vmul.f32 %v4626_v62, %v5686_v2 }
 0x441   : > { %1592 = vrot.lane.b32.xlu1 %v4599_v51, %s3259_s27 }
 0x444   : > { %1602 = vrot.lane.b32.xlu0 %v4613_v39, %s3259_s27  ;;  %v1504_v39 = vmul.f32 %v4636_v61, %v4515_v27  ;;  %v1508_v27 = vmul.f32 %v4653_v26, %v4555_v47 }
 0x445   : > { %1596 = vrot.lane.b32.xlu1 %v4616_v16, %s3259_s27  ;;  %v1501_v16 = vmul.f32 %v4638_v6, %v4525_v59  ;;  %v1505_v59 = vmul.f32 %v4655_v56, %v4565_v42  ;;  %v5693_v42 = vld [vmem:[#allocation94_spill] sm:$0xff] }
 0x448   : > { %1606 = vrot.lane.b32.xlu0 %v4626_v62, %s3259_s27  ;;  %v1506_v62 = vmul.f32 %v4645_v58, %v4541_v44 }
 0x449   : > { %1600 = vrot.lane.b32.xlu1 %v4628_v0, %s3259_s27  ;;  %v5690_v0 = vld [vmem:[#allocation85_spill] sm:$0xff] }
 0x44c   : > { %1610 = vrot.lane.b32.xlu0 %v4636_v61, %s3259_s27 }
 0x44d   : > { %1604 = vrot.lane.b32.xlu1 %v4638_v6, %s3259_s27  ;;  %v5691_v6 = vld [vmem:[#allocation90_spill] sm:$0xff] }
 0x450   : > { %1614 = vrot.lane.b32.xlu0 %v4645_v58, %s3259_s27  ;;  %v1503_v58 = vmul.f32 %v4647_v15, %v4547_v12  ;;  %v1507_v12 = vmul.f32 %v4661_v37, %v4588_v19 }
 0x451   : > { %1608 = vrot.lane.b32.xlu1 %v4647_v15, %s3259_s27  ;;  %v5692_v15 = vld [vmem:[#allocation92_spill] sm:$0xff] }
 0x454   : > { %1618 = vrot.lane.b32.xlu0 %v4653_v26, %s3259_s27 }
 0x455   : > { %1612 = vrot.lane.b32.xlu1 %v4655_v56, %s3259_s27 }
 0x458   : > { %1654 = vrot.lane.b32.xlu0 %v4285_v63, %s3260_s28 }
 0x459   : > { %1616 = vrot.lane.b32.xlu1 %v4661_v37, %s3259_s27 }
 0x45c   : > { %1858 = vrot.lane.b32.xlu0 %v3455_v9, %s3261_s30  ;;  %v5672_v9 = vld [vmem:[#allocation112_spill] sm:$0xff] }
 0x45d   : > { %1620 = vrot.lane.b32.xlu1 %v4666_v52, %s3259_s27 }
 0x460   : > { %1862 = vrot.lane.b32.xlu0 %v3463_v11, %s3261_s30  ;;  %v5674_v11 = vld [vmem:[#allocation114_spill] sm:$0xff] }
 0x461   : > { %1656 = vrot.lane.b32.xlu1 %v4317_v46, %s3260_s28  ;;  %v5680_v46 = vld [vmem:[#allocation41_spill] sm:$0xff] }
 0x462   : > { %v1495_v31 = vmul.f32 %v4599_v51, %v5680_v46  ;;  %v5685_v51 = vld [vmem:[#allocation12_spill] sm:$0xff] }
 0x463   : > { %v1494_v7 = vmul.f32 %v4558_v53, %v5685_v51 }
 0x464   : > { %1866 = vrot.lane.b32.xlu0 %v3490_v28, %s3261_s30  ;;  %v5676_v28 = vld [vmem:[#allocation115_spill] sm:$0xff] }
 0x465   : > { %1860 = vrot.lane.b32.xlu1 %v3459_v10, %s3261_s30  ;;  %v5673_v10 = vld [vmem:[#allocation107_spill] sm:$0xff] }
 0x468   : > { %1870 = vrot.lane.b32.xlu0 %v3511_v45, %s3261_s30  ;;  %v5678_v45 = vld [vmem:[#allocation116_spill] sm:$0xff] }
 0x469   : > { %1864 = vrot.lane.b32.xlu1 %v3479_v18, %s3261_s30  ;;  %v5675_v18 = vld [vmem:[#allocation108_spill] sm:$0xff] }
 0x46c   : > { %1899 = vperm.xlu0 %3037, %v4289_v54  }
 0x46d   : > { %1868 = vrot.lane.b32.xlu1 %v3497_v36, %s3261_s30  ;;  %v5677_v36 = vld [vmem:[#allocation109_spill] sm:$0xff] }
 0x470   : > { %1911 = vperm.xlu0 %3037, %v4333_v34  }
 0x471   : > { %1872 = vrot.lane.b32.xlu1 %v3517_v50, %s3261_s30  ;;  %v5679_v50 = vld [vmem:[#allocation110_spill] sm:$0xff] }
 0x474   : > { %1919 = vperm.xlu0 %3037, %v4345_v30  }
 0x475   : > { %1903 = vperm.xlu1 %3038, %v4321_v22  }
 0x478   : > { %1927 = vperm.xlu0 %3037, %v4357_v5  }
 0x479   : > { %1907 = vperm.xlu1 %3038, %v4303_v25  }
 0x47c   : > { %1935 = vperm.xlu0 %3037, %v5672_v9  }
 0x47d   : > { %1915 = vperm.xlu1 %3038, %v5673_v10  }
 0x480   : > { %1943 = vperm.xlu0 %3037, %v5674_v11  }
 0x481   : > { %1923 = vperm.xlu1 %3038, %v5675_v18  }
 0x484   : > { %1951 = vperm.xlu0 %3037, %v5676_v28  }
 0x485   : > { %1931 = vperm.xlu1 %3038, %v5677_v36  }
 0x488   : > { %1959 = vperm.xlu0 %3037, %v5678_v45  }
 0x489   : > { %1939 = vperm.xlu1 %3038, %v5679_v50  }
 0x48a   : > { %v1527_v63 = vpop.permute.xlu0 %1526 }
 0x48c   : > { %3040 = vset.pattern.permute.xlu0 %v3262_v20 }
 0x48d   : > { %1947 = vperm.xlu1 %3038, %v5681_v29   ;;  %2005 = vperm.xlu0 %3040, %v1495_v31   ;;  %v1574_v31 = vmul.f32 %v1527_v63, %v5690_v0  ;;  %v5701_v0 = vld [vmem:[#allocation89_spill] sm:$0xff] }
 0x48e   : > { %v4712_v32 = vpop.permute.xlu0 %1530 }
 0x491   : > { %1955 = vperm.xlu1 %3038, %v5683_v35   ;;  %2020 = vperm.xlu0 %3040, %v1498_v38  }
 0x492   : > { %v4717_v57 = vpop.permute.xlu0 %1534 }
 0x493   : > { %v1529_v14 = vpop.permute.xlu1 %1528 }
 0x495   : > { %3039 = vset.pattern.permute.xlu1 %v3262_v20  ;;  %2030 = vperm.xlu0 %3040, %v1500_v43   ;;  %v3263_v20 = vmov 18  }
 0x496   : > { %2000 = vperm.xlu1 %3039, %v1494_v7   ;;  %v4723_v41 = vpop.permute.xlu0 %1538  ;;  %v1509_v7 = vmul.f32 %v4666_v52, %v4604_v13 }
 0x497   : > { %v1533_v21 = vpop.permute.xlu1 %1532 }
 0x498   : > { %v1577_v26 = vmul.f32 %v1533_v21, %v5691_v6  ;;  %v5694_v21 = vld [vmem:[#allocation96_spill] sm:$0xff] }
 0x499   : > { %2040 = vperm.xlu0 %3040, %v1502_v23  }
 0x49a   : > { %2010 = vperm.xlu1 %3039, %v1496_v55   ;;  %v4729_v49 = vpop.permute.xlu0 %1542  ;;  %v5695_v55 = vld [vmem:[#allocation88_spill] sm:$0xff] }
 0x49b   : > { %v1537_v53 = vpop.permute.xlu1 %1536 }
 0x49c   : > { %v1579_v63 = vmul.f32 %v1537_v53, %v5692_v15  ;;  %v5696_v53 = vld [vmem:[#allocation78_spill] sm:$0xff] }
 0x49d   : > { %2050 = vperm.xlu0 %3040, %v1504_v39   ;;  %v1575_v39 = vmul.f32 %v1529_v14, %v5695_v55  ;;  %v5709_v55 = vld [vmem:[#allocation97_spill] sm:$0xff] }
 0x49e   : > { %2015 = vperm.xlu1 %3039, %v1497_v40   ;;  %v4735_v17 = vpop.permute.xlu0 %1546  ;;  %v5697_v40 = vld [vmem:[#allocation86_spill] sm:$0xff] }
 0x49f   : > { %v1541_v8 = vpop.permute.xlu1 %1540  ;;  %v1576_v13 = vmul.f32 %v4712_v32, %v5697_v40  ;;  %v5711_v40 = vld [vmem:[#allocation82_spill] sm:$0xff] }
 0x4a0   : > { %v1581_v56 = vmul.f32 %v1541_v8, %v5693_v42  ;;  %v5698_v8 = vld [vmem:[#allocation81_spill] sm:$0xff] }
 0x4a1   : > { %2060 = vperm.xlu0 %3040, %v1506_v62  }
 0x4a2   : > { %2025 = vperm.xlu1 %3039, %v1499_v48   ;;  %v4741_v3 = vpop.permute.xlu0 %1550  ;;  %v5699_v48 = vld [vmem:[#allocation87_spill] sm:$0xff] }
 0x4a3   : > { %v1545_v61 = vpop.permute.xlu1 %1544 }
 0x4a4   : > { %v1583_v1 = vmul.f32 %v1545_v61, %v5694_v21  ;;  %v5708_v21 = vld [vmem:[#allocation77_spill] sm:$0xff] }
 0x4a5   : > { %2070 = vperm.xlu0 %3040, %v1508_v27   ;;  %v1578_v27 = vmul.f32 %v4717_v57, %v5699_v48  ;;  %v3264_v57 = vmov 19   ;;  %v5714_v48 = vld [vmem:[#allocation103_spill] sm:$0xff] }
 0x4a6   : > { %2035 = vperm.xlu1 %3039, %v1501_v16   ;;  %v4747_v46 = vpop.permute.xlu0 %1554  ;;  %v5700_v16 = vld [vmem:[#allocation75_spill] sm:$0xff] }
 0x4a7   : > { %v1549_v44 = vpop.permute.xlu1 %1548 }
 0x4a8   : > { %v1585_v60 = vmul.f32 %v1549_v44, %v5696_v53  ;;  %v1580_v44 = vmul.f32 %v4723_v41, %v5701_v0  ;;  %v5705_v41 = vld [vmem:[#allocation76_spill] sm:$0xff]  ;;  %v5710_v53 = vld [vmem:[#allocation99_spill] sm:$0xff]  ;;  %v5716_v0 = vld [vmem:[#allocation98_spill] sm:$0xff] }
 0x4a9   : > { %3041 = vset.pattern.permute.xlu0 %v3263_v20 }
 0x4aa   : > { %2045 = vperm.xlu1 %3039, %v1503_v58   ;;  %v4752_v24 = vpop.permute.xlu0 %1590  ;;  %2116 = vperm.xlu0 %3041, %v1574_v31   ;;  %v5702_v31 = vld [vmem:[#allocation91_spill] sm:$0xff] }
 0x4ab   : > { %v1553_v47 = vpop.permute.xlu1 %1552 }
 0x4ac   : > { %v1587_v33 = vmul.f32 %v1553_v47, %v5698_v8  ;;  %v5703_v47 = vld [vmem:[#allocation83_spill] sm:$0xff] }
 0x4ae   : > { %2055 = vperm.xlu1 %3039, %v1505_v59   ;;  %v4757_v38 = vpop.permute.xlu0 %1594  ;;  %2131 = vperm.xlu0 %3041, %v1577_v26  }
 0x4af   : > { %v1557_v4 = vpop.permute.xlu1 %1556 }
 0x4b0   : > { %v1589_v58 = vmul.f32 %v1557_v4, %v5700_v16  ;;  %v5704_v4 = vld [vmem:[#allocation93_spill] sm:$0xff] }
 0x4b2   : > { %2065 = vperm.xlu1 %3039, %v1507_v12   ;;  %v1599_v43 = vpop.permute.xlu0 %1598  ;;  %2141 = vperm.xlu0 %3041, %v1579_v63   ;;  %v1584_v12 = vmul.f32 %v4735_v17, %v5704_v4  ;;  %v5719_v4 = vld [vmem:[#allocation10_spill] sm:$0xff] }
 0x4b3   : > { %v1593_v51 = vpop.permute.xlu1 %1592  ;;  %v1642_v15 = vmul.f32 %v1599_v43, %v5705_v41 }
 0x4b4   : > { %v1639_v59 = vmul.f32 %v1593_v51, %v5703_v47  ;;  %v5707_v51 = vld [vmem:[#allocation80_spill] sm:$0xff] }
 0x4b5   : > { %v5718_v47 = vld [vmem:[#allocation48_spill] sm:$0xff] }
 0x4b6   : > { %2075 = vperm.xlu1 %3039, %v1509_v7   ;;  %v1603_v2 = vpop.permute.xlu0 %1602  ;;  %2151 = vperm.xlu0 %3041, %v1581_v56   ;;  %v5706_v7 = vld [vmem:[#allocation95_spill] sm:$0xff] }
 0x4b7   : > { %v1597_v23 = vpop.permute.xlu1 %1596  ;;  %v1644_v42 = vmul.f32 %v1603_v2, %v5707_v51 }
 0x4ba   : > { %3042 = vset.pattern.permute.xlu1 %v3263_v20  ;;  %v1607_v19 = vpop.permute.xlu0 %1606  ;;  %2161 = vperm.xlu0 %3041, %v1583_v1   ;;  %v1582_v20 = vmul.f32 %v4729_v49, %v5702_v31  ;;  %v1586_v49 = vmul.f32 %v4741_v3, %v5706_v7  ;;  %v1588_v1 = vmul.f32 %v4747_v46, %v5708_v21  ;;  %v5713_v46 = vld [vmem:[#allocation79_spill] sm:$0xff] }
 0x4bb   : > { %2121 = vperm.xlu1 %3042, %v1575_v39   ;;  %v1601_v37 = vpop.permute.xlu1 %1600  ;;  %v1646_v17 = vmul.f32 %v1607_v19, %v5709_v55  ;;  %v1638_v3 = vmul.f32 %v4752_v24, %v5711_v40  ;;  %v1640_v19 = vmul.f32 %v4757_v38, %v5713_v46  ;;  %v5717_v38 = vld [vmem:[#allocation100_spill] sm:$0xff]  ;;  %v5722_v21 = vld [vmem:[#allocation55_spill] sm:$0xff]  ;;  %v5725_v46 = vld [vmem:[#allocation105_spill] sm:$0xff] }
 0x4bc   : > { %v5724_v55 = vld [vmem:[#allocation104_spill] sm:$0xff] }
 0x4be   : > { %v1611_v52 = vpop.permute.xlu0 %1610  ;;  %2171 = vperm.xlu0 %3041, %v1585_v60  }
 0x4bf   : > { %2126 = vperm.xlu1 %3042, %v1576_v13   ;;  %v1605_v62 = vpop.permute.xlu1 %1604  ;;  %v1648_v60 = vmul.f32 %v1611_v52, %v5710_v53  ;;  %v5712_v13 = vld [vmem:[#allocation101_spill] sm:$0xff]  ;;  %v5715_v52 = vld [vmem:[#allocation84_spill] sm:$0xff] }
 0x4c2   : > { %2181 = vperm.xlu0 %3041, %v1587_v33   ;;  %v1615_v14 = vpop.permute.xlu0 %1614 }
 0x4c3   : > { %2136 = vperm.xlu1 %3042, %v1578_v27   ;;  %v1609_v61 = vpop.permute.xlu1 %1608  ;;  %v1650_v8 = vmul.f32 %v1615_v14, %v5712_v13  ;;  %v3265_v14 = vmov 7  }
 0x4c6   : > { %2191 = vperm.xlu0 %3041, %v1589_v58   ;;  %v1619_v6 = vpop.permute.xlu0 %1618  ;;  %v1641_v58 = vmul.f32 %v1597_v23, %v5715_v52  ;;  %v5727_v52 = vld [vmem:[#allocation52_spill] sm:$0xff] }
 0x4c7   : > { %2146 = vperm.xlu1 %3042, %v1580_v44   ;;  %v4776_v32 = vpop.permute.xlu1 %1612  ;;  %v1652_v27 = vmul.f32 %v1619_v6, %v5714_v48  ;;  %v1643_v44 = vmul.f32 %v1601_v37, %v5716_v0  ;;  %v5720_v37 = vld [vmem:[#allocation102_spill] sm:$0xff]  ;;  %v5726_v48 = vld [vmem:[#allocation59_spill] sm:$0xff] }
 0x4c8   : > { %v1647_v41 = vmul.f32 %v1609_v61, %v5720_v37  ;;  %v5730_v37 = vld [vmem:[#allocation56_spill] sm:$0xff] }
 0x4ca   : > { %3044 = vset.pattern.permute.xlu0 %v3264_v57  ;;  %v4786_v63 = vpop.permute.xlu0 %1654 }
 0x4cb   : > { %2156 = vperm.xlu1 %3042, %v1582_v20   ;;  %2237 = vperm.xlu0 %3044, %v1639_v59   ;;  %v4781_v26 = vpop.permute.xlu1 %1616  ;;  %v1645_v20 = vmul.f32 %v1605_v62, %v5717_v38  ;;  %v1780_v59 = vadd.f32 %v5718_v47, %v4786_v63  ;;  %v5728_v47 = vld [vmem:[#allocation106_spill] sm:$0xff] }
 0x4ce   : > { %v1859_v39 = vpop.permute.xlu0 %1858 }
 0x4cf   : > { %2166 = vperm.xlu1 %3042, %v1584_v12   ;;  %2252 = vperm.xlu0 %3044, %v1642_v15   ;;  %v4791_v56 = vpop.permute.xlu1 %1620  ;;  %v5721_v15 = vld [vmem:[#allocation51_spill] sm:$0xff] }
 0x4d2   : > { %v4801_v2 = vpop.permute.xlu0 %1862 }
 0x4d3   : > { %2176 = vperm.xlu1 %3042, %v1586_v49   ;;  %2262 = vperm.xlu0 %3044, %v1644_v42   ;;  %v4796_v43 = vpop.permute.xlu1 %1656 }
 0x4d4   : > { %v1795_v7 = vadd.f32 %v5721_v15, %v4796_v43 }
 0x4d6   : > { %v4807_v16 = vpop.permute.xlu0 %1866 }
 0x4d7   : > { %2186 = vperm.xlu1 %3042, %v1588_v1   ;;  %2272 = vperm.xlu0 %3044, %v1646_v17   ;;  %v1861_v33 = vpop.permute.xlu1 %1860  ;;  %v1805_v1 = vadd.f32 %v5722_v21, %v4796_v43  ;;  %v1649_v17 = vmul.f32 %v4776_v32, %v5724_v55  ;;  %v1815_v32 = vadd.f32 %v5726_v48, %v4796_v43 }
 0x4d8   : > { %v1885_v49 = vadd.f32 %v1861_v33, %v1795_v7 }
 0x4d9   : > { %v1887_v40 = vadd.f32 %v4801_v2, %v1805_v1 }
 0x4da   : > { %v4813_v31 = vpop.permute.xlu0 %1870 }
 0x4db   : > { %3043 = vset.pattern.permute.xlu1 %v3264_v57  ;;  %2282 = vperm.xlu0 %3044, %v1648_v60   ;;  %v4810_v24 = vpop.permute.xlu1 %1864  ;;  %v1882_v57 = vadd.f32 %v1859_v39, %v1780_v59  ;;  %v1653_v59 = vmul.f32 %v4791_v56, %v5728_v47 }
 0x4dc   : > { %2232 = vperm.xlu1 %3043, %v1638_v3   ;;  %v1889_v38 = vadd.f32 %v4810_v24, %v1815_v32 }
 0x4df   : > { %2292 = vperm.xlu0 %3044, %v1650_v8   ;;  %v4820_v23 = vpop.permute.xlu1 %1868 }
 0x4e0   : > { %2242 = vperm.xlu1 %3043, %v1640_v19   ;;  %v1651_v19 = vmul.f32 %v4781_v26, %v5725_v46  ;;  %v5734_v46 = vld [vmem:[#allocation64_spill] sm:$0xff] }
 0x4e3   : > { %2302 = vperm.xlu0 %3044, %v1652_v27   ;;  %v4829_v51 = vpop.permute.xlu1 %1872 }
 0x4e4   : > { %2247 = vperm.xlu1 %3043, %v1641_v58   ;;  %v1790_v58 = vadd.f32 %v5727_v52, %v4786_v63 }
 0x4e6   : > { %v1884_v26 = vadd.f32 %v1861_v33, %v1790_v58  ;;  %v5735_v58 = vld [vmem:[#allocation72_spill] sm:$0xff] }
 0x4e7   : > { %3045 = vset.pattern.permute.xlu0 %v3265_v14 }
 0x4e8   : > { %2257 = vperm.xlu1 %3043, %v1643_v44   ;;  %2347 = vperm.xlu0 %3045, %v4289_v54  }
 0x4eb   : > { %v1900_v6 = vpop.permute.xlu0 %1899 }
 0x4ec   : > { %v1966_v12 = vmul.f32 %v5719_v4, %v1900_v6  ;;  %2267 = vperm.xlu1 %3043, %v1645_v20   ;;  %2359 = vperm.xlu0 %3045, %v4333_v34   ;;  %v5723_v34 = vld [vmem:[#allocation47_spill] sm:$0xff] }
 0x4ed   : > { %v1785_v61 = vadd.f32 %v5723_v34, %v4796_v43  ;;  %v5729_v6 = vld [vmem:[#allocation63_spill] sm:$0xff]  ;;  %v5732_v34 = vld [vmem:[#allocation60_spill] sm:$0xff] }
 0x4ee   : > { %v4827_v54 = vadd.f32 %v1966_v12, %v1882_v57  ;;  %v1825_v57 = vadd.f32 %v5729_v6, %v4796_v43 }
 0x4ef   : > { %v1912_v62 = vpop.permute.xlu0 %1911 }
 0x4f0   : > { %v1969_v42 = vmul.f32 %v5719_v4, %v1912_v62  ;;  %2277 = vperm.xlu1 %3043, %v1647_v41   ;;  %2367 = vperm.xlu0 %3045, %v4345_v30   ;;  %v1883_v30 = vadd.f32 %v1859_v39, %v1785_v61  ;;  %v1800_v41 = vadd.f32 %v5730_v37, %v4786_v63 }
 0x4f1   : > { %v1891_v62 = vadd.f32 %v4807_v16, %v1825_v57  ;;  %v1810_v61 = vadd.f32 %v5732_v34, %v4786_v63 }
 0x4f2   : > { %v4839_v53 = vadd.f32 %v1969_v42, %v1885_v49  ;;  %v1886_v56 = vadd.f32 %v4801_v2, %v1800_v41  ;;  %v5731_v42 = vld [vmem:[#allocation66_spill] sm:$0xff] }
 0x4f3   : > { %v1920_v60 = vpop.permute.xlu0 %1919  ;;  %v1835_v21 = vadd.f32 %v5731_v42, %v4796_v43  ;;  %v1888_v2 = vadd.f32 %v4810_v24, %v1810_v61  ;;  %v5740_v42 = vld [vmem:[#allocation74_spill] sm:$0xff] }
 0x4f4   : > { %v1971_v3 = vmul.f32 %v5719_v4, %v1920_v60  ;;  %2287 = vperm.xlu1 %3043, %v1649_v17   ;;  %v1904_v13 = vpop.permute.xlu1 %1903  ;;  %2375 = vperm.xlu0 %3045, %v4357_v5  }
 0x4f5   : > { %v1967_v8 = vmul.f32 %v5719_v4, %v1904_v13  ;;  %v1893_v60 = vadd.f32 %v4820_v23, %v1835_v21  ;;  %v5733_v13 = vld [vmem:[#allocation69_spill] sm:$0xff]  ;;  %v1850_v21 = vadd.f32 %v5740_v42, %v4786_v63 }
 0x4f6   : > { %v4849_v27 = vadd.f32 %v1971_v3, %v1887_v40 }
 0x4f7   : > { %v4853_v0 = vadd.f32 %v1967_v8, %v1883_v30  ;;  %v1928_v44 = vpop.permute.xlu0 %1927  ;;  %v1845_v30 = vadd.f32 %v5733_v13, %v4796_v43 }
 0x4f8   : > { %v1973_v5 = vmul.f32 %v5719_v4, %v1928_v44  ;;  %2297 = vperm.xlu1 %3043, %v1651_v19   ;;  %v1908_v39 = vpop.permute.xlu1 %1907  ;;  %2383 = vperm.xlu0 %3045, %v5672_v9   ;;  %v1820_v19 = vadd.f32 %v5734_v46, %v4786_v63  ;;  %v1855_v44 = vadd.f32 %v5735_v58, %v4796_v43  ;;  %v5737_v43 = vld [vmem:[#allocation9_spill] sm:$0xff] }
 0x4f9   : > { %v1968_v20 = vmul.f32 %v5719_v4, %v1908_v39  ;;  %v5738_v57 = vsub.s32 0, %v5737_v43 }
 0x4fa   : > { %v4863_v12 = vadd.f32 %v1973_v5, %v1889_v38  ;;  %v1890_v24 = vadd.f32 %v4807_v16, %v1820_v19  ;;  %v5736_v5 = vld [vmem:[#allocation68_spill] sm:$0xff]  ;;  %v1897_v47 = vadd.f32 %v4829_v51, %v1855_v44 }
 0x4fb   : > { %v4867_v15 = vadd.f32 %v1968_v20, %v1884_v26  ;;  %v1936_v7 = vpop.permute.xlu0 %1935  ;;  %v1830_v39 = vadd.f32 %v5736_v5, %v4786_v63 }
 0x4fc   : > { %v1975_v9 = vmul.f32 %v5719_v4, %v1936_v7  ;;  %2307 = vperm.xlu1 %3043, %v1653_v59   ;;  %v1916_v33 = vpop.permute.xlu1 %1915  ;;  %2391 = vperm.xlu0 %3045, %v5674_v11   ;;  %v5739_v7 = vld [vmem:[#allocation71_spill] sm:$0xff] }
 0x4fd   : > { %v1970_v49 = vmul.f32 %v5719_v4, %v1916_v33  ;;  %v1892_v16 = vadd.f32 %v4820_v23, %v1830_v39 }
 0x4fe   : > { %v4876_v1 = vadd.f32 %v1975_v9, %v1891_v62  ;;  %v1840_v62 = vadd.f32 %v5739_v7, %v4786_v63 }
 0x4ff   : > { %v1986_v55 = vadd.f32 %v1970_v49, %v1886_v56  ;;  %v1944_v17 = vpop.permute.xlu0 %1943 }
 0x500   : > { %v1977_v40 = vmul.f32 %v5719_v4, %v1944_v17  ;;  %3046 = vset.pattern.permute.xlu1 %v3265_v14  ;;  %v1924_v11 = vpop.permute.xlu1 %1923  ;;  %2399 = vperm.xlu0 %3045, %v5676_v28   ;;  %v1895_v14 = vadd.f32 %v4813_v31, %v1845_v30  ;;  %v1894_v23 = vadd.f32 %v4813_v31, %v1840_v62 }
 0x501   : > { %v1972_v3 = vmul.f32 %v5719_v4, %v1924_v11  ;;  %2351 = vperm.xlu1 %3046, %v4321_v22  }
 0x502   : > { %v4889_v8 = vadd.f32 %v1977_v40, %v1893_v60  ;;  %v1896_v40 = vadd.f32 %v4829_v51, %v1850_v21 }
 0x503   : > { %v1988_v48 = vadd.f32 %v1972_v3, %v1888_v2  ;;  %v1952_v32 = vpop.permute.xlu0 %1951 }
 0x504   : > { %v1979_v28 = vmul.f32 %v5719_v4, %v1952_v32  ;;  %v1932_v52 = vpop.permute.xlu1 %1931  ;;  %2407 = vperm.xlu0 %3045, %v5678_v45  }
 0x505   : > { %v1974_v22 = vmul.f32 %v5719_v4, %v1932_v52  ;;  %2355 = vperm.xlu1 %3046, %v4303_v25   ;;  %v4910_v25 = vld [vmem:[#allocation6 + $0x10] sm:$0xff] }
 0x506   : > { %v4901_v38 = vadd.f32 %v1979_v28, %v1895_v14  ;;  %v4915_v37 = vrot.slane %v4910_v25, %v5738_v57 }
 0x507   : > { %v1990_v26 = vadd.f32 %v1974_v22, %v1890_v24  ;;  %v1960_v20 = vpop.permute.xlu0 %1959 }
 0x508   : > { %v1981_v45 = vmul.f32 %v5719_v4, %v1960_v20  ;;  %v1940_v59 = vpop.permute.xlu1 %1939 }
 0x509   : > { %v1976_v6 = vmul.f32 %v5719_v4, %v1940_v59  ;;  %2363 = vperm.xlu1 %3046, %v5673_v10  }
 0x50a   : > { %v4917_v41 = vadd.f32 %v1981_v45, %v1897_v47 }
 0x50b   : > { %v1992_v9 = vadd.f32 %v1976_v6, %v1892_v16  ;;  %v5741_v6 = vsub.s32 1, %v5737_v43 }
 0x50c   : > { %v1948_v33 = vpop.permute.xlu1 %1947  ;;  %v2006_v56 = vpop.permute.xlu0 %2005 }
 0x50d   : > { %v1978_v49 = vmul.f32 %v5719_v4, %v1948_v33  ;;  %v2083_v10 = vmul.f32 %v4915_v37, %v2006_v56  ;;  %2371 = vperm.xlu1 %3046, %v5675_v18  }
 0x50f   : > { %v1994_v34 = vadd.f32 %v1978_v49, %v1894_v23  ;;  %v4928_v61 = vadd.f32 %v2083_v10, %v4853_v0 }
 0x510   : > { %v1956_v17 = vpop.permute.xlu1 %1955  ;;  %v2021_v60 = vpop.permute.xlu0 %2020 }
 0x511   : > { %v1980_v11 = vmul.f32 %v5719_v4, %v1956_v17  ;;  %v2086_v31 = vmul.f32 %v4915_v37, %v2021_v60  ;;  %2379 = vperm.xlu1 %3046, %v5677_v36  }
 0x513   : > { %v1996_v2 = vadd.f32 %v1980_v11, %v1896_v40  ;;  %v4934_v3 = vadd.f32 %v2086_v31, %v1986_v55 }
 0x514   : > { %v2031_v18 = vpop.permute.xlu0 %2030 }
 0x515   : > { %v2088_v63 = vmul.f32 %v4915_v37, %v2031_v18  ;;  %2387 = vperm.xlu1 %3046, %v5679_v50   ;;  %v2001_v0 = vpop.permute.xlu1 %2000 }
 0x516   : > { %v2082_v13 = vmul.f32 %v4915_v37, %v2001_v0 }
 0x517   : > { %v4939_v30 = vadd.f32 %v2088_v63, %v1988_v48 }
 0x518   : > { %v4942_v51 = vadd.f32 %v2082_v13, %v4827_v54  ;;  %v2041_v4 = vpop.permute.xlu0 %2040 }
 0x519   : > { %v2090_v46 = vmul.f32 %v4915_v37, %v2041_v4  ;;  %2395 = vperm.xlu1 %3046, %v5681_v29   ;;  %v2011_v36 = vpop.permute.xlu1 %2010 }
 0x51a   : > { %v2084_v55 = vmul.f32 %v4915_v37, %v2011_v36 }
 0x51b   : > { %v4947_v19 = vadd.f32 %v2090_v46, %v1990_v26 }
 0x51c   : > { %v2100_v50 = vadd.f32 %v2084_v55, %v4867_v15  ;;  %v2051_v32 = vpop.permute.xlu0 %2050 }
 0x51d   : > { %v2092_v14 = vmul.f32 %v4915_v37, %v2051_v32  ;;  %2403 = vperm.xlu1 %3046, %v5683_v35   ;;  %v2016_v48 = vpop.permute.xlu1 %2015 }
 0x51e   : > { %v2085_v54 = vmul.f32 %v4915_v37, %v2016_v48 }
 0x51f   : > { %v4953_v28 = vadd.f32 %v2092_v14, %v1992_v9 }
 0x520   : > { %v2101_v52 = vadd.f32 %v2085_v54, %v4839_v53  ;;  %v2061_v29 = vpop.permute.xlu0 %2060 }
 0x521   : > { %v2094_v24 = vmul.f32 %v4915_v37, %v2061_v29  ;;  %v2026_v22 = vpop.permute.xlu1 %2025 }
 0x522   : > { %v2087_v58 = vmul.f32 %v4915_v37, %v2026_v22 }
 0x523   : > { %v4958_v44 = vadd.f32 %v2094_v24, %v1994_v34 }
 0x524   : > { %v2103_v15 = vadd.f32 %v2087_v58, %v4849_v27  ;;  %v2071_v5 = vpop.permute.xlu0 %2070  ;;  %v4973_v27 = vrot.slane %v4910_v25, %v5741_v6 }
 0x525   : > { %v2096_v35 = vmul.f32 %v4915_v37, %v2071_v5  ;;  %v2036_v39 = vpop.permute.xlu1 %2035 }
 0x526   : > { %v2089_v26 = vmul.f32 %v4915_v37, %v2036_v39 }
 0x527   : > { %v4963_v20 = vadd.f32 %v2096_v35, %v1996_v2 }
 0x528   : > { %v2105_v53 = vadd.f32 %v2089_v26, %v4863_v12 }
 0x529   : > { %v2046_v47 = vpop.permute.xlu1 %2045  ;;  %v4966_v45 = vpop.permute.xlu0 %2116 }
 0x52a   : > { %v2091_v59 = vmul.f32 %v4915_v37, %v2046_v47 }
 0x52c   : > { %v2107_v16 = vadd.f32 %v2091_v59, %v4876_v1 }
 0x52d   : > { %v2056_v57 = vpop.permute.xlu1 %2055  ;;  %v2132_v7 = vpop.permute.xlu0 %2131 }
 0x52e   : > { %v2093_v62 = vmul.f32 %v4915_v37, %v2056_v57  ;;  %v2201_v9 = vmul.f32 %v4973_v27, %v2132_v7 }
 0x530   : > { %v2109_v12 = vadd.f32 %v2093_v62, %v4889_v8  ;;  %v4978_v33 = vadd.f32 %v2201_v9, %v2101_v52 }
 0x531   : > { %v2066_v56 = vpop.permute.xlu1 %2065  ;;  %v2142_v23 = vpop.permute.xlu0 %2141 }
 0x532   : > { %v2095_v49 = vmul.f32 %v4915_v37, %v2066_v56  ;;  %v2203_v1 = vmul.f32 %v4973_v27, %v2142_v23  ;;  %v2198_v56 = vmul.f32 %v4973_v27, %v4966_v45 }
 0x534   : > { %v2111_v10 = vadd.f32 %v2095_v49, %v4901_v38  ;;  %v4983_v42 = vadd.f32 %v2203_v1, %v2103_v15 }
 0x535   : > { %v2076_v21 = vpop.permute.xlu1 %2075  ;;  %v2152_v34 = vpop.permute.xlu0 %2151 }
 0x536   : > { %v2097_v17 = vmul.f32 %v4915_v37, %v2076_v21  ;;  %v2205_v60 = vmul.f32 %v4973_v27, %v2152_v34  ;;  %v2214_v34 = vadd.f32 %v2198_v56, %v4942_v51 }
 0x538   : > { %v2113_v8 = vadd.f32 %v2097_v17, %v4917_v41  ;;  %v4988_v40 = vadd.f32 %v2205_v60, %v2105_v53 }
 0x539   : > { %v2162_v11 = vpop.permute.xlu0 %2161 }
 0x53a   : > { %v2207_v31 = vmul.f32 %v4973_v27, %v2162_v11  ;;  %v2122_v2 = vpop.permute.xlu1 %2121  ;;  %v5744_v11 = vsub.s32 4, %v5737_v43 }
 0x53b   : > { %v2199_v18 = vmul.f32 %v4973_v27, %v2122_v2 }
 0x53c   : > { %v4992_v63 = vadd.f32 %v2207_v31, %v2107_v16  ;;  %v5059_v31 = vrot.slane %v4910_v25, %v5744_v11 }
 0x53d   : > { %v4995_v38 = vadd.f32 %v2199_v18, %v4928_v61  ;;  %v2172_v0 = vpop.permute.xlu0 %2171 }
 0x53e   : > { %v2209_v37 = vmul.f32 %v4973_v27, %v2172_v0  ;;  %v2127_v13 = vpop.permute.xlu1 %2126 }
 0x53f   : > { %v2200_v4 = vmul.f32 %v4973_v27, %v2127_v13 }
 0x540   : > { %v4999_v41 = vadd.f32 %v2209_v37, %v2109_v12 }
 0x541   : > { %v5001_v46 = vadd.f32 %v2200_v4, %v2100_v50  ;;  %v2182_v36 = vpop.permute.xlu0 %2181 }
 0x542   : > { %v2211_v55 = vmul.f32 %v4973_v27, %v2182_v36  ;;  %v2137_v32 = vpop.permute.xlu1 %2136 }
 0x543   : > { %v2202_v14 = vmul.f32 %v4973_v27, %v2137_v32 }
 0x544   : > { %v5005_v48 = vadd.f32 %v2211_v55, %v2111_v10  ;;  %v5743_v10 = vsub.s32 3, %v5737_v43 }
 0x545   : > { %v5008_v61 = vadd.f32 %v2202_v14, %v4934_v3  ;;  %v2192_v54 = vpop.permute.xlu0 %2191 }
 0x546   : > { %v2213_v52 = vmul.f32 %v4973_v27, %v2192_v54  ;;  %v2147_v29 = vpop.permute.xlu1 %2146  ;;  %v5052_v21 = vrot.slane %v4910_v25, %v5743_v10 }
 0x547   : > { %v2204_v24 = vmul.f32 %v4973_v27, %v2147_v29 }
 0x548   : > { %v5012_v22 = vadd.f32 %v2213_v52, %v2113_v8 }
 0x549   : > { %v5015_v50 = vadd.f32 %v2204_v24, %v4939_v30 }
 0x54a   : > { %v2157_v58 = vpop.permute.xlu1 %2156  ;;  %v2238_v15 = vpop.permute.xlu0 %2237 }
 0x54b   : > { %v2206_v5 = vmul.f32 %v4973_v27, %v2157_v58 }
 0x54d   : > { %v5019_v35 = vadd.f32 %v2206_v5, %v4947_v19 }
 0x54e   : > { %v2167_v3 = vpop.permute.xlu1 %2166  ;;  %v2253_v39 = vpop.permute.xlu0 %2252 }
 0x54f   : > { %v2208_v26 = vmul.f32 %v4973_v27, %v2167_v3 }
 0x551   : > { %v5023_v53 = vadd.f32 %v2208_v26, %v4953_v28 }
 0x552   : > { %v2177_v47 = vpop.permute.xlu1 %2176  ;;  %v2263_v59 = vpop.permute.xlu0 %2262 }
 0x553   : > { %v2210_v16 = vmul.f32 %v4973_v27, %v2177_v47 }
 0x555   : > { %v5027_v30 = vadd.f32 %v2210_v16, %v4958_v44  ;;  %v5742_v44 = vsub.s32 2, %v5737_v43 }
 0x556   : > { %v2187_v6 = vpop.permute.xlu1 %2186  ;;  %v5029_v57 = vpop.permute.xlu0 %2272 }
 0x557   : > { %v2212_v19 = vmul.f32 %v4973_v27, %v2187_v6  ;;  %v5044_v23 = vrot.slane %v4910_v25, %v5742_v44 }
 0x559   : > { %v5033_v7 = vadd.f32 %v2212_v19, %v4963_v20  ;;  %v2315_v14 = vmul.f32 %v5044_v23, %v2238_v15  ;;  %v2318_v6 = vmul.f32 %v5044_v23, %v2253_v39 }
 0x55a   : > { %v5035_v62 = vpop.permute.xlu0 %2282 }
 0x55b   : > { %v2233_v9 = vpop.permute.xlu1 %2232  ;;  %v2331_v58 = vadd.f32 %v2315_v14, %v4995_v38  ;;  %v2334_v39 = vadd.f32 %v2318_v6, %v5008_v61  ;;  %v2322_v61 = vmul.f32 %v5044_v23, %v5029_v57 }
 0x55c   : > { %v2314_v20 = vmul.f32 %v5044_v23, %v2233_v9 }
 0x55e   : > { %v5037_v28 = vpop.permute.xlu0 %2292  ;;  %v2330_v45 = vadd.f32 %v2314_v20, %v2214_v34  ;;  %v2320_v34 = vmul.f32 %v5044_v23, %v2263_v59 }
 0x55f   : > { %v2243_v12 = vpop.permute.xlu1 %2242 }
 0x560   : > { %v2316_v5 = vmul.f32 %v5044_v23, %v2243_v12 }
 0x562   : > { %v5046_v49 = vpop.permute.xlu0 %2302  ;;  %v2332_v56 = vadd.f32 %v2316_v5, %v5001_v46 }
 0x563   : > { %v2248_v1 = vpop.permute.xlu1 %2247 }
 0x564   : > { %v2317_v54 = vmul.f32 %v5044_v23, %v2248_v1 }
 0x566   : > { %v2333_v26 = vadd.f32 %v2317_v54, %v4978_v33 }
 0x567   : > { %v2258_v17 = vpop.permute.xlu1 %2257  ;;  %v2348_v60 = vpop.permute.xlu0 %2347 }
 0x568   : > { %v2414_v27 = vmul.f32 %v5052_v21, %v2348_v60  ;;  %v2319_v47 = vmul.f32 %v5044_v23, %v2258_v17 }
 0x56a   : > { %v2430_v8 = vadd.f32 %v2414_v27, %v2330_v45  ;;  %v2335_v20 = vadd.f32 %v2319_v47, %v4983_v42 }
 0x56b   : > { %v2268_v2 = vpop.permute.xlu1 %2267  ;;  %v2360_v13 = vpop.permute.xlu0 %2359 }
 0x56c   : > { %v2446_v18 = vmul.f32 %v2430_v8, %v2348_v60  ;;  %v2417_v29 = vmul.f32 %v5052_v21, %v2360_v13  ;;  %v2321_v12 = vmul.f32 %v5044_v23, %v2268_v2 }
 0x56e   : > { %v5062_v0 = vadd.f32 %v5059_v31, %v2446_v18  ;;  %v2433_v15 = vadd.f32 %v2417_v29, %v2333_v26  ;;  %v2337_v42 = vadd.f32 %v2321_v12, %v4988_v40  ;;  %v2324_v26 = vmul.f32 %v5044_v23, %v5035_v62 }
 0x56f   : > { %v2278_v37 = vpop.permute.xlu1 %2277  ;;  %v2368_v55 = vpop.permute.xlu0 %2367 }
 0x570   : > { %v2483_v51 = vsel %vm2482_vm4, %v5062_v0, 0.0  ;;  %v2419_v44 = vmul.f32 %v5052_v21, %v2368_v55  ;;  %v2449_v17 = vmul.f32 %v2433_v15, %v2360_v13  ;;  %v2323_v2 = vmul.f32 %v5044_v23, %v2278_v37 }
 0x571   : > { %2484 = vadd.xlane.f32.xlu1 %v2483_v51  ;;  %v2336_v13 = vadd.f32 %v2320_v34, %v5015_v50  ;;  %v2338_v50 = vadd.f32 %v2322_v61, %v5019_v35  ;;  %v2340_v12 = vadd.f32 %v2324_v26, %v5023_v53 }
 0x572   : > { %v2435_v45 = vadd.f32 %v2419_v44, %v2335_v20  ;;  %v2339_v5 = vadd.f32 %v2323_v2, %v4992_v63 }
 0x573   : > { %v2288_v4 = vpop.permute.xlu1 %2287  ;;  %v2376_v52 = vpop.permute.xlu0 %2375 }
 0x574   : > { %v2421_v46 = vmul.f32 %v5052_v21, %v2376_v52  ;;  %v2451_v40 = vmul.f32 %v2435_v45, %v2368_v55 }
 0x576   : > { %v2437_v14 = vadd.f32 %v2421_v46, %v2337_v42  ;;  %v5123_v62 = vadd.f32 %v5059_v31, %v2451_v40 }
 0x577   : > { %v5066_v36 = vpop.permute.xlu1 %2297  ;;  %v2384_v19 = vpop.permute.xlu0 %2383 }
 0x578   : > { %v2423_v54 = vmul.f32 %v5052_v21, %v2384_v19  ;;  %v2453_v55 = vmul.f32 %v2437_v14, %v2376_v52  ;;  %v2326_v52 = vmul.f32 %v5044_v23, %v5037_v28 }
 0x57a   : > { %v2439_v6 = vadd.f32 %v2423_v54, %v2339_v5  ;;  %v5136_v28 = vadd.f32 %v5059_v31, %v2453_v55  ;;  %v2342_v45 = vadd.f32 %v2326_v52, %v5027_v30 }
 0x57b   : > { %v5068_v32 = vpop.permute.xlu1 %2307  ;;  %v2392_v18 = vpop.permute.xlu0 %2391 }
 0x57c   : > { %v2425_v15 = vmul.f32 %v5052_v21, %v2392_v18  ;;  %v2504_v30 = vsel %vm2482_vm4, %v5136_v28, 0.0 }
 0x580   : > { %v2352_v24 = vpop.permute.xlu1 %2351 }
 0x581   : > { %v2415_v3 = vmul.f32 %v5052_v21, %v2352_v24 }
 0x583   : > { %v2431_v16 = vadd.f32 %v2415_v3, %v2331_v58  ;;  %v2325_v3 = vmul.f32 %v5044_v23, %v2288_v4 }
 0x584   : > { %v2356_v9 = vpop.permute.xlu1 %2355 }
 0x585   : > { %v2447_v1 = vmul.f32 %v2431_v16, %v2352_v24  ;;  %v2416_v38 = vmul.f32 %v5052_v21, %v2356_v9  ;;  %v5103_v24 = vadd.f32 %v5059_v31, %v2449_v17 }
 0x587   : > { %v2432_v33 = vadd.f32 %v2416_v38, %v2332_v56  ;;  %v5085_v10 = vadd.f32 %v5059_v31, %v2447_v1  ;;  %v2492_v63 = vsel %vm2482_vm4, %v5103_v24, 0.0  ;;  %v2341_v1 = vadd.f32 %v2325_v3, %v4999_v41 }
 0x588   : > { %v2364_v60 = vpop.permute.xlu1 %2363  ;;  %v2327_v38 = vmul.f32 %v5044_v23, %v5066_v36  ;;  %v2498_v36 = vsel %vm2482_vm4, %v5123_v62, 0.0 }
 0x589   : > { %v2448_v27 = vmul.f32 %v2432_v33, %v2356_v9  ;;  %v2418_v8 = vmul.f32 %v5052_v21, %v2364_v60  ;;  %v2486_v11 = vsel %vm2482_vm4, %v5085_v10, 0.0  ;;  %v2400_v9 = vpop.permute.xlu0 %2399  ;;  %v2441_v34 = vadd.f32 %v2425_v15, %v2341_v1 }
 0x58a   : > { %2487 = vadd.xlane.f32.xlu0 %v2486_v11  ;;  %v2427_v17 = vmul.f32 %v5052_v21, %v2400_v9  ;;  %v2329_v11 = vmul.f32 %v5044_v23, %v5068_v32 }
 0x58b   : > { %v2434_v59 = vadd.f32 %v2418_v8, %v2334_v39  ;;  %v5098_v51 = vadd.f32 %v5059_v31, %v2448_v27  ;;  %v2455_v39 = vmul.f32 %v2439_v6, %v2384_v19  ;;  %v2343_v19 = vadd.f32 %v2327_v38, %v5005_v48 }
 0x58c   : > { %v2372_v29 = vpop.permute.xlu1 %2371  ;;  %v2328_v8 = vmul.f32 %v5044_v23, %v5046_v49  ;;  %v2457_v61 = vmul.f32 %v2441_v34, %v2392_v18  ;;  %v2345_v32 = vadd.f32 %v2329_v11, %v5012_v22 }
 0x58d   : > { %v2450_v37 = vmul.f32 %v2434_v59, %v2364_v60  ;;  %v2420_v58 = vmul.f32 %v5052_v21, %v2372_v29  ;;  %v2489_v57 = vsel %vm2482_vm4, %v5098_v51, 0.0  ;;  %v2408_v27 = vpop.permute.xlu0 %2407  ;;  %v2443_v59 = vadd.f32 %v2427_v17, %v2343_v19 }
 0x58e   : > { %2490 = vadd.xlane.f32.xlu0 %v2489_v57  ;;  %v5155_v48 = vadd.f32 %v5059_v31, %v2455_v39  ;;  %v2429_v14 = vmul.f32 %v5052_v21, %v2408_v27  ;;  %v2344_v40 = vadd.f32 %v2328_v8, %v5033_v7  ;;  %v5169_v5 = vadd.f32 %v5059_v31, %v2457_v61 }
 0x58f   : > { %v2436_v47 = vadd.f32 %v2420_v58, %v2336_v13  ;;  %v5114_v16 = vadd.f32 %v5059_v31, %v2450_v37  ;;  %v2459_v37 = vmul.f32 %v2443_v59, %v2400_v9 }
 0x590   : > { %v2380_v56 = vpop.permute.xlu1 %2379  ;;  %v2510_v57 = vsel %vm2482_vm4, %v5155_v48, 0.0  ;;  %v2445_v3 = vadd.f32 %v2429_v14, %v2345_v32  ;;  %v2516_v55 = vsel %vm2482_vm4, %v5169_v5, 0.0 }
 0x591   : > { %v2452_v4 = vmul.f32 %v2436_v47, %v2372_v29  ;;  %v2422_v44 = vmul.f32 %v5052_v21, %v2380_v56  ;;  %v2495_v35 = vsel %vm2482_vm4, %v5114_v16, 0.0 }
 0x592   : > { %2493 = vadd.xlane.f32.xlu0 %v2492_v63  ;;  %2496 = vadd.xlane.f32.xlu1 %v2495_v35  ;;  %v2461_v6 = vmul.f32 %v2445_v3, %v2408_v27 }
 0x593   : > { %v2438_v20 = vadd.f32 %v2422_v44, %v2338_v50  ;;  %v5132_v33 = vadd.f32 %v5059_v31, %v2452_v4 }
 0x594   : > { %v2388_v46 = vpop.permute.xlu1 %2387  ;;  %v5192_v44 = vadd.f32 %v5059_v31, %v2461_v6 }
 0x595   : > { %v2454_v41 = vmul.f32 %v2438_v20, %v2380_v56  ;;  %v2424_v60 = vmul.f32 %v5052_v21, %v2388_v46  ;;  %v2501_v53 = vsel %vm2482_vm4, %v5132_v33, 0.0  ;;  %v5182_v56 = vadd.f32 %v5059_v31, %v2459_v37 }
 0x596   : > { %2499 = vadd.xlane.f32.xlu0 %v2498_v36  ;;  %2502 = vadd.xlane.f32.xlu1 %v2501_v53  ;;  %v2528_v35 = vsel %vm2482_vm4, %v5192_v44, 0.0 }
 0x597   : > { %v2440_v42 = vadd.f32 %v2424_v60, %v2340_v12  ;;  %v5150_v2 = vadd.f32 %v5059_v31, %v2454_v41  ;;  %v2522_v63 = vsel %vm2482_vm4, %v5182_v56, 0.0 }
 0x598   : > { %v2396_v13 = vpop.permute.xlu1 %2395 }
 0x599   : > { %v2456_v54 = vmul.f32 %v2440_v42, %v2388_v46  ;;  %v2426_v49 = vmul.f32 %v5052_v21, %v2396_v13  ;;  %v2507_v23 = vsel %vm2482_vm4, %v5150_v2, 0.0 }
 0x59a   : > { %2505 = vadd.xlane.f32.xlu0 %v2504_v30  ;;  %2508 = vadd.xlane.f32.xlu1 %v2507_v23 }
 0x59b   : > { %v2442_v18 = vadd.f32 %v2426_v49, %v2342_v45  ;;  %v5163_v29 = vadd.f32 %v5059_v31, %v2456_v54 }
 0x59c   : > { %v2404_v58 = vpop.permute.xlu1 %2403 }
 0x59d   : > { %v2458_v50 = vmul.f32 %v2442_v18, %v2396_v13  ;;  %v2428_v26 = vmul.f32 %v5052_v21, %v2404_v58  ;;  %v2513_v22 = vsel %vm2482_vm4, %v5163_v29, 0.0 }
 0x59e   : > { %2511 = vadd.xlane.f32.xlu0 %v2510_v57  ;;  %2514 = vadd.xlane.f32.xlu1 %v2513_v22 }
 0x59f   : > { %v2444_v47 = vadd.f32 %v2428_v26, %v2344_v40  ;;  %v5175_v7 = vadd.f32 %v5059_v31, %v2458_v50 }
 0x5a1   : > { %v2460_v15 = vmul.f32 %v2444_v47, %v2404_v58  ;;  %v2519_v9 = vsel %vm2482_vm4, %v5175_v7, 0.0 }
 0x5a2   : > { %2517 = vadd.xlane.f32.xlu0 %v2516_v55  ;;  %2520 = vadd.xlane.f32.xlu1 %v2519_v9 }
 0x5a3   : > { %v5185_v21 = vadd.f32 %v5059_v31, %v2460_v15 }
 0x5a5   : > { %v2525_v4 = vsel %vm2482_vm4, %v5185_v21, 0.0 }
 0x5a6   : > { %2523 = vadd.xlane.f32.xlu0 %v2522_v63  ;;  %2526 = vadd.xlane.f32.xlu1 %v2525_v4 }
 0x5aa   : > { %2529 = vadd.xlane.f32.xlu0 %v2528_v35 }
 0x5fe   : > { %v2485_v52 = vpop.xlane.xlu1 %2484 }
 0x5ff   : > { %v2532_v1 = vmul.f32 0.03125, %v2485_v52 }
 0x601   : > { %v5197_v38 = vsub.f32 %v5062_v0, %v2532_v1 }
 0x603   : > { %v2564_v12 = vmul.f32 %v5197_v38, %v5197_v38 }
 0x605   : > { %v2580_v20 = vsel %vm2482_vm4, %v2564_v12, 0.0 }
 0x606   : > { %2581 = vadd.xlane.f32.xlu1 %v2580_v20 }
 0x617   : > { %v2488_v39 = vpop.xlane.xlu0 %2487 }
 0x618   : > { %v2533_v31 = vmul.f32 0.03125, %v2488_v39 }
 0x61a   : > { %v5203_v34 = vsub.f32 %v5085_v10, %v2533_v31 }
 0x61b   : > { %v2491_v17 = vpop.xlane.xlu0 %2490 }
 0x61c   : > { %v2534_v46 = vmul.f32 0.03125, %v2491_v17  ;;  %v2565_v41 = vmul.f32 %v5203_v34, %v5203_v34 }
 0x61e   : > { %v5208_v60 = vsub.f32 %v5098_v51, %v2534_v46  ;;  %v2583_v0 = vsel %vm2482_vm4, %v2565_v41, 0.0 }
 0x61f   : > { %2584 = vadd.xlane.f32.xlu0 %v2583_v0  ;;  %v2494_v36 = vpop.xlane.xlu0 %2493  ;;  %v2497_v53 = vpop.xlane.xlu1 %2496 }
 0x620   : > { %v2535_v45 = vmul.f32 0.03125, %v2494_v36  ;;  %v2536_v19 = vmul.f32 0.03125, %v2497_v53  ;;  %v2566_v27 = vmul.f32 %v5208_v60, %v5208_v60 }
 0x622   : > { %v5214_v10 = vsub.f32 %v5103_v24, %v2535_v45  ;;  %v5217_v8 = vsub.f32 %v5114_v16, %v2536_v19  ;;  %v2586_v11 = vsel %vm2482_vm4, %v2566_v27, 0.0 }
 0x623   : > { %v2500_v51 = vpop.xlane.xlu0 %2499  ;;  %2587 = vadd.xlane.f32.xlu1 %v2586_v11  ;;  %v2503_v42 = vpop.xlane.xlu1 %2502 }
 0x624   : > { %v2537_v61 = vmul.f32 0.03125, %v2500_v51  ;;  %v2538_v59 = vmul.f32 0.03125, %v2503_v42  ;;  %v2567_v13 = vmul.f32 %v5214_v10, %v5214_v10  ;;  %v2568_v30 = vmul.f32 %v5217_v8, %v5217_v8 }
 0x626   : > { %v5225_v14 = vsub.f32 %v5123_v62, %v2537_v61  ;;  %v5228_v24 = vsub.f32 %v5132_v33, %v2538_v59  ;;  %v2589_v16 = vsel %vm2482_vm4, %v2567_v13, 0.0  ;;  %v2592_v54 = vsel %vm2482_vm4, %v2568_v30, 0.0 }
 0x627   : > { %2590 = vadd.xlane.f32.xlu0 %v2589_v16  ;;  %v2506_v49 = vpop.xlane.xlu0 %2505  ;;  %2593 = vadd.xlane.f32.xlu1 %v2592_v54  ;;  %v2509_v23 = vpop.xlane.xlu1 %2508 }
 0x628   : > { %v2539_v32 = vmul.f32 0.03125, %v2506_v49  ;;  %v2540_v18 = vmul.f32 0.03125, %v2509_v23  ;;  %v2569_v40 = vmul.f32 %v5225_v14, %v5225_v14  ;;  %v2570_v62 = vmul.f32 %v5228_v24, %v5228_v24 }
 0x629   : > { %v5746_v49 = vsub.s32 6, %v5737_v43 }
 0x62a   : > { %v5237_v37 = vsub.f32 %v5136_v28, %v2539_v32  ;;  %v5240_v33 = vsub.f32 %v5150_v2, %v2540_v18  ;;  %v2595_v58 = vsel %vm2482_vm4, %v2569_v40, 0.0  ;;  %v2598_v57 = vsel %vm2482_vm4, %v2570_v62, 0.0 }
 0x62b   : > { %2596 = vadd.xlane.f32.xlu0 %v2595_v58  ;;  %v2512_v3 = vpop.xlane.xlu0 %2511  ;;  %2599 = vadd.xlane.f32.xlu1 %v2598_v57  ;;  %v2515_v50 = vpop.xlane.xlu1 %2514  ;;  %v5302_v23 = vrot.slane %v4910_v25, %v5746_v49 }
 0x62c   : > { %v2541_v26 = vmul.f32 0.03125, %v2512_v3  ;;  %v2542_v22 = vmul.f32 0.03125, %v2515_v50  ;;  %v2571_v47 = vmul.f32 %v5237_v37, %v5237_v37  ;;  %v2572_v28 = vmul.f32 %v5240_v33, %v5240_v33 }
 0x62e   : > { %v5249_v55 = vsub.f32 %v5155_v48, %v2541_v26  ;;  %v5252_v2 = vsub.f32 %v5163_v29, %v2542_v22  ;;  %v2601_v6 = vsel %vm2482_vm4, %v2571_v47, 0.0  ;;  %v2604_v15 = vsel %vm2482_vm4, %v2572_v28, 0.0 }
 0x62f   : > { %2602 = vadd.xlane.f32.xlu0 %v2601_v6  ;;  %v2518_v9 = vpop.xlane.xlu0 %2517  ;;  %2605 = vadd.xlane.f32.xlu1 %v2604_v15  ;;  %v2521_v63 = vpop.xlane.xlu1 %2520 }
 0x630   : > { %v2543_v4 = vmul.f32 0.03125, %v2518_v9  ;;  %v2544_v35 = vmul.f32 0.03125, %v2521_v63  ;;  %v2573_v52 = vmul.f32 %v5249_v55, %v5249_v55  ;;  %v2574_v48 = vmul.f32 %v5252_v2, %v5252_v2 }
 0x632   : > { %v5261_v1 = vsub.f32 %v5169_v5, %v2543_v4  ;;  %v5264_v29 = vsub.f32 %v5175_v7, %v2544_v35  ;;  %v2607_v12 = vsel %vm2482_vm4, %v2573_v52, 0.0  ;;  %v2610_v20 = vsel %vm2482_vm4, %v2574_v48, 0.0 }
 0x633   : > { %2608 = vadd.xlane.f32.xlu0 %v2607_v12  ;;  %v2524_v39 = vpop.xlane.xlu0 %2523  ;;  %2611 = vadd.xlane.f32.xlu1 %v2610_v20  ;;  %v2527_v31 = vpop.xlane.xlu1 %2526 }
 0x634   : > { %v2545_v17 = vmul.f32 0.03125, %v2524_v39  ;;  %v2546_v46 = vmul.f32 0.03125, %v2527_v31  ;;  %v2575_v41 = vmul.f32 %v5261_v1, %v5261_v1  ;;  %v2576_v5 = vmul.f32 %v5264_v29, %v5264_v29 }
 0x636   : > { %v5273_v0 = vsub.f32 %v5182_v56, %v2545_v17  ;;  %v5276_v7 = vsub.f32 %v5185_v21, %v2546_v46  ;;  %v2613_v36 = vsel %vm2482_vm4, %v2575_v41, 0.0  ;;  %v2616_v53 = vsel %vm2482_vm4, %v2576_v5, 0.0 }
 0x637   : > { %2614 = vadd.xlane.f32.xlu0 %v2613_v36  ;;  %v2530_v45 = vpop.xlane.xlu0 %2529  ;;  %2617 = vadd.xlane.f32.xlu1 %v2616_v53 }
 0x638   : > { %v2547_v19 = vmul.f32 0.03125, %v2530_v45  ;;  %v2577_v27 = vmul.f32 %v5273_v0, %v5273_v0  ;;  %v2578_v11 = vmul.f32 %v5276_v7, %v5276_v7 }
 0x63a   : > { %v5285_v56 = vsub.f32 %v5192_v44, %v2547_v19  ;;  %v2619_v21 = vsel %vm2482_vm4, %v2577_v27, 0.0  ;;  %v2622_v51 = vsel %vm2482_vm4, %v2578_v11, 0.0  ;;  %v5745_v44 = vsub.s32 5, %v5737_v43 }
 0x63b   : > { %2620 = vadd.xlane.f32.xlu0 %v2619_v21  ;;  %2623 = vadd.xlane.f32.xlu1 %v2622_v51 }
 0x63c   : > { %v2579_v42 = vmul.f32 %v5285_v56, %v5285_v56  ;;  %v5297_v16 = vrot.slane %v4910_v25, %v5745_v44 }
 0x63e   : > { %v2625_v61 = vsel %vm2482_vm4, %v2579_v42, 0.0 }
 0x63f   : > { %2626 = vadd.xlane.f32.xlu0 %v2625_v61 }
 0x693   : > { %v2582_v59 = vpop.xlane.xlu1 %2581 }
 0x694   : > { %v2628_v13 = vmul.f32 0.03125, %v2582_v59 }
 0x696   : > { %v2644_v30 = vadd.f32 1e-05, %v2628_v13 }
 0x698   : > { %3079 = vrsqrt.f32 %v2644_v30 }
 0x6a2   : > { %v3080_v54 = vpop.eup %3079 }
 0x6a3   : > { %v2676_v32 = vmul.f32 %v3080_v54, %v5197_v38 }
 0x6a5   : > { %v2696_v18 = vmul.f32 %v5297_v16, %v2676_v32 }
 0x6a7   : > { %v2716_v40 = vadd.f32 %v5302_v23, %v2696_v18 }
 0x6a9   : > { %2732 = vst.msk [vmem:[%s5309_s8] sm:$0xff] %vm2482_vm4, %v2716_v40 }
 0x6ac   : > { %v2585_v62 = vpop.xlane.xlu0 %2584 }
 0x6ad   : > { %v2629_v58 = vmul.f32 0.03125, %v2585_v62 }
 0x6af   : > { %v2645_v43 = vadd.f32 1e-05, %v2629_v58 }
 0x6b0   : > { %v2588_v57 = vpop.xlane.xlu1 %2587 }
 0x6b1   : > { %3081 = vrsqrt.f32 %v2645_v43  ;;  %v2630_v25 = vmul.f32 0.03125, %v2588_v57 }
 0x6b3   : > { %v2646_v3 = vadd.f32 1e-05, %v2630_v25 }
 0x6b4   : > { %v2591_v38 = vpop.xlane.xlu0 %2590  ;;  %v2594_v50 = vpop.xlane.xlu1 %2593 }
 0x6b5   : > { %3083 = vrsqrt.f32 %v2646_v3  ;;  %v2631_v26 = vmul.f32 0.03125, %v2591_v38  ;;  %v2632_v22 = vmul.f32 0.03125, %v2594_v50 }
 0x6b7   : > { %v2647_v47 = vadd.f32 1e-05, %v2631_v26  ;;  %v2648_v28 = vadd.f32 1e-05, %v2632_v22 }
 0x6b8   : > { %v2597_v6 = vpop.xlane.xlu0 %2596  ;;  %v2600_v15 = vpop.xlane.xlu1 %2599 }
 0x6b9   : > { %3085 = vrsqrt.f32 %v2647_v47  ;;  %v2633_v9 = vmul.f32 0.03125, %v2597_v6  ;;  %v2634_v63 = vmul.f32 0.03125, %v2600_v15 }
 0x6ba   : > { %3087 = vrsqrt.f32 %v2648_v28 }
 0x6bb   : > { %v3082_v4 = vpop.eup %3081  ;;  %v2649_v35 = vadd.f32 1e-05, %v2633_v9  ;;  %v2650_v52 = vadd.f32 1e-05, %v2634_v63 }
 0x6bc   : > { %v2677_v48 = vmul.f32 %v3082_v4, %v5203_v34  ;;  %v2603_v12 = vpop.xlane.xlu0 %2602  ;;  %v2606_v20 = vpop.xlane.xlu1 %2605 }
 0x6bd   : > { %3089 = vrsqrt.f32 %v2649_v35  ;;  %v2635_v39 = vmul.f32 0.03125, %v2603_v12  ;;  %v2636_v31 = vmul.f32 0.03125, %v2606_v20 }
 0x6be   : > { %v2697_v17 = vmul.f32 %v5297_v16, %v2677_v48  ;;  %3091 = vrsqrt.f32 %v2650_v52 }
 0x6bf   : > { %v3084_v46 = vpop.eup %3083  ;;  %v2651_v41 = vadd.f32 1e-05, %v2635_v39  ;;  %v2652_v5 = vadd.f32 1e-05, %v2636_v31 }
 0x6c0   : > { %v2717_v36 = vadd.f32 %v5302_v23, %v2697_v17  ;;  %v2678_v53 = vmul.f32 %v3084_v46, %v5208_v60  ;;  %v2609_v45 = vpop.xlane.xlu0 %2608  ;;  %v2612_v19 = vpop.xlane.xlu1 %2611 }
 0x6c1   : > { %3093 = vrsqrt.f32 %v2651_v41  ;;  %v2637_v34 = vmul.f32 0.03125, %v2609_v45  ;;  %v2638_v27 = vmul.f32 0.03125, %v2612_v19 }
 0x6c2   : > { %2733 = vst.msk [vmem:[%s5309_s8 + $0x8] sm:$0xff] %vm2482_vm4, %v2717_v36  ;;  %v2698_v11 = vmul.f32 %v5297_v16, %v2678_v53  ;;  %3095 = vrsqrt.f32 %v2652_v5 }
 0x6c3   : > { %v3086_v21 = vpop.eup %3085  ;;  %v2653_v51 = vadd.f32 1e-05, %v2637_v34  ;;  %v2654_v42 = vadd.f32 1e-05, %v2638_v27 }
 0x6c4   : > { %v3088_v61 = vpop.eup %3087  ;;  %v2718_v59 = vadd.f32 %v5302_v23, %v2698_v11  ;;  %v2679_v13 = vmul.f32 %v3086_v21, %v5214_v10  ;;  %v2615_v60 = vpop.xlane.xlu0 %2614 }
 0x6c5   : > { %v2618_v30 = vpop.xlane.xlu1 %2617  ;;  %v2680_v44 = vmul.f32 %v3088_v61, %v5217_v8  ;;  %3097 = vrsqrt.f32 %v2653_v51  ;;  %v2639_v54 = vmul.f32 0.03125, %v2615_v60 }
 0x6c6   : > { %v2640_v49 = vmul.f32 0.03125, %v2618_v30  ;;  %2734 = vst.msk [vmem:[%s5309_s8 + $0x10] sm:$0xff] %vm2482_vm4, %v2718_v59  ;;  %v2699_v32 = vmul.f32 %v5297_v16, %v2679_v13  ;;  %3099 = vrsqrt.f32 %v2654_v42 }
 0x6c7   : > { %v3090_v18 = vpop.eup %3089  ;;  %v2700_v40 = vmul.f32 %v5297_v16, %v2680_v44  ;;  %v2655_v62 = vadd.f32 1e-05, %v2639_v54 }
 0x6c8   : > { %v2656_v58 = vadd.f32 1e-05, %v2640_v49  ;;  %v3092_v10 = vpop.eup %3091  ;;  %v2719_v43 = vadd.f32 %v5302_v23, %v2699_v32  ;;  %v2681_v8 = vmul.f32 %v3090_v18, %v5225_v14  ;;  %v2621_v57 = vpop.xlane.xlu0 %2620 }
 0x6c9   : > { %v2624_v25 = vpop.xlane.xlu1 %2623  ;;  %v2720_v3 = vadd.f32 %v5302_v23, %v2700_v40  ;;  %v2682_v38 = vmul.f32 %v3092_v10, %v5228_v24  ;;  %3101 = vrsqrt.f32 %v2655_v62  ;;  %v2641_v50 = vmul.f32 0.03125, %v2621_v57 }
 0x6ca   : > { %2735 = vst.msk [vmem:[%s5309_s8 + $0x18] sm:$0xff] %vm2482_vm4, %v2719_v43  ;;  %v2701_v26 = vmul.f32 %v5297_v16, %v2681_v8  ;;  %3103 = vrsqrt.f32 %v2656_v58  ;;  %v2642_v22 = vmul.f32 0.03125, %v2624_v25 }
 0x6cb   : > { %v3094_v47 = vpop.eup %3093  ;;  %2736 = vst.msk [vmem:[%s5309_s8 + $0x20] sm:$0xff] %vm2482_vm4, %v2720_v3  ;;  %v2702_v14 = vmul.f32 %v5297_v16, %v2682_v38  ;;  %v2657_v28 = vadd.f32 1e-05, %v2641_v50 }
 0x6cc   : > { %v3096_v6 = vpop.eup %3095  ;;  %v2721_v15 = vadd.f32 %v5302_v23, %v2701_v26  ;;  %v2683_v24 = vmul.f32 %v3094_v47, %v5237_v37  ;;  %v2658_v9 = vadd.f32 1e-05, %v2642_v22  ;;  %v2627_v63 = vpop.xlane.xlu0 %2626 }
 0x6cd   : > { %v2722_v4 = vadd.f32 %v5302_v23, %v2702_v14  ;;  %v2684_v35 = vmul.f32 %v3096_v6, %v5240_v33  ;;  %3105 = vrsqrt.f32 %v2657_v28  ;;  %v2643_v52 = vmul.f32 0.03125, %v2627_v63 }
 0x6ce   : > { %2737 = vst.msk [vmem:[%s5309_s8 + $0x28] sm:$0xff] %vm2482_vm4, %v2721_v15  ;;  %v2703_v48 = vmul.f32 %v5297_v16, %v2683_v24  ;;  %3107 = vrsqrt.f32 %v2658_v9 }
 0x6cf   : > { %v3098_v12 = vpop.eup %3097  ;;  %2738 = vst.msk [vmem:[%s5309_s8 + $0x30] sm:$0xff] %vm2482_vm4, %v2722_v4  ;;  %v2704_v37 = vmul.f32 %v5297_v16, %v2684_v35  ;;  %v2659_v20 = vadd.f32 1e-05, %v2643_v52 }
 0x6d0   : > { %v3100_v39 = vpop.eup %3099  ;;  %v2723_v31 = vadd.f32 %v5302_v23, %v2703_v48  ;;  %v2685_v33 = vmul.f32 %v3098_v12, %v5249_v55 }
 0x6d1   : > { %v2724_v17 = vadd.f32 %v5302_v23, %v2704_v37  ;;  %v2686_v46 = vmul.f32 %v3100_v39, %v5252_v2  ;;  %3109 = vrsqrt.f32 %v2659_v20 }
 0x6d2   : > { %2739 = vst.msk [vmem:[%s5309_s8 + $0x38] sm:$0xff] %vm2482_vm4, %v2723_v31  ;;  %v2705_v41 = vmul.f32 %v5297_v16, %v2685_v33 }
 0x6d3   : > { %v3102_v5 = vpop.eup %3101  ;;  %2740 = vst.msk [vmem:[%s5309_s8 + $0x40] sm:$0xff] %vm2482_vm4, %v2724_v17  ;;  %v2706_v36 = vmul.f32 %v5297_v16, %v2686_v46 }
 0x6d4   : > { %v3104_v53 = vpop.eup %3103  ;;  %v2725_v45 = vadd.f32 %v5302_v23, %v2705_v41  ;;  %v2687_v55 = vmul.f32 %v3102_v5, %v5261_v1 }
 0x6d5   : > { %v2726_v19 = vadd.f32 %v5302_v23, %v2706_v36  ;;  %v2688_v2 = vmul.f32 %v3104_v53, %v5264_v29 }
 0x6d6   : > { %2741 = vst.msk [vmem:[%s5309_s8 + $0x48] sm:$0xff] %vm2482_vm4, %v2725_v45  ;;  %v2707_v34 = vmul.f32 %v5297_v16, %v2687_v55 }
 0x6d7   : > { %v3106_v27 = vpop.eup %3105  ;;  %2742 = vst.msk [vmem:[%s5309_s8 + $0x50] sm:$0xff] %vm2482_vm4, %v2726_v19  ;;  %v2708_v11 = vmul.f32 %v5297_v16, %v2688_v2 }
 0x6d8   : > { %v3108_v21 = vpop.eup %3107  ;;  %v2727_v51 = vadd.f32 %v5302_v23, %v2707_v34  ;;  %v2689_v1 = vmul.f32 %v3106_v27, %v5273_v0 }
 0x6d9   : > { %v2728_v42 = vadd.f32 %v5302_v23, %v2708_v11  ;;  %v2690_v29 = vmul.f32 %v3108_v21, %v5276_v7 }
 0x6da   : > { %2743 = vst.msk [vmem:[%s5309_s8 + $0x58] sm:$0xff] %vm2482_vm4, %v2727_v51  ;;  %v2709_v61 = vmul.f32 %v5297_v16, %v2689_v1 }
 0x6db   : > { %v3110_v59 = vpop.eup %3109  ;;  %2744 = vst.msk [vmem:[%s5309_s8 + $0x60] sm:$0xff] %vm2482_vm4, %v2728_v42  ;;  %v2710_v13 = vmul.f32 %v5297_v16, %v2690_v29 }
 0x6dc   : > { %v2729_v60 = vadd.f32 %v5302_v23, %v2709_v61  ;;  %v2691_v30 = vmul.f32 %v3110_v59, %v5285_v56 }
 0x6dd   : > { %v2730_v44 = vadd.f32 %v5302_v23, %v2710_v13 }
 0x6de   : > { %2745 = vst.msk [vmem:[%s5309_s8 + $0x68] sm:$0xff] %vm2482_vm4, %v2729_v60  ;;  %v2711_v0 = vmul.f32 %v5297_v16, %v2691_v30 }
 0x6df   : > { %2746 = vst.msk [vmem:[%s5309_s8 + $0x70] sm:$0xff] %vm2482_vm4, %v2730_v44 }
 0x6e0   : > { %v2731_v7 = vadd.f32 %v5302_v23, %v2711_v0 }
 0x6e2   : > { %2747 = vst.msk [vmem:[%s5309_s8 + $0x78] sm:$0xff] %vm2482_vm4, %v2731_v7 }
 0x6e3 PF: > { %p14_p6 = scmp.ge.s32.totalorder %s3382_s29, 4   ;;  %s5747_s12 = smov %s3230_s13 }
 0x6e4   : > { %s5748_s13 = smov %s3234_s14  ;;  %s5749_s14 = smov %s3393_s5 }
 0x6e5   : > { %s5750_s15 = smov %s3382_s29  ;;  %16 = sbr.rel (!%p14_p6) target bundleno = 4 (0x4), region = 80 }
 0x6ec   :  { %2770 = vsyncpa [#allocation3], 1 }
 0x6ed   :  { %2772 = vsyncpa [#allocation3 + $0x1], 1 }
 0x6ee   :  { %2773 = vsyncpa [#allocation5], 1 }

</bundles_post_ra>
